<compile_context>
chip_gen: v6e
topology: v6e:2x2x1
jax: 0.10.0
libtpu: 0.0.40
codegen_flags: <defaults>
</compile_context>

<pallas_src>
import jax
import jax.numpy as jnp
from jax.experimental import pallas as pl
from jax.experimental.pallas import tpu as pltpu


# ---------------------------------------------------------------------------
# Small helpers
# ---------------------------------------------------------------------------
def _round_up(x, m):
    return (x + m - 1) // m * m


def _default_vmem_limit():
    try:
        cap = pltpu.get_tpu_info().vmem_capacity_bytes
    except Exception:
        cap = 128 * 1024 * 1024
    return int(min(96 * 1024 * 1024, max(32 * 1024 * 1024, cap // 2)))


_VMEM_LIMIT = _default_vmem_limit()


def _divisor_tile(dim, pref, align):
    """Pick a tile for one block dim: largest t <= pref that divides dim and is a
    multiple of `align` (or equals the full dim).  Returns (tile, padded_dim); padding
    is only used as a rare fallback when no aligned divisor exists."""
    if dim <= pref:
        return dim, dim                       # full-dim block: always layout-legal
    t = (pref // align) * align
    while t >= align:
        if dim % t == 0:
            return t, dim
        t -= align
    t = (pref // align) * align
    return t, _round_up(dim, t)


def _alpha_rows(alpha, cout):
    """PReLU negative-slope vector per output channel (handles scalar or per-channel)."""
    if alpha is None:
        return None
    a = jnp.asarray(alpha, jnp.float32).reshape(-1)
    if a.shape[0] == 1:
        a = jnp.broadcast_to(a, (cout,))
    return a


# ---------------------------------------------------------------------------
# Pallas kernels
# ---------------------------------------------------------------------------
def _matmul_rows(a, b, bias=None, alpha=None, out_scale=1.0, out_dtype=jnp.float32):
    """Batched fused GEMM, channel-major:
         out[n] = PReLU_alpha((a[n or 0] @ b[n] + bias) * out_scale)
       a: (BA, R, K) with BA in {1, B} (BA==1 -> shared weights), rows R = output channels,
       b: (B, K, M) with M = spatial extent on the lane axis (lane-dense output),
       bias/alpha: (R,) or None.  f32 MXU accumulation, bf16 inputs.  Returns (B, R, M)."""
    BA, R, K = a.shape
    Bb, K2, M = b.shape
    assert K2 == K and BA in (1, Bb)
    use_bias = bias is not None
    use_act = alpha is not None

    a = a.astype(jnp.bfloat16)
    b = b.astype(jnp.bfloat16)

    # K: single block whenever it fits; only tile + zero-pad for very large contractions.
    if K <= 2048:
        tk, Kp = K, K
    else:
        tk = 512
        Kp = _round_up(K, tk)
        a = jnp.pad(a, ((0, 0), (0, 0), (0, Kp - K)))
        b = jnp.pad(b, ((0, 0), (0, Kp - K), (0, 0)))
    kt = Kp // tk

    # Lane-dense column (spatial) tile — exact divisor in the common path.
    tc, Mp = _divisor_tile(M, 512, 128)
    if Bb == 1 and Mp // tc < 2 and tc % 2 == 0 and (tc // 2) % 128 == 0:
        tc //= 2                              # keep >=2 parallel blocks (v7x: 2 TCs)
    if Mp != M:
        b = jnp.pad(b, ((0, 0), (0, 0), (0, Mp - M)))

    bias_col = (jnp.zeros((R, 1), jnp.float32) if bias is None
                else jnp.asarray(bias, jnp.float32).reshape(R, 1))
    alpha_col = (jnp.zeros((R, 1), jnp.float32) if alpha is None
                 else jnp.asarray(alpha, jnp.float32).reshape(R, 1))

    def finalize(acc, bias_ref, alpha_ref):
        if use_bias:
            acc = acc + bias_ref[...]
        if out_scale != 1.0:
            acc = acc * out_scale
        if use_act:
            acc = jnp.where(acc > 0, acc, alpha_ref[...] * acc)   # per-row PReLU
        return acc

    a_idx = (lambda bb, j, k: (0, 0, k)) if BA == 1 else (lambda bb, j, k: (bb, 0, k))

    if kt == 1:
        def kernel(a_ref, b_ref, bias_ref, alpha_ref, o_ref):
            acc = jnp.dot(a_ref[0], b_ref[0], preferred_element_type=jnp.float32)
            o_ref[0] = finalize(acc, bias_ref, alpha_ref).astype(o_ref.dtype)
        scratch = []
    else:
        def kernel(a_ref, b_ref, bias_ref, alpha_ref, o_ref, acc_ref):
            kk = pl.program_id(2)

            @pl.when(kk == 0)
            def _():
                acc_ref[...] = jnp.zeros_like(acc_ref)

            acc_ref[...] += jnp.dot(a_ref[0], b_ref[0],
                                    preferred_element_type=jnp.float32)

            @pl.when(kk == kt - 1)
            def _():
                o_ref[0] = finalize(acc_ref[...], bias_ref,
                                    alpha_ref).astype(o_ref.dtype)
        scratch = [pltpu.VMEM((R, tc), jnp.float32)]

    out = pl.pallas_call(
        kernel,
        out_shape=jax.ShapeDtypeStruct((Bb, R, Mp), out_dtype),
        grid=(Bb, Mp // tc, kt),
        in_specs=[
            pl.BlockSpec((1, R, tk), a_idx),
            pl.BlockSpec((1, tk, tc), lambda bb, j, k: (bb, k, j)),
            pl.BlockSpec((R, 1), lambda bb, j, k: (0, 0)),
            pl.BlockSpec((R, 1), lambda bb, j, k: (0, 0)),
        ],
        out_specs=pl.BlockSpec((1, R, tc), lambda bb, j, k: (bb, 0, j)),
        scratch_shapes=scratch,
        compiler_params=pltpu.CompilerParams(
            dimension_semantics=("parallel", "parallel", "arbitrary"),
            vmem_limit_bytes=_VMEM_LIMIT),
        cost_estimate=pl.CostEstimate(
            flops=2 * Bb * R * Mp * Kp,
            transcendentals=0,
            bytes_accessed=2 * (max(BA, Bb) * R * Kp + Bb * Kp * Mp)
                           + Bb * R * Mp * jnp.dtype(out_dtype).itemsize),
    )(a, b, bias_col, alpha_col)
    return out[:, :, :M] if Mp != M else out


def _csa_match(wn, patches, out_dtype=jnp.bfloat16):
    """CrossScaleAttention matching: softmax over filters of (wn[b] @ patches[b]).
       wn: (B, L, K1) normalized filters (L2-norm and softmax_scale pre-folded),
       patches: (B, K1, M).  Scores are channel-major (filters on sublanes, spatial on
       lanes), softmax is over the filter (sublane) axis.  Returns (B, L, M)."""
    B, L, K1 = wn.shape
    B2, K2, M = patches.shape
    assert B == B2 and K1 == K2

    tc, Mp = _divisor_tile(M, 512, 128)
    while L * tc * 4 > (2 << 20) and tc % 256 == 0:   # keep the f32 score block modest
        tc //= 2
    if Mp != M:
        patches = jnp.pad(patches, ((0, 0), (0, 0), (0, Mp - M)))
    wn = wn.astype(jnp.bfloat16)
    patches = patches.astype(jnp.bfloat16)

    def kernel(w_ref, p_ref, o_ref):
        s = jnp.dot(w_ref[0], p_ref[0], preferred_element_type=jnp.float32)
        m = jnp.max(s, axis=0, keepdims=True)
        e = jnp.exp(s - m)
        inv = pl.reciprocal(jnp.sum(e, axis=0, keepdims=True), approx=True)
        o_ref[0] = (e * inv).astype(o_ref.dtype)

    out = pl.pallas_call(
        kernel,
        out_shape=jax.ShapeDtypeStruct((B, L, Mp), out_dtype),
        grid=(B, Mp // tc),
        in_specs=[pl.BlockSpec((1, L, K1), lambda b, j: (b, 0, 0)),
                  pl.BlockSpec((1, K1, tc), lambda b, j: (b, 0, j))],
        out_specs=pl.BlockSpec((1, L, tc), lambda b, j: (b, 0, j)),
        compiler_params=pltpu.CompilerParams(
            dimension_semantics=("parallel", "parallel"),
            vmem_limit_bytes=_VMEM_LIMIT),
        cost_estimate=pl.CostEstimate(
            flops=2 * B * L * Mp * K1,
            transcendentals=B * L * Mp,
            bytes_accessed=2 * B * (L * K1 + K1 * Mp + L * Mp)),
    )(wn, patches)
    return out[:, :, :M] if Mp != M else out


def _nla_flash(q, k, v, out_dtype=jnp.bfloat16):
    """NonLocalAttention core: softmax(q @ k, axis=-1) @ v, flash-style (kv tiled with
       online softmax) so the (HW, HW) score matrix never lives in VMEM at once.
       q: (B, HW, C2), k: (B, C2, HW), v: (B, HW, C).  Returns (B, HW, C)."""
    B, HW, C2 = q.shape
    C = v.shape[-1]

    tq, HWq = _divisor_tile(HW, 128, 16)      # modest q tile -> no vreg spill pressure
    tkv, HWk = _divisor_tile(HW, 512, 128)

    q = q.astype(jnp.bfloat16)
    k = k.astype(jnp.bfloat16)
    v = v.astype(jnp.bfloat16)
    if HWq != HW:
        q = jnp.pad(q, ((0, 0), (0, HWq - HW), (0, 0)))
    mask_keys = HWk != HW                      # trace-time: never true for divisor tiles
    if mask_keys:
        k = jnp.pad(k, ((0, 0), (0, 0), (0, HWk - HW)))
        v = jnp.pad(v, ((0, 0), (0, HWk - HW), (0, 0)))

    def kernel(q_ref, k_ref, v_ref, o_ref, m_sc, l_sc, acc_sc):
        kv = pl.program_id(2)

        @pl.when(kv == 0)
        def _():
            m_sc[...] = jnp.full_like(m_sc, -jnp.inf)
            l_sc[...] = jnp.zeros_like(l_sc)
            acc_sc[...] = jnp.zeros_like(acc_sc)

        s = jnp.dot(q_ref[0], k_ref[0], preferred_element_type=jnp.float32)
        if mask_keys:                          # only emitted when HW % tkv != 0
            col = kv * tkv + jax.lax.broadcasted_iota(jnp.int32, s.shape, 1)
            s = jnp.where(col < HW, s, -jnp.inf)

        m_new = jnp.maximum(m_sc[...], jnp.max(s, axis=-1, keepdims=True))
        corr = jnp.exp(m_sc[...] - m_new)
        p = jnp.exp(s - m_new)
        l_sc[...] = corr * l_sc[...] + jnp.sum(p, axis=-1, keepdims=True)
        acc_sc[...] = corr * acc_sc[...] + jnp.dot(
            p.astype(jnp.bfloat16), v_ref[0], preferred_element_type=jnp.float32)
        m_sc[...] = m_new

        @pl.when(kv == pl.num_programs(2) - 1)
        def _():
            o_ref[0] = (acc_sc[...] *
                        pl.reciprocal(l_sc[...], approx=True)).astype(o_ref.dtype)

    out = pl.pallas_call(
        kernel,
        out_shape=jax.ShapeDtypeStruct((B, HWq, C), out_dtype),
        grid=(B, HWq // tq, HWk // tkv),
        in_specs=[pl.BlockSpec((1, tq, C2), lambda b, i, j: (b, i, 0)),
                  pl.BlockSpec((1, C2, tkv), lambda b, i, j: (b, 0, j)),
                  pl.BlockSpec((1, tkv, C), lambda b, i, j: (b, j, 0))],
        out_specs=pl.BlockSpec((1, tq, C), lambda b, i, j: (b, i, 0)),
        scratch_shapes=[pltpu.VMEM((tq, 1), jnp.float32),
                        pltpu.VMEM((tq, 1), jnp.float32),
                        pltpu.VMEM((tq, C), jnp.float32)],
        compiler_params=pltpu.CompilerParams(
            dimension_semantics=("parallel", "parallel", "arbitrary"),
            vmem_limit_bytes=_VMEM_LIMIT),
        cost_estimate=pl.CostEstimate(
            flops=2 * B * HWq * HWk * (C2 + C),
            transcendentals=2 * B * HWq * HWk,
            bytes_accessed=2 * B * (HWq * C2 + C2 * HWk + HWk * C + HWq * C)),
    )(q, k, v)
    return out[:, :HW, :] if HWq != HW else out


# ---------------------------------------------------------------------------
# Plain-JAX glue (padding, channel-major im2col) — no heavy compute here.
# ---------------------------------------------------------------------------
def _same_pad_amounts(H, W, kh, kw, sh, sw):
    out_h = (H + sh - 1) // sh
    out_w = (W + sw - 1) // sw
    ph = max(0, (out_h - 1) * sh + kh - H)
    pw = max(0, (out_w - 1) * sw + kw - W)
    return ph // 2, ph - ph // 2, pw // 2, pw - pw // 2


def _im2col_cm(x, kh, kw, stride, pads):
    """Channel-major im2col: x NCHW, pads=(top,bottom,left,right).
       Returns (N, C*kh*kw, oh*ow) with row order c*kh*kw + i*kw + j (== torch Unfold /
       Conv2d weight flattening) and spatial positions row-major on the lane axis."""
    pt, pb, plft, pr = pads
    x = jnp.pad(x, ((0, 0), (0, 0), (pt, pb), (plft, pr)))
    N, C, Hp, Wp = x.shape
    oh = (Hp - kh) // stride + 1
    ow = (Wp - kw) // stride + 1
    cols = []
    for i in range(kh):
        for j in range(kw):
            cols.append(x[:, :, i:i + stride * oh:stride, j:j + stride * ow:stride])
    p = jnp.stack(cols, axis=2)                      # (N, C, kh*kw, oh, ow)
    return p.reshape(N, C * kh * kw, oh * ow), oh, ow


def conv2d(x, w, b=None, alpha=None, stride=1, padding=0, out_scale=1.0,
           out_dtype=jnp.float32):
    """torch F.conv2d (NCHW, weight (Cout,Cin,kh,kw)) + optional bias/PReLU, lowered to
       one channel-major Pallas GEMM (Cout rows, spatial lanes)."""
    N = x.shape[0]
    Cout, Cin, kh, kw = w.shape
    patches, oh, ow = _im2col_cm(x.astype(jnp.bfloat16), kh, kw, stride,
                                 (padding,) * 4)
    A = w.reshape(1, Cout, Cin * kh * kw)
    out = _matmul_rows(A, patches, bias=b, alpha=_alpha_rows(alpha, Cout),
                       out_scale=out_scale, out_dtype=out_dtype)
    return out.reshape(N, Cout, oh, ow)


def conv_transpose2d_s2(x, w, b=None, alpha=None, out_dtype=jnp.float32):
    """nn.ConvTranspose2d(Cin, Cout, 6, stride=2, padding=2) (+ optional PReLU),
       decomposed into 4 sub-pixel 3x3 convolutions (one fused Pallas GEMM) followed by
       a pixel shuffle — exact equivalence, no zero-dilated MACs."""
    Cin, Cout, kh, kw = w.shape
    assert kh == 6 and kw == 6
    subs = []
    for dy in range(2):
        for dx in range(2):
            ws = jnp.flip(w[:, :, dy::2, dx::2], axis=(2, 3)).transpose(1, 0, 2, 3)
            subs.append(ws)                                   # (Cout, Cin, 3, 3)
    w_st = jnp.concatenate(subs, axis=0)                      # (4*Cout, Cin, 3, 3)
    b_st = None if b is None else jnp.tile(jnp.asarray(b).reshape(-1), 2 * 2)
    a_st = None if alpha is None else jnp.tile(_alpha_rows(alpha, Cout), 2 * 2)
    y = conv2d(x, w_st, b_st, a_st, stride=1, padding=1, out_dtype=out_dtype)
    N, _, H, W = y.shape
    y = y.reshape(N, 2, 2, Cout, H, W).transpose(0, 3, 4, 1, 5, 2)
    return y.reshape(N, Cout, 2 * H, 2 * W)


def conv1x1_fused(x, branches, out_dtype=jnp.bfloat16):
    """Several ConvBlock(...,1,1,0,'prelu') sharing the same input, fused into one
       Pallas GEMM (weights/bias/PReLU-alpha concatenated along the Cout rows).
       No im2col / transpose needed: the 1x1-conv patch matrix is just x.reshape."""
    N, Cin, H, W = x.shape
    bmat = x.astype(jnp.bfloat16).reshape(N, Cin, H * W)
    ws, bs, als, couts = [], [], [], []
    for w, b, al in branches:
        cout = w.shape[0]
        couts.append(cout)
        ws.append(w.reshape(cout, Cin))
        bs.append(jnp.asarray(b).reshape(-1))
        als.append(_alpha_rows(al, cout))
    A = jnp.concatenate(ws, axis=0)[None]                     # (1, sum(Cout), Cin)
    bc = jnp.concatenate(bs, axis=0)
    ac = jnp.concatenate(als, axis=0)
    out = _matmul_rows(A, bmat, bias=bc, alpha=ac, out_dtype=out_dtype)
    outs, off = [], 0
    for cout in couts:
        outs.append(out[:, off:off + cout, :].reshape(N, cout, H, W))
        off += cout
    return outs


# ---------------------------------------------------------------------------
# Module forwards
# ---------------------------------------------------------------------------
def cross_scale_attention(x, p, ksize=3, scale=2, softmax_scale=10.0, escape_nan=1e-4):
    N, C, H, W = x.shape
    embed_w, match_in = conv1x1_fused(
        x, [(p['ca_w'], p['ca_b'], p['ca_a']),
            (p['cm1_w'], p['cm1_b'], p['cm1_a'])])
    kernel = scale * ksize

    # Raw deconv filters: one (C, 6, 6) patch of embed_w per low-res position.
    pads = _same_pad_amounts(H, W, kernel, kernel, scale, scale)
    rawp, roh, row_ = _im2col_cm(embed_w, kernel, kernel, scale, pads)   # (N, C*36, L)
    L = roh * row_
    raw = rawp.reshape(N, C, kernel, kernel, L).transpose(0, 4, 1, 2, 3)  # (N,L,C,6,6)

    # F.interpolate(scale_factor=1/2, mode='bilinear', align_corners=False) on even
    # spatial dims is exactly 2x2 average pooling (glue, not a hot path).
    ref_in = x.reshape(N, C, H // scale, scale, W // scale, scale).mean(axis=(3, 5))
    ref, = conv1x1_fused(ref_in, [(p['cm2_w'], p['cm2_b'], p['cm2_a'])])
    Hr, Wr = H // scale, W // scale
    pads_r = _same_pad_amounts(Hr, Wr, ksize, ksize, 1, 1)
    wp, oh2, ow2 = _im2col_cm(ref, ksize, ksize, 1, pads_r)              # (N, C2*9, L2)
    L2 = oh2 * ow2
    assert L2 == L

    # Hoisted per-filter L2-norm; softmax_scale folded into the filters.
    wn = wp.transpose(0, 2, 1).astype(jnp.float32)                       # (N, L2, K1)
    nrm = jnp.maximum(jnp.sqrt(jnp.sum(wn * wn, axis=2, keepdims=True)), escape_nan)
    wn = (wn * (softmax_scale / nrm)).astype(jnp.bfloat16)

    # Correlation + softmax over filters (scores channel-major, spatial lane-dense).
    pads_x = _same_pad_amounts(H, W, ksize, ksize, 1, 1)
    xp, _, _ = _im2col_cm(match_in, ksize, ksize, 1, pads_x)             # (N, C2*9, HW)
    att = _csa_match(wn, xp)                                             # (N, L, HW) bf16

    # Sub-pixel reconstruction: conv_transpose2d(att, raw, stride=2, padding=2) / 6
    # as 4 stacked 3x3 convs (single batched Pallas GEMM) + pixel shuffle.
    subs = []
    for dy in range(scale):
        for dx in range(scale):
            ws = jnp.flip(raw[:, :, :, dy::scale, dx::scale], axis=(3, 4))  # (N,L,C,3,3)
            subs.append(ws.transpose(0, 2, 1, 3, 4).reshape(N, C, L * ksize * ksize))
    w_st = jnp.concatenate(subs, axis=1)                                 # (N, 4C, 9L)

    att_img = att.reshape(N, L, H, W)
    ap, _, _ = _im2col_cm(att_img, ksize, ksize, 1, (1, 1, 1, 1))        # (N, 9L, HW)
    y = _matmul_rows(w_st, ap, out_scale=1.0 / 6.0, out_dtype=jnp.float32)  # (N,4C,HW)
    y = y.reshape(N, scale, scale, C, H, W).transpose(0, 3, 4, 1, 5, 2)
    return y.reshape(N, C, scale * H, scale * W)


def non_local_attention(x, p, out_dtype=jnp.bfloat16):
    N, C, H, W = x.shape
    x1, x2, xa = conv1x1_fused(
        x, [(p['cm1_w'], p['cm1_b'], p['cm1_a']),
            (p['cm2_w'], p['cm2_b'], p['cm2_a']),
            (p['ca_w'], p['ca_b'], p['ca_a'])])
    C2 = x1.shape[1]
    q = x1.reshape(N, C2, H * W).transpose(0, 2, 1)           # (N, HW, C2)  (tiny)
    k = x2.reshape(N, C2, H * W)                              # (N, C2, HW)
    v = xa.reshape(N, C, H * W).transpose(0, 2, 1)            # (N, HW, C)   (tiny)
    out = _nla_flash(q, k, v, out_dtype=out_dtype)            # (N, HW, C)
    return out.transpose(0, 2, 1).reshape(N, C, H, W)


def multisource_projection(x, p):
    nla = non_local_attention(x, p['nla'])                                # bf16 NCHW
    down_map = conv_transpose2d_s2(nla, p['up_w'], p['up_b'], p['up_a'],
                                   out_dtype=jnp.float32)
    up_map = cross_scale_attention(x, p['csa'])                           # f32
    r = up_map - down_map
    # TODO(synk): ResnetBlock source was not provided; assuming the DBPN-style
    # conv3x3 -> PReLU -> conv3x3 + residual (norm=None, no post-add activation).
    h = conv2d(r, p['enc1_w'], p['enc1_b'], p['enc_a'], stride=1, padding=1,
               out_dtype=jnp.bfloat16)
    h = conv2d(h, p['enc2_w'], p['enc2_b'], None, stride=1, padding=1,
               out_dtype=jnp.float32)
    err = h + r
    return down_map + err


def recurrent_projection(x, p):
    """RecurrentProjection.forward for scale=2.  Returns (x_final, h_estimate)."""
    x_up = multisource_projection(x, p['msp'])                            # (N,C,2H,2W)
    x_down = conv2d(x_up, p['ds1_w'], p['ds1_b'], p['ds1_a'], stride=2, padding=2)
    error_up = conv_transpose2d_s2(x - x_down, p['ee_w'], p['ee_b'], p['ee_a'])
    h_estimate = x_up + error_up                                          # (N,C,2H,2W)
    x_mid = conv2d(h_estimate, p['ds2_w'], p['ds2_b'], p['ds2_a'],
                   stride=2, padding=2, out_dtype=jnp.bfloat16)
    x_final = conv2d(x_mid, p['pc_w'], p['pc_b'], p['pc_a'],
                     stride=1, padding=1, out_dtype=jnp.float32)
    return x_final, h_estimate


# ---------------------------------------------------------------------------
# Deterministic parameter initialization (synthetic weights, no checkpoint).
# ---------------------------------------------------------------------------
def init_params(key, C):
    keys = iter(jax.random.split(key, 64))

    def w(cout, cin, k):
        return jax.random.normal(next(keys), (cout, cin, k, k), jnp.float32) * 0.05

    def b(c):
        return jax.random.normal(next(keys), (c,), jnp.float32) * 0.01

    a = lambda: jnp.array([0.25], jnp.float32)        # nn.PReLU() default single param
    C2 = C // 2

    def attn():
        return dict(cm1_w=w(C2, C, 1), cm1_b=b(C2), cm1_a=a(),
                    cm2_w=w(C2, C, 1), cm2_b=b(C2), cm2_a=a(),
                    ca_w=w(C, C, 1), ca_b=b(C), ca_a=a())

    msp = dict(csa=attn(), nla=attn(),
               up_w=w(C, C, 6).transpose(1, 0, 2, 3),  # ConvTranspose2d weight (Cin,Cout,k,k)
               up_b=b(C), up_a=a(),
               enc1_w=w(C, C, 3), enc1_b=b(C),
               enc2_w=w(C, C, 3), enc2_b=b(C), enc_a=a())

    return dict(msp=msp,
                ds1_w=w(C, C, 6), ds1_b=b(C), ds1_a=a(),
                ds2_w=w(C, C, 6), ds2_b=b(C), ds2_a=a(),
                ee_w=w(C, C, 6).transpose(1, 0, 2, 3), ee_b=b(C), ee_a=a(),
                pc_w=w(C, C, 3), pc_b=b(C), pc_a=a())


if __name__ == "__main__":
    key = jax.random.PRNGKey(0)
    kx, kp = jax.random.split(key)
    N, C, H, W = 2, 8, 16, 16
    x = jax.random.normal(kx, (N, C, H, W), jnp.float32)
    params = init_params(kp, C)

    fwd = jax.jit(recurrent_projection)
    x_final, h_estimate = fwd(x, params)
    jax.block_until_ready(x_final)
    jax.block_until_ready(h_estimate)

    assert x_final.shape == (N, C, H, W), x_final.shape
    assert h_estimate.shape == (N, C, 2 * H, 2 * W), h_estimate.shape
    assert bool(jnp.all(jnp.isfinite(x_final))) and bool(jnp.all(jnp.isfinite(h_estimate)))
    print("KERNEL_OK")
</pallas_src>

<mosaic_0001>
module attributes {stable_mosaic.version = 11 : i64} {
  func.func @kernel(%arg0: i32, %arg1: i32, %arg2: i32, %arg3: memref<1x4x8xbf16, #tpu.memory_space<vmem>>, %arg4: memref<1x8x64xbf16, #tpu.memory_space<vmem>>, %arg5: memref<4x1xf32, #tpu.memory_space<vmem>>, %arg6: memref<4x1xf32, #tpu.memory_space<vmem>>, %arg7: memref<1x4x64xbf16, #tpu.memory_space<vmem>>) attributes {dimension_semantics = [#tpu.dimension_semantics<parallel>, #tpu.dimension_semantics<parallel>, #tpu.dimension_semantics<arbitrary>], iteration_bounds = array<i64: 2, 1, 1>, scalar_prefetch = 0 : i64, scratch_operands = 0 : i64, tpu.core_type = #tpu.core_type<tc>, window_params = [{transform_indices = @transform_0, window_bounds = array<i64: 1, 4, 8>}, {transform_indices = @transform_1, window_bounds = array<i64: 1, 8, 64>}, {pipeline_mode = #tpu.pipeline_mode<synchronous>, transform_indices = @transform_2, window_bounds = array<i64: 4, 1>}, {pipeline_mode = #tpu.pipeline_mode<synchronous>, transform_indices = @transform_3, window_bounds = array<i64: 4, 1>}, {transform_indices = @transform_4, window_bounds = array<i64: 1, 4, 64>}]} {
    %c0 = arith.constant 0 : index
    %c0_0 = arith.constant 0 : index
    %c0_1 = arith.constant 0 : index
    %0 = vector.load %arg3[%c0, %c0_0, %c0_1] : memref<1x4x8xbf16, #tpu.memory_space<vmem>>, vector<1x4x8xbf16>
    %1 = vector.shape_cast %0 : vector<1x4x8xbf16> to vector<4x8xbf16>
    %c0_2 = arith.constant 0 : index
    %c0_3 = arith.constant 0 : index
    %c0_4 = arith.constant 0 : index
    %2 = vector.load %arg4[%c0_2, %c0_3, %c0_4] : memref<1x8x64xbf16, #tpu.memory_space<vmem>>, vector<1x8x64xbf16>
    %3 = vector.shape_cast %2 : vector<1x8x64xbf16> to vector<8x64xbf16>
    %cst = arith.constant dense<0.000000e+00> : vector<4x64xf32>
    %4 = tpu.matmul %1, %3, %cst {dimension_numbers = #tpu.dot_dimension_numbers<[1], [0], [0], [1], [0, 0, 1, 1], [], []>} : vector<4x8xbf16>, vector<8x64xbf16>, vector<4x64xf32> -> vector<4x64xf32>
    %c0_5 = arith.constant 0 : index
    %c0_6 = arith.constant 0 : index
    %5 = vector.load %arg5[%c0_5, %c0_6] : memref<4x1xf32, #tpu.memory_space<vmem>>, vector<4x1xf32>
    %6 = vector.broadcast %5 : vector<4x1xf32> to vector<4x64xf32>
    %7 = arith.addf %4, %6 : vector<4x64xf32>
    %cst_7 = arith.constant 0.000000e+00 : f32
    %8 = vector.broadcast %cst_7 : f32 to vector<4x64xf32>
    %9 = arith.cmpf ogt, %7, %8 : vector<4x64xf32>
    %c0_8 = arith.constant 0 : index
    %c0_9 = arith.constant 0 : index
    %10 = vector.load %arg6[%c0_8, %c0_9] : memref<4x1xf32, #tpu.memory_space<vmem>>, vector<4x1xf32>
    %11 = vector.broadcast %10 : vector<4x1xf32> to vector<4x64xf32>
    %12 = arith.mulf %11, %7 : vector<4x64xf32>
    %13 = arith.select %9, %7, %12 : vector<4x64xi1>, vector<4x64xf32>
    %14 = arith.truncf %13 : vector<4x64xf32> to vector<4x64xbf16>
    %c0_10 = arith.constant 0 : index
    %c0_11 = arith.constant 0 : index
    %c0_12 = arith.constant 0 : index
    %15 = vector.load %arg7[%c0_10, %c0_11, %c0_12] : memref<1x4x64xbf16, #tpu.memory_space<vmem>>, vector<1x4x64xbf16>
    %16 = vector.shape_cast %15 : vector<1x4x64xbf16> to vector<4x64xbf16>
    %17 = vector.shape_cast %14 : vector<4x64xbf16> to vector<1x4x64xbf16>
    tpu.vector_store %arg7[%c0_10, %c0_11, %c0_12], %17 {strides = array<i32>} : memref<1x4x64xbf16, #tpu.memory_space<vmem>>, vector<1x4x64xbf16>,
    return
  }
  func.func @transform_0(%arg0: i32, %arg1: i32, %arg2: i32) -> (i32, i32, i32) {
    %c0_i32 = arith.constant 0 : i32
    %c0_i32_0 = arith.constant 0 : i32
    %c0_i32_1 = arith.constant 0 : i32
    return %c0_i32, %c0_i32_0, %arg2 : i32, i32, i32
  }
  func.func @transform_1(%arg0: i32, %arg1: i32, %arg2: i32) -> (i32, i32, i32) {
    %c0_i32 = arith.constant 0 : i32
    return %arg0, %arg2, %arg1 : i32, i32, i32
  }
  func.func @transform_2(%arg0: i32, %arg1: i32, %arg2: i32) -> (i32, i32) {
    %c0_i32 = arith.constant 0 : i32
    %c0_i32_0 = arith.constant 0 : i32
    %c0_i32_1 = arith.constant 0 : i32
    return %c0_i32, %c0_i32_0 : i32, i32
  }
  func.func @transform_3(%arg0: i32, %arg1: i32, %arg2: i32) -> (i32, i32) {
    %c0_i32 = arith.constant 0 : i32
    %c0_i32_0 = arith.constant 0 : i32
    %c0_i32_1 = arith.constant 0 : i32
    return %c0_i32, %c0_i32_0 : i32, i32
  }
  func.func @transform_4(%arg0: i32, %arg1: i32, %arg2: i32) -> (i32, i32, i32) {
    %c0_i32 = arith.constant 0 : i32
    %c0_i32_0 = arith.constant 0 : i32
    return %arg0, %c0_i32, %arg1 : i32, i32, i32
  }
}

module attributes {stable_mosaic.version = 11 : i64} {
  func.func @kernel(%arg0: i32, %arg1: i32, %arg2: i32, %arg3: memref<1x12x8xbf16, #tpu.memory_space<vmem>>, %arg4: memref<1x8x256xbf16, #tpu.memory_space<vmem>>, %arg5: memref<12x1xf32, #tpu.memory_space<vmem>>, %arg6: memref<12x1xf32, #tpu.memory_space<vmem>>, %arg7: memref<1x12x256xbf16, #tpu.memory_space<vmem>>) attributes {dimension_semantics = [#tpu.dimension_semantics<parallel>, #tpu.dimension_semantics<parallel>, #tpu.dimension_semantics<arbitrary>], iteration_bounds = array<i64: 2, 1, 1>, scalar_prefetch = 0 : i64, scratch_operands = 0 : i64, tpu.core_type = #tpu.core_type<tc>, window_params = [{transform_indices = @transform_0, window_bounds = array<i64: 1, 12, 8>}, {transform_indices = @transform_1, window_bounds = array<i64: 1, 8, 256>}, {pipeline_mode = #tpu.pipeline_mode<synchronous>, transform_indices = @transform_2, window_bounds = array<i64: 12, 1>}, {pipeline_mode = #tpu.pipeline_mode<synchronous>, transform_indices = @transform_3, window_bounds = array<i64: 12, 1>}, {transform_indices = @transform_4, window_bounds = array<i64: 1, 12, 256>}]} {
    %c0 = arith.constant 0 : index
    %c0_0 = arith.constant 0 : index
    %c0_1 = arith.constant 0 : index
    %0 = vector.load %arg3[%c0, %c0_0, %c0_1] : memref<1x12x8xbf16, #tpu.memory_space<vmem>>, vector<1x12x8xbf16>
    %1 = vector.shape_cast %0 : vector<1x12x8xbf16> to vector<12x8xbf16>
    %c0_2 = arith.constant 0 : index
    %c0_3 = arith.constant 0 : index
    %c0_4 = arith.constant 0 : index
    %2 = vector.load %arg4[%c0_2, %c0_3, %c0_4] : memref<1x8x256xbf16, #tpu.memory_space<vmem>>, vector<1x8x256xbf16>
    %3 = vector.shape_cast %2 : vector<1x8x256xbf16> to vector<8x256xbf16>
    %cst = arith.constant dense<0.000000e+00> : vector<12x256xf32>
    %4 = tpu.matmul %1, %3, %cst {dimension_numbers = #tpu.dot_dimension_numbers<[1], [0], [0], [1], [0, 0, 1, 1], [], []>} : vector<12x8xbf16>, vector<8x256xbf16>, vector<12x256xf32> -> vector<12x256xf32>
    %c0_5 = arith.constant 0 : index
    %c0_6 = arith.constant 0 : index
    %5 = vector.load %arg5[%c0_5, %c0_6] : memref<12x1xf32, #tpu.memory_space<vmem>>, vector<12x1xf32>
    %6 = vector.broadcast %5 : vector<12x1xf32> to vector<12x256xf32>
    %7 = arith.addf %4, %6 : vector<12x256xf32>
    %cst_7 = arith.constant 0.000000e+00 : f32
    %8 = vector.broadcast %cst_7 : f32 to vector<12x256xf32>
    %9 = arith.cmpf ogt, %7, %8 : vector<12x256xf32>
    %c0_8 = arith.constant 0 : index
    %c0_9 = arith.constant 0 : index
    %10 = vector.load %arg6[%c0_8, %c0_9] : memref<12x1xf32, #tpu.memory_space<vmem>>, vector<12x1xf32>
    %11 = vector.broadcast %10 : vector<12x1xf32> to vector<12x256xf32>
    %12 = arith.mulf %11, %7 : vector<12x256xf32>
    %13 = arith.select %9, %7, %12 : vector<12x256xi1>, vector<12x256xf32>
    %14 = arith.truncf %13 : vector<12x256xf32> to vector<12x256xbf16>
    %c0_10 = arith.constant 0 : index
    %c0_11 = arith.constant 0 : index
    %c0_12 = arith.constant 0 : index
    %15 = vector.load %arg7[%c0_10, %c0_11, %c0_12] : memref<1x12x256xbf16, #tpu.memory_space<vmem>>, vector<1x12x256xbf16>
    %16 = vector.shape_cast %15 : vector<1x12x256xbf16> to vector<12x256xbf16>
    %17 = vector.shape_cast %14 : vector<12x256xbf16> to vector<1x12x256xbf16>
    tpu.vector_store %arg7[%c0_10, %c0_11, %c0_12], %17 {strides = array<i32>} : memref<1x12x256xbf16, #tpu.memory_space<vmem>>, vector<1x12x256xbf16>,
    return
  }
  func.func @transform_0(%arg0: i32, %arg1: i32, %arg2: i32) -> (i32, i32, i32) {
    %c0_i32 = arith.constant 0 : i32
    %c0_i32_0 = arith.constant 0 : i32
    %c0_i32_1 = arith.constant 0 : i32
    return %c0_i32, %c0_i32_0, %arg2 : i32, i32, i32
  }
  func.func @transform_1(%arg0: i32, %arg1: i32, %arg2: i32) -> (i32, i32, i32) {
    %c0_i32 = arith.constant 0 : i32
    return %arg0, %arg2, %arg1 : i32, i32, i32
  }
  func.func @transform_2(%arg0: i32, %arg1: i32, %arg2: i32) -> (i32, i32) {
    %c0_i32 = arith.constant 0 : i32
    %c0_i32_0 = arith.constant 0 : i32
    %c0_i32_1 = arith.constant 0 : i32
    return %c0_i32, %c0_i32_0 : i32, i32
  }
  func.func @transform_3(%arg0: i32, %arg1: i32, %arg2: i32) -> (i32, i32) {
    %c0_i32 = arith.constant 0 : i32
    %c0_i32_0 = arith.constant 0 : i32
    %c0_i32_1 = arith.constant 0 : i32
    return %c0_i32, %c0_i32_0 : i32, i32
  }
  func.func @transform_4(%arg0: i32, %arg1: i32, %arg2: i32) -> (i32, i32, i32) {
    %c0_i32 = arith.constant 0 : i32
    %c0_i32_0 = arith.constant 0 : i32
    return %arg0, %c0_i32, %arg1 : i32, i32, i32
  }
}

module attributes {stable_mosaic.version = 11 : i64} {
  func.func @kernel(%arg0: i32, %arg1: i32, %arg2: memref<1x64x36xbf16, #tpu.memory_space<vmem>>, %arg3: memref<1x36x256xbf16, #tpu.memory_space<vmem>>, %arg4: memref<1x64x256xbf16, #tpu.memory_space<vmem>>) attributes {dimension_semantics = [#tpu.dimension_semantics<parallel>, #tpu.dimension_semantics<parallel>], iteration_bounds = array<i64: 2, 1>, scalar_prefetch = 0 : i64, scratch_operands = 0 : i64, tpu.core_type = #tpu.core_type<tc>, window_params = [{transform_indices = @transform_0, window_bounds = array<i64: 1, 64, 36>}, {transform_indices = @transform_1, window_bounds = array<i64: 1, 36, 256>}, {transform_indices = @transform_2, window_bounds = array<i64: 1, 64, 256>}]} {
    %c0 = arith.constant 0 : index
    %c0_0 = arith.constant 0 : index
    %c0_1 = arith.constant 0 : index
    %0 = vector.load %arg2[%c0, %c0_0, %c0_1] : memref<1x64x36xbf16, #tpu.memory_space<vmem>>, vector<1x64x36xbf16>
    %1 = vector.shape_cast %0 : vector<1x64x36xbf16> to vector<64x36xbf16>
    %c0_2 = arith.constant 0 : index
    %c0_3 = arith.constant 0 : index
    %c0_4 = arith.constant 0 : index
    %2 = vector.load %arg3[%c0_2, %c0_3, %c0_4] : memref<1x36x256xbf16, #tpu.memory_space<vmem>>, vector<1x36x256xbf16>
    %3 = vector.shape_cast %2 : vector<1x36x256xbf16> to vector<36x256xbf16>
    %cst = arith.constant dense<0.000000e+00> : vector<64x256xf32>
    %4 = tpu.matmul %1, %3, %cst {dimension_numbers = #tpu.dot_dimension_numbers<[1], [0], [0], [1], [0, 0, 1, 1], [], []>} : vector<64x36xbf16>, vector<36x256xbf16>, vector<64x256xf32> -> vector<64x256xf32>
    %cst_5 = arith.constant dense<0xFF800000> : vector<256xf32>
    %5 = vector.multi_reduction <maximumf>, %4, %cst_5 [0] : vector<64x256xf32> to vector<256xf32>
    %6 = vector.shape_cast %5 : vector<256xf32> to vector<1x256xf32>
    %7 = vector.broadcast %6 : vector<1x256xf32> to vector<64x256xf32>
    %8 = arith.subf %4, %7 : vector<64x256xf32>
    %9 = math.exp %8 : vector<64x256xf32>
    %cst_6 = arith.constant dense<0.000000e+00> : vector<256xf32>
    %10 = vector.multi_reduction <add>, %9, %cst_6 [0] : vector<64x256xf32> to vector<256xf32>
    %11 = vector.shape_cast %10 : vector<256xf32> to vector<1x256xf32>
    %12 = tpu.reciprocal %11 {approx = true} : vector<1x256xf32> -> vector<1x256xf32>
    %13 = vector.broadcast %12 : vector<1x256xf32> to vector<64x256xf32>
    %14 = arith.mulf %9, %13 : vector<64x256xf32>
    %15 = arith.truncf %14 : vector<64x256xf32> to vector<64x256xbf16>
    %c0_7 = arith.constant 0 : index
    %c0_8 = arith.constant 0 : index
    %c0_9 = arith.constant 0 : index
    %16 = vector.load %arg4[%c0_7, %c0_8, %c0_9] : memref<1x64x256xbf16, #tpu.memory_space<vmem>>, vector<1x64x256xbf16>
    %17 = vector.shape_cast %16 : vector<1x64x256xbf16> to vector<64x256xbf16>
    %18 = vector.shape_cast %15 : vector<64x256xbf16> to vector<1x64x256xbf16>
    tpu.vector_store %arg4[%c0_7, %c0_8, %c0_9], %18 {strides = array<i32>} : memref<1x64x256xbf16, #tpu.memory_space<vmem>>, vector<1x64x256xbf16>,
    return
  }
  func.func @transform_0(%arg0: i32, %arg1: i32) -> (i32, i32, i32) {
    %c0_i32 = arith.constant 0 : i32
    %c0_i32_0 = arith.constant 0 : i32
    %c0_i32_1 = arith.constant 0 : i32
    return %arg0, %c0_i32, %c0_i32_0 : i32, i32, i32
  }
  func.func @transform_1(%arg0: i32, %arg1: i32) -> (i32, i32, i32) {
    %c0_i32 = arith.constant 0 : i32
    %c0_i32_0 = arith.constant 0 : i32
    return %arg0, %c0_i32, %arg1 : i32, i32, i32
  }
  func.func @transform_2(%arg0: i32, %arg1: i32) -> (i32, i32, i32) {
    %c0_i32 = arith.constant 0 : i32
    %c0_i32_0 = arith.constant 0 : i32
    return %arg0, %c0_i32, %arg1 : i32, i32, i32
  }
}

module attributes {stable_mosaic.version = 11 : i64} {
  func.func @kernel(%arg0: i32, %arg1: i32, %arg2: i32, %arg3: memref<1x32x576xbf16, #tpu.memory_space<vmem>>, %arg4: memref<1x576x256xbf16, #tpu.memory_space<vmem>>, %arg5: memref<32x1xf32, #tpu.memory_space<vmem>>, %arg6: memref<32x1xf32, #tpu.memory_space<vmem>>, %arg7: memref<1x32x256xf32, #tpu.memory_space<vmem>>) attributes {dimension_semantics = [#tpu.dimension_semantics<parallel>, #tpu.dimension_semantics<parallel>, #tpu.dimension_semantics<arbitrary>], iteration_bounds = array<i64: 2, 1, 1>, scalar_prefetch = 0 : i64, scratch_operands = 0 : i64, tpu.core_type = #tpu.core_type<tc>, window_params = [{transform_indices = @transform_0, window_bounds = array<i64: 1, 32, 576>}, {transform_indices = @transform_1, window_bounds = array<i64: 1, 576, 256>}, {pipeline_mode = #tpu.pipeline_mode<synchronous>, transform_indices = @transform_2, window_bounds = array<i64: 32, 1>}, {pipeline_mode = #tpu.pipeline_mode<synchronous>, transform_indices = @transform_3, window_bounds = array<i64: 32, 1>}, {transform_indices = @transform_4, window_bounds = array<i64: 1, 32, 256>}]} {
    %c0 = arith.constant 0 : index
    %c0_0 = arith.constant 0 : index
    %c0_1 = arith.constant 0 : index
    %0 = vector.load %arg3[%c0, %c0_0, %c0_1] : memref<1x32x576xbf16, #tpu.memory_space<vmem>>, vector<1x32x576xbf16>
    %1 = vector.shape_cast %0 : vector<1x32x576xbf16> to vector<32x576xbf16>
    %c0_2 = arith.constant 0 : index
    %c0_3 = arith.constant 0 : index
    %c0_4 = arith.constant 0 : index
    %2 = vector.load %arg4[%c0_2, %c0_3, %c0_4] : memref<1x576x256xbf16, #tpu.memory_space<vmem>>, vector<1x576x256xbf16>
    %3 = vector.shape_cast %2 : vector<1x576x256xbf16> to vector<576x256xbf16>
    %cst = arith.constant dense<0.000000e+00> : vector<32x256xf32>
    %4 = tpu.matmul %1, %3, %cst {dimension_numbers = #tpu.dot_dimension_numbers<[1], [0], [0], [1], [0, 0, 1, 1], [], []>} : vector<32x576xbf16>, vector<576x256xbf16>, vector<32x256xf32> -> vector<32x256xf32>
    %cst_5 = arith.constant 0.166666672 : f32
    %5 = vector.broadcast %cst_5 : f32 to vector<32x256xf32>
    %6 = arith.mulf %4, %5 : vector<32x256xf32>
    %c0_6 = arith.constant 0 : index
    %c0_7 = arith.constant 0 : index
    %c0_8 = arith.constant 0 : index
    %7 = vector.load %arg7[%c0_6, %c0_7, %c0_8] : memref<1x32x256xf32, #tpu.memory_space<vmem>>, vector<1x32x256xf32>
    %8 = vector.shape_cast %7 : vector<1x32x256xf32> to vector<32x256xf32>
    %9 = vector.shape_cast %6 : vector<32x256xf32> to vector<1x32x256xf32>
    tpu.vector_store %arg7[%c0_6, %c0_7, %c0_8], %9 {strides = array<i32>} : memref<1x32x256xf32, #tpu.memory_space<vmem>>, vector<1x32x256xf32>,
    return
  }
  func.func @transform_0(%arg0: i32, %arg1: i32, %arg2: i32) -> (i32, i32, i32) {
    %c0_i32 = arith.constant 0 : i32
    %c0_i32_0 = arith.constant 0 : i32
    return %arg0, %c0_i32, %arg2 : i32, i32, i32
  }
  func.func @transform_1(%arg0: i32, %arg1: i32, %arg2: i32) -> (i32, i32, i32) {
    %c0_i32 = arith.constant 0 : i32
    return %arg0, %arg2, %arg1 : i32, i32, i32
  }
  func.func @transform_2(%arg0: i32, %arg1: i32, %arg2: i32) -> (i32, i32) {
    %c0_i32 = arith.constant 0 : i32
    %c0_i32_0 = arith.constant 0 : i32
    %c0_i32_1 = arith.constant 0 : i32
    return %c0_i32, %c0_i32_0 : i32, i32
  }
  func.func @transform_3(%arg0: i32, %arg1: i32, %arg2: i32) -> (i32, i32) {
    %c0_i32 = arith.constant 0 : i32
    %c0_i32_0 = arith.constant 0 : i32
    %c0_i32_1 = arith.constant 0 : i32
    return %c0_i32, %c0_i32_0 : i32, i32
  }
  func.func @transform_4(%arg0: i32, %arg1: i32, %arg2: i32) -> (i32, i32, i32) {
    %c0_i32 = arith.constant 0 : i32
    %c0_i32_0 = arith.constant 0 : i32
    return %arg0, %c0_i32, %arg1 : i32, i32, i32
  }
}

module attributes {stable_mosaic.version = 11 : i64} {
  func.func @kernel(%arg0: i32, %arg1: i32, %arg2: i32, %arg3: memref<1x16x8xbf16, #tpu.memory_space<vmem>>, %arg4: memref<1x8x256xbf16, #tpu.memory_space<vmem>>, %arg5: memref<16x1xf32, #tpu.memory_space<vmem>>, %arg6: memref<16x1xf32, #tpu.memory_space<vmem>>, %arg7: memref<1x16x256xbf16, #tpu.memory_space<vmem>>) attributes {dimension_semantics = [#tpu.dimension_semantics<parallel>, #tpu.dimension_semantics<parallel>, #tpu.dimension_semantics<arbitrary>], iteration_bounds = array<i64: 2, 1, 1>, scalar_prefetch = 0 : i64, scratch_operands = 0 : i64, tpu.core_type = #tpu.core_type<tc>, window_params = [{transform_indices = @transform_0, window_bounds = array<i64: 1, 16, 8>}, {transform_indices = @transform_1, window_bounds = array<i64: 1, 8, 256>}, {pipeline_mode = #tpu.pipeline_mode<synchronous>, transform_indices = @transform_2, window_bounds = array<i64: 16, 1>}, {pipeline_mode = #tpu.pipeline_mode<synchronous>, transform_indices = @transform_3, window_bounds = array<i64: 16, 1>}, {transform_indices = @transform_4, window_bounds = array<i64: 1, 16, 256>}]} {
    %c0 = arith.constant 0 : index
    %c0_0 = arith.constant 0 : index
    %c0_1 = arith.constant 0 : index
    %0 = vector.load %arg3[%c0, %c0_0, %c0_1] : memref<1x16x8xbf16, #tpu.memory_space<vmem>>, vector<1x16x8xbf16>
    %1 = vector.shape_cast %0 : vector<1x16x8xbf16> to vector<16x8xbf16>
    %c0_2 = arith.constant 0 : index
    %c0_3 = arith.constant 0 : index
    %c0_4 = arith.constant 0 : index
    %2 = vector.load %arg4[%c0_2, %c0_3, %c0_4] : memref<1x8x256xbf16, #tpu.memory_space<vmem>>, vector<1x8x256xbf16>
    %3 = vector.shape_cast %2 : vector<1x8x256xbf16> to vector<8x256xbf16>
    %cst = arith.constant dense<0.000000e+00> : vector<16x256xf32>
    %4 = tpu.matmul %1, %3, %cst {dimension_numbers = #tpu.dot_dimension_numbers<[1], [0], [0], [1], [0, 0, 1, 1], [], []>} : vector<16x8xbf16>, vector<8x256xbf16>, vector<16x256xf32> -> vector<16x256xf32>
    %c0_5 = arith.constant 0 : index
    %c0_6 = arith.constant 0 : index
    %5 = vector.load %arg5[%c0_5, %c0_6] : memref<16x1xf32, #tpu.memory_space<vmem>>, vector<16x1xf32>
    %6 = vector.broadcast %5 : vector<16x1xf32> to vector<16x256xf32>
    %7 = arith.addf %4, %6 : vector<16x256xf32>
    %cst_7 = arith.constant 0.000000e+00 : f32
    %8 = vector.broadcast %cst_7 : f32 to vector<16x256xf32>
    %9 = arith.cmpf ogt, %7, %8 : vector<16x256xf32>
    %c0_8 = arith.constant 0 : index
    %c0_9 = arith.constant 0 : index
    %10 = vector.load %arg6[%c0_8, %c0_9] : memref<16x1xf32, #tpu.memory_space<vmem>>, vector<16x1xf32>
    %11 = vector.broadcast %10 : vector<16x1xf32> to vector<16x256xf32>
    %12 = arith.mulf %11, %7 : vector<16x256xf32>
    %13 = arith.select %9, %7, %12 : vector<16x256xi1>, vector<16x256xf32>
    %14 = arith.truncf %13 : vector<16x256xf32> to vector<16x256xbf16>
    %c0_10 = arith.constant 0 : index
    %c0_11 = arith.constant 0 : index
    %c0_12 = arith.constant 0 : index
    %15 = vector.load %arg7[%c0_10, %c0_11, %c0_12] : memref<1x16x256xbf16, #tpu.memory_space<vmem>>, vector<1x16x256xbf16>
    %16 = vector.shape_cast %15 : vector<1x16x256xbf16> to vector<16x256xbf16>
    %17 = vector.shape_cast %14 : vector<16x256xbf16> to vector<1x16x256xbf16>
    tpu.vector_store %arg7[%c0_10, %c0_11, %c0_12], %17 {strides = array<i32>} : memref<1x16x256xbf16, #tpu.memory_space<vmem>>, vector<1x16x256xbf16>,
    return
  }
  func.func @transform_0(%arg0: i32, %arg1: i32, %arg2: i32) -> (i32, i32, i32) {
    %c0_i32 = arith.constant 0 : i32
    %c0_i32_0 = arith.constant 0 : i32
    %c0_i32_1 = arith.constant 0 : i32
    return %c0_i32, %c0_i32_0, %arg2 : i32, i32, i32
  }
  func.func @transform_1(%arg0: i32, %arg1: i32, %arg2: i32) -> (i32, i32, i32) {
    %c0_i32 = arith.constant 0 : i32
    return %arg0, %arg2, %arg1 : i32, i32, i32
  }
  func.func @transform_2(%arg0: i32, %arg1: i32, %arg2: i32) -> (i32, i32) {
    %c0_i32 = arith.constant 0 : i32
    %c0_i32_0 = arith.constant 0 : i32
    %c0_i32_1 = arith.constant 0 : i32
    return %c0_i32, %c0_i32_0 : i32, i32
  }
  func.func @transform_3(%arg0: i32, %arg1: i32, %arg2: i32) -> (i32, i32) {
    %c0_i32 = arith.constant 0 : i32
    %c0_i32_0 = arith.constant 0 : i32
    %c0_i32_1 = arith.constant 0 : i32
    return %c0_i32, %c0_i32_0 : i32, i32
  }
  func.func @transform_4(%arg0: i32, %arg1: i32, %arg2: i32) -> (i32, i32, i32) {
    %c0_i32 = arith.constant 0 : i32
    %c0_i32_0 = arith.constant 0 : i32
    return %arg0, %c0_i32, %arg1 : i32, i32, i32
  }
}

module attributes {stable_mosaic.version = 11 : i64} {
  func.func @kernel(%arg0: i32, %arg1: i32, %arg2: i32, %arg3: memref<1x128x4xbf16, #tpu.memory_space<vmem>>, %arg4: memref<1x4x256xbf16, #tpu.memory_space<vmem>>, %arg5: memref<1x256x8xbf16, #tpu.memory_space<vmem>>, %arg6: memref<1x128x8xbf16, #tpu.memory_space<vmem>>, %arg7: memref<128x1xf32, #tpu.memory_space<vmem>>, %arg8: memref<128x1xf32, #tpu.memory_space<vmem>>, %arg9: memref<128x8xf32, #tpu.memory_space<vmem>>) attributes {dimension_semantics = [#tpu.dimension_semantics<parallel>, #tpu.dimension_semantics<parallel>, #tpu.dimension_semantics<arbitrary>], iteration_bounds = array<i64: 2, 2, 1>, scalar_prefetch = 0 : i64, scratch_operands = 3 : i64, tpu.core_type = #tpu.core_type<tc>, window_params = [{transform_indices = @transform_0, window_bounds = array<i64: 1, 128, 4>}, {transform_indices = @transform_1, window_bounds = array<i64: 1, 4, 256>}, {transform_indices = @transform_2, window_bounds = array<i64: 1, 256, 8>}, {transform_indices = @transform_3, window_bounds = array<i64: 1, 128, 8>}]} {
    %c0_i32 = arith.constant 0 : i32
    %0 = arith.cmpi eq, %arg2, %c0_i32 : i32
    %1 = arith.extui %0 : i1 to i32
    %c0_i32_0 = arith.constant 0 : i32
    %2 = arith.cmpi ne, %1, %c0_i32_0 : i32
    scf.if %2 {
      %cst_28 = arith.constant 0xFF800000 : f32
      %37 = vector.broadcast %cst_28 : f32 to vector<128x1xf32>
      %c0_29 = arith.constant 0 : index
      %c0_30 = arith.constant 0 : index
      %38 = vector.load %arg7[%c0_29, %c0_30] : memref<128x1xf32, #tpu.memory_space<vmem>>, vector<128x1xf32>
      tpu.vector_store %arg7[%c0_29, %c0_30], %37 {strides = array<i32>} : memref<128x1xf32, #tpu.memory_space<vmem>>, vector<128x1xf32>,
      %cst_31 = arith.constant 0.000000e+00 : f32
      %39 = vector.broadcast %cst_31 : f32 to vector<128x1xf32>
      %c0_32 = arith.constant 0 : index
      %c0_33 = arith.constant 0 : index
      %40 = vector.load %arg8[%c0_32, %c0_33] : memref<128x1xf32, #tpu.memory_space<vmem>>, vector<128x1xf32>
      tpu.vector_store %arg8[%c0_32, %c0_33], %39 {strides = array<i32>} : memref<128x1xf32, #tpu.memory_space<vmem>>, vector<128x1xf32>,
      %cst_34 = arith.constant 0.000000e+00 : f32
      %41 = vector.broadcast %cst_34 : f32 to vector<128x8xf32>
      %c0_35 = arith.constant 0 : index
      %c0_36 = arith.constant 0 : index
      %42 = vector.load %arg9[%c0_35, %c0_36] : memref<128x8xf32, #tpu.memory_space<vmem>>, vector<128x8xf32>
      tpu.vector_store %arg9[%c0_35, %c0_36], %41 {strides = array<i32>} : memref<128x8xf32, #tpu.memory_space<vmem>>, vector<128x8xf32>,
    } else {
    }
    %c0 = arith.constant 0 : index
    %c0_1 = arith.constant 0 : index
    %c0_2 = arith.constant 0 : index
    %3 = vector.load %arg3[%c0, %c0_1, %c0_2] : memref<1x128x4xbf16, #tpu.memory_space<vmem>>, vector<1x128x4xbf16>
    %4 = vector.shape_cast %3 : vector<1x128x4xbf16> to vector<128x4xbf16>
    %c0_3 = arith.constant 0 : index
    %c0_4 = arith.constant 0 : index
    %c0_5 = arith.constant 0 : index
    %5 = vector.load %arg4[%c0_3, %c0_4, %c0_5] : memref<1x4x256xbf16, #tpu.memory_space<vmem>>, vector<1x4x256xbf16>
    %6 = vector.shape_cast %5 : vector<1x4x256xbf16> to vector<4x256xbf16>
    %cst = arith.constant dense<0.000000e+00> : vector<128x256xf32>
    %7 = tpu.matmul %4, %6, %cst {dimension_numbers = #tpu.dot_dimension_numbers<[1], [0], [0], [1], [0, 0, 1, 1], [], []>} : vector<128x4xbf16>, vector<4x256xbf16>, vector<128x256xf32> -> vector<128x256xf32>
    %c0_6 = arith.constant 0 : index
    %c0_7 = arith.constant 0 : index
    %8 = vector.load %arg7[%c0_6, %c0_7] : memref<128x1xf32, #tpu.memory_space<vmem>>, vector<128x1xf32>
    %cst_8 = arith.constant dense<0xFF800000> : vector<128xf32>
    %9 = vector.multi_reduction <maximumf>, %7, %cst_8 [1] : vector<128x256xf32> to vector<128xf32>
    %10 = vector.shape_cast %9 : vector<128xf32> to vector<128x1xf32>
    %11 = arith.maximumf %8, %10 : vector<128x1xf32>
    %c0_9 = arith.constant 0 : index
    %c0_10 = arith.constant 0 : index
    %12 = vector.load %arg7[%c0_9, %c0_10] : memref<128x1xf32, #tpu.memory_space<vmem>>, vector<128x1xf32>
    %13 = arith.subf %12, %11 : vector<128x1xf32>
    %14 = math.exp %13 : vector<128x1xf32>
    %15 = vector.broadcast %11 : vector<128x1xf32> to vector<128x256xf32>
    %16 = arith.subf %7, %15 : vector<128x256xf32>
    %17 = math.exp %16 : vector<128x256xf32>
    %c0_11 = arith.constant 0 : index
    %c0_12 = arith.constant 0 : index
    %18 = vector.load %arg8[%c0_11, %c0_12] : memref<128x1xf32, #tpu.memory_space<vmem>>, vector<128x1xf32>
    %19 = arith.mulf %14, %18 : vector<128x1xf32>
    %cst_13 = arith.constant dense<0.000000e+00> : vector<128xf32>
    %20 = vector.multi_reduction <add>, %17, %cst_13 [1] : vector<128x256xf32> to vector<128xf32>
    %21 = vector.shape_cast %20 : vector<128xf32> to vector<128x1xf32>
    %22 = arith.addf %19, %21 : vector<128x1xf32>
    %c0_14 = arith.constant 0 : index
    %c0_15 = arith.constant 0 : index
    %23 = vector.load %arg8[%c0_14, %c0_15] : memref<128x1xf32, #tpu.memory_space<vmem>>, vector<128x1xf32>
    tpu.vector_store %arg8[%c0_14, %c0_15], %22 {strides = array<i32>} : memref<128x1xf32, #tpu.memory_space<vmem>>, vector<128x1xf32>,
    %c0_16 = arith.constant 0 : index
    %c0_17 = arith.constant 0 : index
    %24 = vector.load %arg9[%c0_16, %c0_17] : memref<128x8xf32, #tpu.memory_space<vmem>>, vector<128x8xf32>
    %25 = vector.broadcast %14 : vector<128x1xf32> to vector<128x8xf32>
    %26 = arith.mulf %25, %24 : vector<128x8xf32>
    %27 = arith.truncf %17 : vector<128x256xf32> to vector<128x256xbf16>
    %c0_18 = arith.constant 0 : index
    %c0_19 = arith.constant 0 : index
    %c0_20 = arith.constant 0 : index
    %28 = vector.load %arg5[%c0_18, %c0_19, %c0_20] : memref<1x256x8xbf16, #tpu.memory_space<vmem>>, vector<1x256x8xbf16>
    %29 = vector.shape_cast %28 : vector<1x256x8xbf16> to vector<256x8xbf16>
    %cst_21 = arith.constant dense<0.000000e+00> : vector<128x8xf32>
    %30 = tpu.matmul %27, %29, %cst_21 {dimension_numbers = #tpu.dot_dimension_numbers<[1], [0], [0], [1], [0, 0, 1, 1], [], []>} : vector<128x256xbf16>, vector<256x8xbf16>, vector<128x8xf32> -> vector<128x8xf32>
    %31 = arith.addf %26, %30 : vector<128x8xf32>
    %c0_22 = arith.constant 0 : index
    %c0_23 = arith.constant 0 : index
    %32 = vector.load %arg9[%c0_22, %c0_23] : memref<128x8xf32, #tpu.memory_space<vmem>>, vector<128x8xf32>
    tpu.vector_store %arg9[%c0_22, %c0_23], %31 {strides = array<i32>} : memref<128x8xf32, #tpu.memory_space<vmem>>, vector<128x8xf32>,
    %c0_24 = arith.constant 0 : index
    %c0_25 = arith.constant 0 : index
    %33 = vector.load %arg7[%c0_24, %c0_25] : memref<128x1xf32, #tpu.memory_space<vmem>>, vector<128x1xf32>
    tpu.vector_store %arg7[%c0_24, %c0_25], %11 {strides = array<i32>} : memref<128x1xf32, #tpu.memory_space<vmem>>, vector<128x1xf32>,
    %c0_i32_26 = arith.constant 0 : i32
    %34 = arith.cmpi eq, %arg2, %c0_i32_26 : i32
    %35 = arith.extui %34 : i1 to i32
    %c0_i32_27 = arith.constant 0 : i32
    %36 = arith.cmpi ne, %35, %c0_i32_27 : i32
    scf.if %36 {
      %c0_28 = arith.constant 0 : index
      %c0_29 = arith.constant 0 : index
      %37 = vector.load %arg9[%c0_28, %c0_29] : memref<128x8xf32, #tpu.memory_space<vmem>>, vector<128x8xf32>
      %c0_30 = arith.constant 0 : index
      %c0_31 = arith.constant 0 : index
      %38 = vector.load %arg8[%c0_30, %c0_31] : memref<128x1xf32, #tpu.memory_space<vmem>>, vector<128x1xf32>
      %39 = tpu.reciprocal %38 {approx = true} : vector<128x1xf32> -> vector<128x1xf32>
      %40 = vector.broadcast %39 : vector<128x1xf32> to vector<128x8xf32>
      %41 = arith.mulf %37, %40 : vector<128x8xf32>
      %42 = arith.truncf %41 : vector<128x8xf32> to vector<128x8xbf16>
      %c0_32 = arith.constant 0 : index
      %c0_33 = arith.constant 0 : index
      %c0_34 = arith.constant 0 : index
      %43 = vector.load %arg6[%c0_32, %c0_33, %c0_34] : memref<1x128x8xbf16, #tpu.memory_space<vmem>>, vector<1x128x8xbf16>
      %44 = vector.shape_cast %43 : vector<1x128x8xbf16> to vector<128x8xbf16>
      %45 = vector.shape_cast %42 : vector<128x8xbf16> to vector<1x128x8xbf16>
      tpu.vector_store %arg6[%c0_32, %c0_33, %c0_34], %45 {strides = array<i32>} : memref<1x128x8xbf16, #tpu.memory_space<vmem>>, vector<1x128x8xbf16>,
    } else {
    }
    return
  }
  func.func @transform_0(%arg0: i32, %arg1: i32, %arg2: i32) -> (i32, i32, i32) {
    %c0_i32 = arith.constant 0 : i32
    %c0_i32_0 = arith.constant 0 : i32
    return %arg0, %arg1, %c0_i32 : i32, i32, i32
  }
  func.func @transform_1(%arg0: i32, %arg1: i32, %arg2: i32) -> (i32, i32, i32) {
    %c0_i32 = arith.constant 0 : i32
    %c0_i32_0 = arith.constant 0 : i32
    return %arg0, %c0_i32, %arg2 : i32, i32, i32
  }
  func.func @transform_2(%arg0: i32, %arg1: i32, %arg2: i32) -> (i32, i32, i32) {
    %c0_i32 = arith.constant 0 : i32
    %c0_i32_0 = arith.constant 0 : i32
    return %arg0, %arg2, %c0_i32 : i32, i32, i32
  }
  func.func @transform_3(%arg0: i32, %arg1: i32, %arg2: i32) -> (i32, i32, i32) {
    %c0_i32 = arith.constant 0 : i32
    %c0_i32_0 = arith.constant 0 : i32
    return %arg0, %arg1, %c0_i32 : i32, i32, i32
  }
}

module attributes {stable_mosaic.version = 11 : i64} {
  func.func @kernel(%arg0: i32, %arg1: i32, %arg2: i32, %arg3: memref<1x32x72xbf16, #tpu.memory_space<vmem>>, %arg4: memref<1x72x256xbf16, #tpu.memory_space<vmem>>, %arg5: memref<32x1xf32, #tpu.memory_space<vmem>>, %arg6: memref<32x1xf32, #tpu.memory_space<vmem>>, %arg7: memref<1x32x256xf32, #tpu.memory_space<vmem>>) attributes {dimension_semantics = [#tpu.dimension_semantics<parallel>, #tpu.dimension_semantics<parallel>, #tpu.dimension_semantics<arbitrary>], iteration_bounds = array<i64: 2, 1, 1>, scalar_prefetch = 0 : i64, scratch_operands = 0 : i64, tpu.core_type = #tpu.core_type<tc>, window_params = [{transform_indices = @transform_0, window_bounds = array<i64: 1, 32, 72>}, {transform_indices = @transform_1, window_bounds = array<i64: 1, 72, 256>}, {pipeline_mode = #tpu.pipeline_mode<synchronous>, transform_indices = @transform_2, window_bounds = array<i64: 32, 1>}, {pipeline_mode = #tpu.pipeline_mode<synchronous>, transform_indices = @transform_3, window_bounds = array<i64: 32, 1>}, {transform_indices = @transform_4, window_bounds = array<i64: 1, 32, 256>}]} {
    %c0 = arith.constant 0 : index
    %c0_0 = arith.constant 0 : index
    %c0_1 = arith.constant 0 : index
    %0 = vector.load %arg3[%c0, %c0_0, %c0_1] : memref<1x32x72xbf16, #tpu.memory_space<vmem>>, vector<1x32x72xbf16>
    %1 = vector.shape_cast %0 : vector<1x32x72xbf16> to vector<32x72xbf16>
    %c0_2 = arith.constant 0 : index
    %c0_3 = arith.constant 0 : index
    %c0_4 = arith.constant 0 : index
    %2 = vector.load %arg4[%c0_2, %c0_3, %c0_4] : memref<1x72x256xbf16, #tpu.memory_space<vmem>>, vector<1x72x256xbf16>
    %3 = vector.shape_cast %2 : vector<1x72x256xbf16> to vector<72x256xbf16>
    %cst = arith.constant dense<0.000000e+00> : vector<32x256xf32>
    %4 = tpu.matmul %1, %3, %cst {dimension_numbers = #tpu.dot_dimension_numbers<[1], [0], [0], [1], [0, 0, 1, 1], [], []>} : vector<32x72xbf16>, vector<72x256xbf16>, vector<32x256xf32> -> vector<32x256xf32>
    %c0_5 = arith.constant 0 : index
    %c0_6 = arith.constant 0 : index
    %5 = vector.load %arg5[%c0_5, %c0_6] : memref<32x1xf32, #tpu.memory_space<vmem>>, vector<32x1xf32>
    %6 = vector.broadcast %5 : vector<32x1xf32> to vector<32x256xf32>
    %7 = arith.addf %4, %6 : vector<32x256xf32>
    %cst_7 = arith.constant 0.000000e+00 : f32
    %8 = vector.broadcast %cst_7 : f32 to vector<32x256xf32>
    %9 = arith.cmpf ogt, %7, %8 : vector<32x256xf32>
    %c0_8 = arith.constant 0 : index
    %c0_9 = arith.constant 0 : index
    %10 = vector.load %arg6[%c0_8, %c0_9] : memref<32x1xf32, #tpu.memory_space<vmem>>, vector<32x1xf32>
    %11 = vector.broadcast %10 : vector<32x1xf32> to vector<32x256xf32>
    %12 = arith.mulf %11, %7 : vector<32x256xf32>
    %13 = arith.select %9, %7, %12 : vector<32x256xi1>, vector<32x256xf32>
    %c0_10 = arith.constant 0 : index
    %c0_11 = arith.constant 0 : index
    %c0_12 = arith.constant 0 : index
    %14 = vector.load %arg7[%c0_10, %c0_11, %c0_12] : memref<1x32x256xf32, #tpu.memory_space<vmem>>, vector<1x32x256xf32>
    %15 = vector.shape_cast %14 : vector<1x32x256xf32> to vector<32x256xf32>
    %16 = vector.shape_cast %13 : vector<32x256xf32> to vector<1x32x256xf32>
    tpu.vector_store %arg7[%c0_10, %c0_11, %c0_12], %16 {strides = array<i32>} : memref<1x32x256xf32, #tpu.memory_space<vmem>>, vector<1x32x256xf32>,
    return
  }
  func.func @transform_0(%arg0: i32, %arg1: i32, %arg2: i32) -> (i32, i32, i32) {
    %c0_i32 = arith.constant 0 : i32
    %c0_i32_0 = arith.constant 0 : i32
    %c0_i32_1 = arith.constant 0 : i32
    return %c0_i32, %c0_i32_0, %arg2 : i32, i32, i32
  }
  func.func @transform_1(%arg0: i32, %arg1: i32, %arg2: i32) -> (i32, i32, i32) {
    %c0_i32 = arith.constant 0 : i32
    return %arg0, %arg2, %arg1 : i32, i32, i32
  }
  func.func @transform_2(%arg0: i32, %arg1: i32, %arg2: i32) -> (i32, i32) {
    %c0_i32 = arith.constant 0 : i32
    %c0_i32_0 = arith.constant 0 : i32
    %c0_i32_1 = arith.constant 0 : i32
    return %c0_i32, %c0_i32_0 : i32, i32
  }
  func.func @transform_3(%arg0: i32, %arg1: i32, %arg2: i32) -> (i32, i32) {
    %c0_i32 = arith.constant 0 : i32
    %c0_i32_0 = arith.constant 0 : i32
    %c0_i32_1 = arith.constant 0 : i32
    return %c0_i32, %c0_i32_0 : i32, i32
  }
  func.func @transform_4(%arg0: i32, %arg1: i32, %arg2: i32) -> (i32, i32, i32) {
    %c0_i32 = arith.constant 0 : i32
    %c0_i32_0 = arith.constant 0 : i32
    return %arg0, %c0_i32, %arg1 : i32, i32, i32
  }
}

module attributes {stable_mosaic.version = 11 : i64} {
  func.func @kernel(%arg0: i32, %arg1: i32, %arg2: i32, %arg3: memref<1x8x72xbf16, #tpu.memory_space<vmem>>, %arg4: memref<1x72x512xbf16, #tpu.memory_space<vmem>>, %arg5: memref<8x1xf32, #tpu.memory_space<vmem>>, %arg6: memref<8x1xf32, #tpu.memory_space<vmem>>, %arg7: memref<1x8x512xbf16, #tpu.memory_space<vmem>>) attributes {dimension_semantics = [#tpu.dimension_semantics<parallel>, #tpu.dimension_semantics<parallel>, #tpu.dimension_semantics<arbitrary>], iteration_bounds = array<i64: 2, 2, 1>, scalar_prefetch = 0 : i64, scratch_operands = 0 : i64, tpu.core_type = #tpu.core_type<tc>, window_params = [{transform_indices = @transform_0, window_bounds = array<i64: 1, 8, 72>}, {transform_indices = @transform_1, window_bounds = array<i64: 1, 72, 512>}, {pipeline_mode = #tpu.pipeline_mode<synchronous>, transform_indices = @transform_2, window_bounds = array<i64: 8, 1>}, {pipeline_mode = #tpu.pipeline_mode<synchronous>, transform_indices = @transform_3, window_bounds = array<i64: 8, 1>}, {transform_indices = @transform_4, window_bounds = array<i64: 1, 8, 512>}]} {
    %c0 = arith.constant 0 : index
    %c0_0 = arith.constant 0 : index
    %c0_1 = arith.constant 0 : index
    %0 = vector.load %arg3[%c0, %c0_0, %c0_1] : memref<1x8x72xbf16, #tpu.memory_space<vmem>>, vector<1x8x72xbf16>
    %1 = vector.shape_cast %0 : vector<1x8x72xbf16> to vector<8x72xbf16>
    %c0_2 = arith.constant 0 : index
    %c0_3 = arith.constant 0 : index
    %c0_4 = arith.constant 0 : index
    %2 = vector.load %arg4[%c0_2, %c0_3, %c0_4] : memref<1x72x512xbf16, #tpu.memory_space<vmem>>, vector<1x72x512xbf16>
    %3 = vector.shape_cast %2 : vector<1x72x512xbf16> to vector<72x512xbf16>
    %cst = arith.constant dense<0.000000e+00> : vector<8x512xf32>
    %4 = tpu.matmul %1, %3, %cst {dimension_numbers = #tpu.dot_dimension_numbers<[1], [0], [0], [1], [0, 0, 1, 1], [], []>} : vector<8x72xbf16>, vector<72x512xbf16>, vector<8x512xf32> -> vector<8x512xf32>
    %c0_5 = arith.constant 0 : index
    %c0_6 = arith.constant 0 : index
    %5 = vector.load %arg5[%c0_5, %c0_6] : memref<8x1xf32, #tpu.memory_space<vmem>>, vector<8x1xf32>
    %6 = vector.broadcast %5 : vector<8x1xf32> to vector<8x512xf32>
    %7 = arith.addf %4, %6 : vector<8x512xf32>
    %cst_7 = arith.constant 0.000000e+00 : f32
    %8 = vector.broadcast %cst_7 : f32 to vector<8x512xf32>
    %9 = arith.cmpf ogt, %7, %8 : vector<8x512xf32>
    %c0_8 = arith.constant 0 : index
    %c0_9 = arith.constant 0 : index
    %10 = vector.load %arg6[%c0_8, %c0_9] : memref<8x1xf32, #tpu.memory_space<vmem>>, vector<8x1xf32>
    %11 = vector.broadcast %10 : vector<8x1xf32> to vector<8x512xf32>
    %12 = arith.mulf %11, %7 : vector<8x512xf32>
    %13 = arith.select %9, %7, %12 : vector<8x512xi1>, vector<8x512xf32>
    %14 = arith.truncf %13 : vector<8x512xf32> to vector<8x512xbf16>
    %c0_10 = arith.constant 0 : index
    %c0_11 = arith.constant 0 : index
    %c0_12 = arith.constant 0 : index
    %15 = vector.load %arg7[%c0_10, %c0_11, %c0_12] : memref<1x8x512xbf16, #tpu.memory_space<vmem>>, vector<1x8x512xbf16>
    %16 = vector.shape_cast %15 : vector<1x8x512xbf16> to vector<8x512xbf16>
    %17 = vector.shape_cast %14 : vector<8x512xbf16> to vector<1x8x512xbf16>
    tpu.vector_store %arg7[%c0_10, %c0_11, %c0_12], %17 {strides = array<i32>} : memref<1x8x512xbf16, #tpu.memory_space<vmem>>, vector<1x8x512xbf16>,
    return
  }
  func.func @transform_0(%arg0: i32, %arg1: i32, %arg2: i32) -> (i32, i32, i32) {
    %c0_i32 = arith.constant 0 : i32
    %c0_i32_0 = arith.constant 0 : i32
    %c0_i32_1 = arith.constant 0 : i32
    return %c0_i32, %c0_i32_0, %arg2 : i32, i32, i32
  }
  func.func @transform_1(%arg0: i32, %arg1: i32, %arg2: i32) -> (i32, i32, i32) {
    %c0_i32 = arith.constant 0 : i32
    return %arg0, %arg2, %arg1 : i32, i32, i32
  }
  func.func @transform_2(%arg0: i32, %arg1: i32, %arg2: i32) -> (i32, i32) {
    %c0_i32 = arith.constant 0 : i32
    %c0_i32_0 = arith.constant 0 : i32
    %c0_i32_1 = arith.constant 0 : i32
    return %c0_i32, %c0_i32_0 : i32, i32
  }
  func.func @transform_3(%arg0: i32, %arg1: i32, %arg2: i32) -> (i32, i32) {
    %c0_i32 = arith.constant 0 : i32
    %c0_i32_0 = arith.constant 0 : i32
    %c0_i32_1 = arith.constant 0 : i32
    return %c0_i32, %c0_i32_0 : i32, i32
  }
  func.func @transform_4(%arg0: i32, %arg1: i32, %arg2: i32) -> (i32, i32, i32) {
    %c0_i32 = arith.constant 0 : i32
    %c0_i32_0 = arith.constant 0 : i32
    return %arg0, %c0_i32, %arg1 : i32, i32, i32
  }
}

module attributes {stable_mosaic.version = 11 : i64} {
  func.func @kernel(%arg0: i32, %arg1: i32, %arg2: i32, %arg3: memref<1x8x72xbf16, #tpu.memory_space<vmem>>, %arg4: memref<1x72x512xbf16, #tpu.memory_space<vmem>>, %arg5: memref<8x1xf32, #tpu.memory_space<vmem>>, %arg6: memref<8x1xf32, #tpu.memory_space<vmem>>, %arg7: memref<1x8x512xf32, #tpu.memory_space<vmem>>) attributes {dimension_semantics = [#tpu.dimension_semantics<parallel>, #tpu.dimension_semantics<parallel>, #tpu.dimension_semantics<arbitrary>], iteration_bounds = array<i64: 2, 2, 1>, scalar_prefetch = 0 : i64, scratch_operands = 0 : i64, tpu.core_type = #tpu.core_type<tc>, window_params = [{transform_indices = @transform_0, window_bounds = array<i64: 1, 8, 72>}, {transform_indices = @transform_1, window_bounds = array<i64: 1, 72, 512>}, {pipeline_mode = #tpu.pipeline_mode<synchronous>, transform_indices = @transform_2, window_bounds = array<i64: 8, 1>}, {pipeline_mode = #tpu.pipeline_mode<synchronous>, transform_indices = @transform_3, window_bounds = array<i64: 8, 1>}, {transform_indices = @transform_4, window_bounds = array<i64: 1, 8, 512>}]} {
    %c0 = arith.constant 0 : index
    %c0_0 = arith.constant 0 : index
    %c0_1 = arith.constant 0 : index
    %0 = vector.load %arg3[%c0, %c0_0, %c0_1] : memref<1x8x72xbf16, #tpu.memory_space<vmem>>, vector<1x8x72xbf16>
    %1 = vector.shape_cast %0 : vector<1x8x72xbf16> to vector<8x72xbf16>
    %c0_2 = arith.constant 0 : index
    %c0_3 = arith.constant 0 : index
    %c0_4 = arith.constant 0 : index
    %2 = vector.load %arg4[%c0_2, %c0_3, %c0_4] : memref<1x72x512xbf16, #tpu.memory_space<vmem>>, vector<1x72x512xbf16>
    %3 = vector.shape_cast %2 : vector<1x72x512xbf16> to vector<72x512xbf16>
    %cst = arith.constant dense<0.000000e+00> : vector<8x512xf32>
    %4 = tpu.matmul %1, %3, %cst {dimension_numbers = #tpu.dot_dimension_numbers<[1], [0], [0], [1], [0, 0, 1, 1], [], []>} : vector<8x72xbf16>, vector<72x512xbf16>, vector<8x512xf32> -> vector<8x512xf32>
    %c0_5 = arith.constant 0 : index
    %c0_6 = arith.constant 0 : index
    %5 = vector.load %arg5[%c0_5, %c0_6] : memref<8x1xf32, #tpu.memory_space<vmem>>, vector<8x1xf32>
    %6 = vector.broadcast %5 : vector<8x1xf32> to vector<8x512xf32>
    %7 = arith.addf %4, %6 : vector<8x512xf32>
    %c0_7 = arith.constant 0 : index
    %c0_8 = arith.constant 0 : index
    %c0_9 = arith.constant 0 : index
    %8 = vector.load %arg7[%c0_7, %c0_8, %c0_9] : memref<1x8x512xf32, #tpu.memory_space<vmem>>, vector<1x8x512xf32>
    %9 = vector.shape_cast %8 : vector<1x8x512xf32> to vector<8x512xf32>
    %10 = vector.shape_cast %7 : vector<8x512xf32> to vector<1x8x512xf32>
    tpu.vector_store %arg7[%c0_7, %c0_8, %c0_9], %10 {strides = array<i32>} : memref<1x8x512xf32, #tpu.memory_space<vmem>>, vector<1x8x512xf32>,
    return
  }
  func.func @transform_0(%arg0: i32, %arg1: i32, %arg2: i32) -> (i32, i32, i32) {
    %c0_i32 = arith.constant 0 : i32
    %c0_i32_0 = arith.constant 0 : i32
    %c0_i32_1 = arith.constant 0 : i32
    return %c0_i32, %c0_i32_0, %arg2 : i32, i32, i32
  }
  func.func @transform_1(%arg0: i32, %arg1: i32, %arg2: i32) -> (i32, i32, i32) {
    %c0_i32 = arith.constant 0 : i32
    return %arg0, %arg2, %arg1 : i32, i32, i32
  }
  func.func @transform_2(%arg0: i32, %arg1: i32, %arg2: i32) -> (i32, i32) {
    %c0_i32 = arith.constant 0 : i32
    %c0_i32_0 = arith.constant 0 : i32
    %c0_i32_1 = arith.constant 0 : i32
    return %c0_i32, %c0_i32_0 : i32, i32
  }
  func.func @transform_3(%arg0: i32, %arg1: i32, %arg2: i32) -> (i32, i32) {
    %c0_i32 = arith.constant 0 : i32
    %c0_i32_0 = arith.constant 0 : i32
    %c0_i32_1 = arith.constant 0 : i32
    return %c0_i32, %c0_i32_0 : i32, i32
  }
  func.func @transform_4(%arg0: i32, %arg1: i32, %arg2: i32) -> (i32, i32, i32) {
    %c0_i32 = arith.constant 0 : i32
    %c0_i32_0 = arith.constant 0 : i32
    return %arg0, %c0_i32, %arg1 : i32, i32, i32
  }
}

module attributes {stable_mosaic.version = 11 : i64} {
  func.func @kernel(%arg0: i32, %arg1: i32, %arg2: i32, %arg3: memref<1x8x288xbf16, #tpu.memory_space<vmem>>, %arg4: memref<1x288x256xbf16, #tpu.memory_space<vmem>>, %arg5: memref<8x1xf32, #tpu.memory_space<vmem>>, %arg6: memref<8x1xf32, #tpu.memory_space<vmem>>, %arg7: memref<1x8x256xf32, #tpu.memory_space<vmem>>) attributes {dimension_semantics = [#tpu.dimension_semantics<parallel>, #tpu.dimension_semantics<parallel>, #tpu.dimension_semantics<arbitrary>], iteration_bounds = array<i64: 2, 1, 1>, scalar_prefetch = 0 : i64, scratch_operands = 0 : i64, tpu.core_type = #tpu.core_type<tc>, window_params = [{transform_indices = @transform_0, window_bounds = array<i64: 1, 8, 288>}, {transform_indices = @transform_1, window_bounds = array<i64: 1, 288, 256>}, {pipeline_mode = #tpu.pipeline_mode<synchronous>, transform_indices = @transform_2, window_bounds = array<i64: 8, 1>}, {pipeline_mode = #tpu.pipeline_mode<synchronous>, transform_indices = @transform_3, window_bounds = array<i64: 8, 1>}, {transform_indices = @transform_4, window_bounds = array<i64: 1, 8, 256>}]} {
    %c0 = arith.constant 0 : index
    %c0_0 = arith.constant 0 : index
    %c0_1 = arith.constant 0 : index
    %0 = vector.load %arg3[%c0, %c0_0, %c0_1] : memref<1x8x288xbf16, #tpu.memory_space<vmem>>, vector<1x8x288xbf16>
    %1 = vector.shape_cast %0 : vector<1x8x288xbf16> to vector<8x288xbf16>
    %c0_2 = arith.constant 0 : index
    %c0_3 = arith.constant 0 : index
    %c0_4 = arith.constant 0 : index
    %2 = vector.load %arg4[%c0_2, %c0_3, %c0_4] : memref<1x288x256xbf16, #tpu.memory_space<vmem>>, vector<1x288x256xbf16>
    %3 = vector.shape_cast %2 : vector<1x288x256xbf16> to vector<288x256xbf16>
    %cst = arith.constant dense<0.000000e+00> : vector<8x256xf32>
    %4 = tpu.matmul %1, %3, %cst {dimension_numbers = #tpu.dot_dimension_numbers<[1], [0], [0], [1], [0, 0, 1, 1], [], []>} : vector<8x288xbf16>, vector<288x256xbf16>, vector<8x256xf32> -> vector<8x256xf32>
    %c0_5 = arith.constant 0 : index
    %c0_6 = arith.constant 0 : index
    %5 = vector.load %arg5[%c0_5, %c0_6] : memref<8x1xf32, #tpu.memory_space<vmem>>, vector<8x1xf32>
    %6 = vector.broadcast %5 : vector<8x1xf32> to vector<8x256xf32>
    %7 = arith.addf %4, %6 : vector<8x256xf32>
    %cst_7 = arith.constant 0.000000e+00 : f32
    %8 = vector.broadcast %cst_7 : f32 to vector<8x256xf32>
    %9 = arith.cmpf ogt, %7, %8 : vector<8x256xf32>
    %c0_8 = arith.constant 0 : index
    %c0_9 = arith.constant 0 : index
    %10 = vector.load %arg6[%c0_8, %c0_9] : memref<8x1xf32, #tpu.memory_space<vmem>>, vector<8x1xf32>
    %11 = vector.broadcast %10 : vector<8x1xf32> to vector<8x256xf32>
    %12 = arith.mulf %11, %7 : vector<8x256xf32>
    %13 = arith.select %9, %7, %12 : vector<8x256xi1>, vector<8x256xf32>
    %c0_10 = arith.constant 0 : index
    %c0_11 = arith.constant 0 : index
    %c0_12 = arith.constant 0 : index
    %14 = vector.load %arg7[%c0_10, %c0_11, %c0_12] : memref<1x8x256xf32, #tpu.memory_space<vmem>>, vector<1x8x256xf32>
    %15 = vector.shape_cast %14 : vector<1x8x256xf32> to vector<8x256xf32>
    %16 = vector.shape_cast %13 : vector<8x256xf32> to vector<1x8x256xf32>
    tpu.vector_store %arg7[%c0_10, %c0_11, %c0_12], %16 {strides = array<i32>} : memref<1x8x256xf32, #tpu.memory_space<vmem>>, vector<1x8x256xf32>,
    return
  }
  func.func @transform_0(%arg0: i32, %arg1: i32, %arg2: i32) -> (i32, i32, i32) {
    %c0_i32 = arith.constant 0 : i32
    %c0_i32_0 = arith.constant 0 : i32
    %c0_i32_1 = arith.constant 0 : i32
    return %c0_i32, %c0_i32_0, %arg2 : i32, i32, i32
  }
  func.func @transform_1(%arg0: i32, %arg1: i32, %arg2: i32) -> (i32, i32, i32) {
    %c0_i32 = arith.constant 0 : i32
    return %arg0, %arg2, %arg1 : i32, i32, i32
  }
  func.func @transform_2(%arg0: i32, %arg1: i32, %arg2: i32) -> (i32, i32) {
    %c0_i32 = arith.constant 0 : i32
    %c0_i32_0 = arith.constant 0 : i32
    %c0_i32_1 = arith.constant 0 : i32
    return %c0_i32, %c0_i32_0 : i32, i32
  }
  func.func @transform_3(%arg0: i32, %arg1: i32, %arg2: i32) -> (i32, i32) {
    %c0_i32 = arith.constant 0 : i32
    %c0_i32_0 = arith.constant 0 : i32
    %c0_i32_1 = arith.constant 0 : i32
    return %c0_i32, %c0_i32_0 : i32, i32
  }
  func.func @transform_4(%arg0: i32, %arg1: i32, %arg2: i32) -> (i32, i32, i32) {
    %c0_i32 = arith.constant 0 : i32
    %c0_i32_0 = arith.constant 0 : i32
    return %arg0, %c0_i32, %arg1 : i32, i32, i32
  }
}

module attributes {stable_mosaic.version = 11 : i64} {
  func.func @kernel(%arg0: i32, %arg1: i32, %arg2: i32, %arg3: memref<1x8x288xbf16, #tpu.memory_space<vmem>>, %arg4: memref<1x288x256xbf16, #tpu.memory_space<vmem>>, %arg5: memref<8x1xf32, #tpu.memory_space<vmem>>, %arg6: memref<8x1xf32, #tpu.memory_space<vmem>>, %arg7: memref<1x8x256xbf16, #tpu.memory_space<vmem>>) attributes {dimension_semantics = [#tpu.dimension_semantics<parallel>, #tpu.dimension_semantics<parallel>, #tpu.dimension_semantics<arbitrary>], iteration_bounds = array<i64: 2, 1, 1>, scalar_prefetch = 0 : i64, scratch_operands = 0 : i64, tpu.core_type = #tpu.core_type<tc>, window_params = [{transform_indices = @transform_0, window_bounds = array<i64: 1, 8, 288>}, {transform_indices = @transform_1, window_bounds = array<i64: 1, 288, 256>}, {pipeline_mode = #tpu.pipeline_mode<synchronous>, transform_indices = @transform_2, window_bounds = array<i64: 8, 1>}, {pipeline_mode = #tpu.pipeline_mode<synchronous>, transform_indices = @transform_3, window_bounds = array<i64: 8, 1>}, {transform_indices = @transform_4, window_bounds = array<i64: 1, 8, 256>}]} {
    %c0 = arith.constant 0 : index
    %c0_0 = arith.constant 0 : index
    %c0_1 = arith.constant 0 : index
    %0 = vector.load %arg3[%c0, %c0_0, %c0_1] : memref<1x8x288xbf16, #tpu.memory_space<vmem>>, vector<1x8x288xbf16>
    %1 = vector.shape_cast %0 : vector<1x8x288xbf16> to vector<8x288xbf16>
    %c0_2 = arith.constant 0 : index
    %c0_3 = arith.constant 0 : index
    %c0_4 = arith.constant 0 : index
    %2 = vector.load %arg4[%c0_2, %c0_3, %c0_4] : memref<1x288x256xbf16, #tpu.memory_space<vmem>>, vector<1x288x256xbf16>
    %3 = vector.shape_cast %2 : vector<1x288x256xbf16> to vector<288x256xbf16>
    %cst = arith.constant dense<0.000000e+00> : vector<8x256xf32>
    %4 = tpu.matmul %1, %3, %cst {dimension_numbers = #tpu.dot_dimension_numbers<[1], [0], [0], [1], [0, 0, 1, 1], [], []>} : vector<8x288xbf16>, vector<288x256xbf16>, vector<8x256xf32> -> vector<8x256xf32>
    %c0_5 = arith.constant 0 : index
    %c0_6 = arith.constant 0 : index
    %5 = vector.load %arg5[%c0_5, %c0_6] : memref<8x1xf32, #tpu.memory_space<vmem>>, vector<8x1xf32>
    %6 = vector.broadcast %5 : vector<8x1xf32> to vector<8x256xf32>
    %7 = arith.addf %4, %6 : vector<8x256xf32>
    %cst_7 = arith.constant 0.000000e+00 : f32
    %8 = vector.broadcast %cst_7 : f32 to vector<8x256xf32>
    %9 = arith.cmpf ogt, %7, %8 : vector<8x256xf32>
    %c0_8 = arith.constant 0 : index
    %c0_9 = arith.constant 0 : index
    %10 = vector.load %arg6[%c0_8, %c0_9] : memref<8x1xf32, #tpu.memory_space<vmem>>, vector<8x1xf32>
    %11 = vector.broadcast %10 : vector<8x1xf32> to vector<8x256xf32>
    %12 = arith.mulf %11, %7 : vector<8x256xf32>
    %13 = arith.select %9, %7, %12 : vector<8x256xi1>, vector<8x256xf32>
    %14 = arith.truncf %13 : vector<8x256xf32> to vector<8x256xbf16>
    %c0_10 = arith.constant 0 : index
    %c0_11 = arith.constant 0 : index
    %c0_12 = arith.constant 0 : index
    %15 = vector.load %arg7[%c0_10, %c0_11, %c0_12] : memref<1x8x256xbf16, #tpu.memory_space<vmem>>, vector<1x8x256xbf16>
    %16 = vector.shape_cast %15 : vector<1x8x256xbf16> to vector<8x256xbf16>
    %17 = vector.shape_cast %14 : vector<8x256xbf16> to vector<1x8x256xbf16>
    tpu.vector_store %arg7[%c0_10, %c0_11, %c0_12], %17 {strides = array<i32>} : memref<1x8x256xbf16, #tpu.memory_space<vmem>>, vector<1x8x256xbf16>,
    return
  }
  func.func @transform_0(%arg0: i32, %arg1: i32, %arg2: i32) -> (i32, i32, i32) {
    %c0_i32 = arith.constant 0 : i32
    %c0_i32_0 = arith.constant 0 : i32
    %c0_i32_1 = arith.constant 0 : i32
    return %c0_i32, %c0_i32_0, %arg2 : i32, i32, i32
  }
  func.func @transform_1(%arg0: i32, %arg1: i32, %arg2: i32) -> (i32, i32, i32) {
    %c0_i32 = arith.constant 0 : i32
    return %arg0, %arg2, %arg1 : i32, i32, i32
  }
  func.func @transform_2(%arg0: i32, %arg1: i32, %arg2: i32) -> (i32, i32) {
    %c0_i32 = arith.constant 0 : i32
    %c0_i32_0 = arith.constant 0 : i32
    %c0_i32_1 = arith.constant 0 : i32
    return %c0_i32, %c0_i32_0 : i32, i32
  }
  func.func @transform_3(%arg0: i32, %arg1: i32, %arg2: i32) -> (i32, i32) {
    %c0_i32 = arith.constant 0 : i32
    %c0_i32_0 = arith.constant 0 : i32
    %c0_i32_1 = arith.constant 0 : i32
    return %c0_i32, %c0_i32_0 : i32, i32
  }
  func.func @transform_4(%arg0: i32, %arg1: i32, %arg2: i32) -> (i32, i32, i32) {
    %c0_i32 = arith.constant 0 : i32
    %c0_i32_0 = arith.constant 0 : i32
    return %arg0, %c0_i32, %arg1 : i32, i32, i32
  }
}

module attributes {stable_mosaic.version = 11 : i64} {
  func.func @kernel(%arg0: i32, %arg1: i32, %arg2: i32, %arg3: memref<1x8x72xbf16, #tpu.memory_space<vmem>>, %arg4: memref<1x72x256xbf16, #tpu.memory_space<vmem>>, %arg5: memref<8x1xf32, #tpu.memory_space<vmem>>, %arg6: memref<8x1xf32, #tpu.memory_space<vmem>>, %arg7: memref<1x8x256xf32, #tpu.memory_space<vmem>>) attributes {dimension_semantics = [#tpu.dimension_semantics<parallel>, #tpu.dimension_semantics<parallel>, #tpu.dimension_semantics<arbitrary>], iteration_bounds = array<i64: 2, 1, 1>, scalar_prefetch = 0 : i64, scratch_operands = 0 : i64, tpu.core_type = #tpu.core_type<tc>, window_params = [{transform_indices = @transform_0, window_bounds = array<i64: 1, 8, 72>}, {transform_indices = @transform_1, window_bounds = array<i64: 1, 72, 256>}, {pipeline_mode = #tpu.pipeline_mode<synchronous>, transform_indices = @transform_2, window_bounds = array<i64: 8, 1>}, {pipeline_mode = #tpu.pipeline_mode<synchronous>, transform_indices = @transform_3, window_bounds = array<i64: 8, 1>}, {transform_indices = @transform_4, window_bounds = array<i64: 1, 8, 256>}]} {
    %c0 = arith.constant 0 : index
    %c0_0 = arith.constant 0 : index
    %c0_1 = arith.constant 0 : index
    %0 = vector.load %arg3[%c0, %c0_0, %c0_1] : memref<1x8x72xbf16, #tpu.memory_space<vmem>>, vector<1x8x72xbf16>
    %1 = vector.shape_cast %0 : vector<1x8x72xbf16> to vector<8x72xbf16>
    %c0_2 = arith.constant 0 : index
    %c0_3 = arith.constant 0 : index
    %c0_4 = arith.constant 0 : index
    %2 = vector.load %arg4[%c0_2, %c0_3, %c0_4] : memref<1x72x256xbf16, #tpu.memory_space<vmem>>, vector<1x72x256xbf16>
    %3 = vector.shape_cast %2 : vector<1x72x256xbf16> to vector<72x256xbf16>
    %cst = arith.constant dense<0.000000e+00> : vector<8x256xf32>
    %4 = tpu.matmul %1, %3, %cst {dimension_numbers = #tpu.dot_dimension_numbers<[1], [0], [0], [1], [0, 0, 1, 1], [], []>} : vector<8x72xbf16>, vector<72x256xbf16>, vector<8x256xf32> -> vector<8x256xf32>
    %c0_5 = arith.constant 0 : index
    %c0_6 = arith.constant 0 : index
    %5 = vector.load %arg5[%c0_5, %c0_6] : memref<8x1xf32, #tpu.memory_space<vmem>>, vector<8x1xf32>
    %6 = vector.broadcast %5 : vector<8x1xf32> to vector<8x256xf32>
    %7 = arith.addf %4, %6 : vector<8x256xf32>
    %cst_7 = arith.constant 0.000000e+00 : f32
    %8 = vector.broadcast %cst_7 : f32 to vector<8x256xf32>
    %9 = arith.cmpf ogt, %7, %8 : vector<8x256xf32>
    %c0_8 = arith.constant 0 : index
    %c0_9 = arith.constant 0 : index
    %10 = vector.load %arg6[%c0_8, %c0_9] : memref<8x1xf32, #tpu.memory_space<vmem>>, vector<8x1xf32>
    %11 = vector.broadcast %10 : vector<8x1xf32> to vector<8x256xf32>
    %12 = arith.mulf %11, %7 : vector<8x256xf32>
    %13 = arith.select %9, %7, %12 : vector<8x256xi1>, vector<8x256xf32>
    %c0_10 = arith.constant 0 : index
    %c0_11 = arith.constant 0 : index
    %c0_12 = arith.constant 0 : index
    %14 = vector.load %arg7[%c0_10, %c0_11, %c0_12] : memref<1x8x256xf32, #tpu.memory_space<vmem>>, vector<1x8x256xf32>
    %15 = vector.shape_cast %14 : vector<1x8x256xf32> to vector<8x256xf32>
    %16 = vector.shape_cast %13 : vector<8x256xf32> to vector<1x8x256xf32>
    tpu.vector_store %arg7[%c0_10, %c0_11, %c0_12], %16 {strides = array<i32>} : memref<1x8x256xf32, #tpu.memory_space<vmem>>, vector<1x8x256xf32>,
    return
  }
  func.func @transform_0(%arg0: i32, %arg1: i32, %arg2: i32) -> (i32, i32, i32) {
    %c0_i32 = arith.constant 0 : i32
    %c0_i32_0 = arith.constant 0 : i32
    %c0_i32_1 = arith.constant 0 : i32
    return %c0_i32, %c0_i32_0, %arg2 : i32, i32, i32
  }
  func.func @transform_1(%arg0: i32, %arg1: i32, %arg2: i32) -> (i32, i32, i32) {
    %c0_i32 = arith.constant 0 : i32
    return %arg0, %arg2, %arg1 : i32, i32, i32
  }
  func.func @transform_2(%arg0: i32, %arg1: i32, %arg2: i32) -> (i32, i32) {
    %c0_i32 = arith.constant 0 : i32
    %c0_i32_0 = arith.constant 0 : i32
    %c0_i32_1 = arith.constant 0 : i32
    return %c0_i32, %c0_i32_0 : i32, i32
  }
  func.func @transform_3(%arg0: i32, %arg1: i32, %arg2: i32) -> (i32, i32) {
    %c0_i32 = arith.constant 0 : i32
    %c0_i32_0 = arith.constant 0 : i32
    %c0_i32_1 = arith.constant 0 : i32
    return %c0_i32, %c0_i32_0 : i32, i32
  }
  func.func @transform_4(%arg0: i32, %arg1: i32, %arg2: i32) -> (i32, i32, i32) {
    %c0_i32 = arith.constant 0 : i32
    %c0_i32_0 = arith.constant 0 : i32
    return %arg0, %c0_i32, %arg1 : i32, i32, i32
  }
}

</mosaic_0001>

<bundles_post_ra>
// kernel: recurrent_projection.17
= control target key start
LH: loop header
LB: loop body
LE: loop exit
PB: predicated region body
PF: predicated region fallthrough
CT: control target
= control target key end

     0   :  { %s523_s15 = smov 0   ;;  %s525_s16 = smov 0   ;;  %s565_s0 = inlined_call_operand.vmem [shape: bf16[1,4,8], index: 0, kind: input, shape index: {}]   ;;  %s566_s1 = inlined_call_operand.vmem [shape: bf16[2,8,64], index: 1, kind: input, shape index: {}]   ;;  %s567_s2 = inlined_call_operand.vmem [shape: f32[4,1], index: 2, kind: input, shape index: {}]   ;;  %s568_s3 = inlined_call_operand.vmem [shape: f32[4,1], index: 3, kind: input, shape index: {}]   ;;  %s569_s4 = inlined_call_operand.vmem [shape: bf16[2,4,64], index: 4, kind: output, shape index: {}]  }
   0x1   :  { %s527_s17 = smov 0  }
   0x2 LB: > { %s33_s18 = sadd.s32 1, %s489_s16  ;;  %p429_p0 = scmp.ge.s32.totalorder %s493_s17, 1  ;;  %s493_s17 = sphi %s527_s17, %s14_s17   ;;  %s489_s16 = sphi %s525_s16, %s571_s16   ;;  %s485_s15 = sphi %s523_s15, %s570_s15  }
   0x3   : > { %p35_p1 = scmp.ge.s32.totalorder %s33_s18, 2  ;;  %p201_p2 = scmp.lt.s32.totalorder %s493_s17, 3 }
   0x5   : > { %s573_s18 = smov (%p35_p1, %s33_s18), 0  ;;  %p202_p3 = pnand %p429_p0, %p201_p2 }
   0x6   : > { %p242_p4 = scmp.lt.s32.totalorder (!%p202_p3), %s485_s15, 1 }
   0x7   : > { %205 = sbr.rel (%p202_p3) target bundleno = 221 (0xdd), region = 36 }
   0xc   : > { %v495_v0 = vmov 0.0   ;;  %vm496_vm0 = vmmov 0   ;;  %v262_v1 = vld [vmem:[%s567_s2] sm:$0xf]  ;;  %s575_s15 = smov (!%p242_p4, %s485_s15), 1  ;;  %v497_v2 = vmov 0  }
   0xd   : > { %437 = vmatprep.subr.bf16.mxu0 %v495_v0  ;;  %439 = vmatprep.mubr.msk.bf16.mxu0 %vm496_vm0, %v495_v0  ;;  %s430_s21 = sshll.u32 %s575_s15, 2  ;;  %vm272_vm1 = vcmask 1043456   ;;  %v317_v3 = vld [vmem:[%s568_s3] sm:$0xf]  ;;  %vm268_vm2 = vcmask 64512   ;;  %s431_s29 = sshll.u32 %s575_s15, 1 }
   0xe   : > { %470 = vset.pattern.permute.xlu0 %v497_v2  ;;  %s251_s26 = scalar_lea.vmem %s566_s1, %s430_s21  ;;  %v260_v6 = vld [vmem:[%s565_s0] sm:$0x3]  ;;  %s258_s6 = scalar_lea.vmem %s569_s4, %s431_s29  ;;  %vm326_vm4 = vcmask 517120  }
   0xf   : > { %265 = vperm.xlu0 %470, %v262_v1   ;;  %v261_v4 = vld [vmem:[%s251_s26] sm:$0xf] }
  0x10   : > { %v274_v5 = vsel %vm272_vm1, %v261_v4, 0 }
  0x11   : > { %438 = vmatpush3.bf16.msra.mxu0 %v274_v5 }
  0x13   : > { %320 = vperm.xlu0 %470, %v317_v3  }
  0x14   : > { %440 = vmatmul.mubr.msk.bf16.vlgmr.msra.gmra.mxu0 %vm268_vm2, %v260_v6 }
  0x8a   : > { %v266_v7 = vpop.permute.xlu0 %265 }
  0x8e   : > { %v321_v10 = vpop.permute.xlu0 %320 }
  0xd4   : > { %v310_v8 = vpop.f32.mrf.mxu0 }
  0xd5   : > { %v311_v9 = vadd.f32 %v310_v8, %v266_v7 }
  0xd6   : > { %v441_v11 = vpop.f32.mrf.mxu0 }
  0xd7   : > { %vm316_vm3 = vcmp.gt.f32.partialorder %v311_v9, 0.0  ;;  %v323_v12 = vmul.f32 %v321_v10, %v311_v9 }
  0xd8   : > { %v313_v13 = vpop.f32.mrf.mxu0 }
  0xd9   : > { %v324_v14 = vsel %vm316_vm3, %v311_v9, %v323_v12 }
  0xda   : > { %v325_v15 = vpack.c.bf16 %v324_v14, %v324_v14  ;;  %v442_v16 = vpop.f32.mrf.mxu0 }
  0xdc   : > { %327 = vst.msk [vmem:[%s258_s6] sm:$0x3] %vm326_vm4, %v325_v15 }
  0xdd PF: > { %s14_s17 = sadd.s32 1, %s493_s17   ;;  %s570_s15 = smov %s489_s16 }
  0xde   : > { %p11_p5 = scmp.ge.s32.totalorder %s14_s17, 4   ;;  %s571_s16 = smov %s573_s18 }
  0xe0   :  { %13 = sbr.rel (!%p11_p5) target bundleno = 2 (0x2), region = 69 }

// kernel: recurrent_projection.16
= control target key start
LH: loop header
LB: loop body
LE: loop exit
PB: predicated region body
PF: predicated region fallthrough
CT: control target
= control target key end

     0   :  { %s607_s15 = smov 0   ;;  %s609_s16 = smov 0   ;;  %s659_s0 = inlined_call_operand.vmem [shape: bf16[1,12,8], index: 0, kind: input, shape index: {}]   ;;  %s660_s1 = inlined_call_operand.vmem [shape: bf16[2,8,256], index: 1, kind: input, shape index: {}]   ;;  %s661_s2 = inlined_call_operand.vmem [shape: f32[12,1], index: 2, kind: input, shape index: {}]   ;;  %s662_s3 = inlined_call_operand.vmem [shape: f32[12,1], index: 3, kind: input, shape index: {}]   ;;  %s663_s4 = inlined_call_operand.vmem [shape: bf16[2,12,256], index: 4, kind: output, shape index: {}]  }
   0x1   :  { %s611_s17 = smov 0  }
   0x2 LB: > { %s33_s18 = sadd.s32 1, %s575_s16  ;;  %p509_p0 = scmp.ge.s32.totalorder %s579_s17, 1  ;;  %s579_s17 = sphi %s611_s17, %s14_s17   ;;  %s575_s16 = sphi %s609_s16, %s665_s16   ;;  %s571_s15 = sphi %s607_s15, %s664_s15  }
   0x3   : > { %p35_p1 = scmp.ge.s32.totalorder %s33_s18, 2  ;;  %p205_p2 = scmp.lt.s32.totalorder %s579_s17, 3 }
   0x5   : > { %s667_s18 = smov (%p35_p1, %s33_s18), 0  ;;  %p206_p3 = pnand %p509_p0, %p205_p2 }
   0x6   : > { %p252_p4 = scmp.lt.s32.totalorder (!%p206_p3), %s571_s15, 1 }
   0x7   : > { %209 = sbr.rel (%p206_p3) target bundleno = 229 (0xe5), region = 36 }
   0xc   : > { %v581_v0 = vmov 0   ;;  %v279_v1 = vld [vmem:[%s661_s2] sm:$0xff]  ;;  %s669_s15 = smov (!%p252_p4, %s571_s15), 1  ;;  %v280_v3 = vld [vmem:[%s661_s2 + $0x8] sm:$0xf]  ;;  %vm305_vm0 = vcmask 1043456  }
   0xd   : > { %344 = vmatprep.mubr.bf16.mxu0 %v581_v0  ;;  %552 = vset.pattern.permute.xlu0 %v581_v0  ;;  %v359_v2 = vld [vmem:[%s662_s3] sm:$0xff]  ;;  %s523_s25 = sshll.u32 %s669_s15, 3  ;;  %v360_v4 = vld [vmem:[%s662_s3 + $0x8] sm:$0xf]  ;;  %vm301_vm1 = vcmask 64512   ;;  %s524_s7 = sshll.u32 %s669_s15, 4 }
   0xe   : > { %283 = vperm.xlu0 %552, %v279_v1   ;;  %553 = vset.pattern.permute.xlu1 %v581_v0  ;;  %s263_s30 = scalar_lea.vmem %s660_s1, %s523_s25  ;;  %v556_v9 = vld [vmem:[%s659_s0] sm:$0x3f]   ;;  %s273_s10 = scalar_lea.vmem %s663_s4, %s524_s7 }
   0xf   : > { %363 = vperm.xlu1 %553, %v359_v2   ;;  %v278_v5 = vld [vmem:[%s263_s30] sm:$0xff] }
  0x10   : > { %v516_v6 = vcombine.high %v278_v5, %v278_v5  ;;  %v515_v7 = vcombine.low %v278_v5, %v278_v5 }
  0x12   : > { %288 = vperm.xlu0 %552, %v280_v3   ;;  %517 = vmatprep.subr.msk.bf16.mxu0 %vm305_vm0, %v516_v6  ;;  %v307_v8 = vsel %vm305_vm0, %v515_v7, 0 }
  0x13   : > { %368 = vperm.xlu1 %553, %v360_v4   ;;  %327 = vmatpush1.bf16.msra.mxu0 %v307_v8 }
  0x16   : > { %518 = vmatmul.mubr.msk.bf16.vlgmr.msra.gmra.mxu0 %vm301_vm1, %v556_v9 }
  0x89   : > { %v284_v10 = vpop.permute.xlu0 %283 }
  0x8a   : > { %v364_v11 = vpop.permute.xlu1 %363 }
  0x8d   : > { %v289_v17 = vpop.permute.xlu0 %288 }
  0x8e   : > { %v369_v21 = vpop.permute.xlu1 %368 }
  0xd6   : > { %v346_v12 = vpop.f32.mrf.mxu0 }
  0xd7   : > { %v347_v13 = vadd.f32 %v346_v12, %v284_v10 }
  0xd8   : > { %v348_v14 = vpop.f32.mrf.mxu0 }
  0xd9   : > { %v371_v15 = vmul.f32 %v364_v11, %v347_v13  ;;  %v349_v16 = vadd.f32 %v348_v14, %v284_v10  ;;  %vm355_vm2 = vcmp.gt.f32.partialorder %v347_v13, 0.0 }
  0xda   : > { %v350_v18 = vpop.f32.mrf.mxu0 }
  0xdb   : > { %vm356_vm3 = vcmp.gt.f32.partialorder %v349_v16, 0.0  ;;  %v372_v19 = vmul.f32 %v364_v11, %v349_v16  ;;  %v351_v20 = vadd.f32 %v350_v18, %v289_v17  ;;  %v375_v23 = vsel %vm355_vm2, %v347_v13, %v371_v15 }
  0xdc   : > { %v352_v22 = vpop.f32.mrf.mxu0 }
  0xdd   : > { %v376_v24 = vsel %vm356_vm3, %v349_v16, %v372_v19  ;;  %v373_v25 = vmul.f32 %v369_v21, %v351_v20  ;;  %v353_v26 = vadd.f32 %v352_v22, %v289_v17  ;;  %vm357_vm4 = vcmp.gt.f32.partialorder %v351_v20, 0.0 }
  0xde   : > { %v525_v27 = vpack.c.bf16 %v376_v24, %v375_v23 }
  0xdf   : > { %vm358_vm5 = vcmp.gt.f32.partialorder %v353_v26, 0.0  ;;  %v374_v28 = vmul.f32 %v369_v21, %v353_v26  ;;  %v377_v29 = vsel %vm357_vm4, %v351_v20, %v373_v25 }
  0xe0   : > { %391 = vst [vmem:[%s273_s10] sm:$0xff] %v525_v27 }
  0xe1   : > { %v378_v30 = vsel %vm358_vm5, %v353_v26, %v374_v28 }
  0xe2   : > { %v526_v31 = vpack.c.bf16 %v378_v30, %v377_v29 }
  0xe4   : > { %392 = vst [vmem:[%s273_s10 + $0x8] sm:$0x33] %v526_v31 }
  0xe5 PF: > { %s14_s17 = sadd.s32 1, %s579_s17   ;;  %s664_s15 = smov %s575_s16 }
  0xe6   : > { %p11_p5 = scmp.ge.s32.totalorder %s14_s17, 4   ;;  %s665_s16 = smov %s667_s18 }
  0xe8   :  { %13 = sbr.rel (!%p11_p5) target bundleno = 2 (0x2), region = 69 }

// kernel: recurrent_projection.18
= control target key start
LH: loop header
LB: loop body
LE: loop exit
PB: predicated region body
PF: predicated region fallthrough
CT: control target
= control target key end

     0   :  { %s793_s9 = smov 0   ;;  %s795_s10 = smov 0   ;;  %s856_s0 = inlined_call_operand.vmem [shape: bf16[2,64,36], index: 0, kind: input, shape index: {}]   ;;  %s857_s1 = inlined_call_operand.vmem [shape: bf16[2,36,256], index: 1, kind: input, shape index: {}]   ;;  %s858_s2 = inlined_call_operand.vmem [shape: bf16[2,64,256], index: 2, kind: output, shape index: {}]  }
   0x1   :  { %s797_s11 = smov 0  }
   0x2 LB: > { %s24_s12 = sadd.s32 1, %s771_s10  ;;  %p632_p0 = scmp.ge.s32.totalorder %s775_s11, 1  ;;  %s775_s11 = sphi %s797_s11, %s12_s11   ;;  %s771_s10 = sphi %s795_s10, %s860_s10   ;;  %s767_s9 = sphi %s793_s9, %s859_s9  }
   0x3   : > { %p26_p1 = scmp.ge.s32.totalorder %s24_s12, 2  ;;  %p143_p2 = scmp.lt.s32.totalorder %s775_s11, 3 }
   0x5   : > { %s862_s12 = smov (%p26_p1, %s24_s12), 0  ;;  %p144_p3 = pnand %p632_p0, %p143_p2 }
   0x6   : > { %p178_p4 = scmp.lt.s32.totalorder (!%p144_p3), %s767_s9, 1 }
   0x7   : > { %147 = sbr.rel (%p144_p3) target bundleno = 329 (0x149), region = 28 }
   0xc   : > { %v777_v0 = vmov 0   ;;  %s864_s9 = smov (!%p178_p4, %s767_s9), 1  ;;  %vm275_vm0 = vcmask 1041408   ;;  %vm262_vm1 = vcmask 293888  }
   0xd   : > { %314 = vmatprep.mubr.bf16.mxu0 %v777_v0  ;;  %334 = vmatprep.mubr.bf16.mxu1 %v777_v0  ;;  %s663_s13 = sshll.u32 %s864_s9, 5  ;;  %s679_s14 = smul.u32 40, %s864_s9 }
   0xe   : > { %s818_s17 = scalar_lea.vmem %s856_s0, %s663_s13  ;;  %s664_s21 = sshll.u32 %s864_s9, 6 }
   0xf   : > { %s191_s20 = scalar_lea.vmem %s857_s1, %s679_s14  ;;  %v713_v9 = vld [vmem:[%s818_s17] sm:$0xff]   ;;  %v714_v10 = vld [vmem:[%s818_s17 + $0x10] sm:$0xff]   ;;  %v715_v11 = vld [vmem:[%s818_s17 + $0x8] sm:$0xff]   ;;  %s201_s24 = scalar_lea.vmem %s858_s2, %s664_s21 }
  0x10   : > { %v216_v1 = vld [vmem:[%s191_s20 + $0x20] sm:$0x33]  ;;  %v707_v4 = vld [vmem:[%s191_s20 + $0x14] ss:$8 sps:$4 sm:$0xff]   ;;  %v709_v6 = vld [vmem:[%s191_s20 + $0x10] ss:$8 sps:$4 sm:$0xff]  }
  0x11   : > { %v647_v2 = vcombine.high %v216_v1, %v216_v1  ;;  %v646_v3 = vcombine.low %v216_v1, %v216_v1  ;;  %v710_v7 = vld [vmem:[%s191_s20 + $0x4] ss:$8 sps:$4 sm:$0xff]   ;;  %v712_v8 = vld [vmem:[%s191_s20] ss:$8 sps:$4 sm:$0xff]   ;;  %v716_v12 = vld [vmem:[%s818_s17 + $0x18] sm:$0xff]  }
  0x13   : > { %648 = vmatprep.subr.msk.bf16.mxu0 %vm275_vm0, %v647_v2  ;;  %673 = vmatprep.subr.msk.bf16.mxu1 %vm275_vm0, %v647_v2  ;;  %v277_v5 = vsel %vm275_vm0, %v646_v3, 0 }
  0x14   : > { %293 = vmatpush1.bf16.msra.mxu0 %v277_v5  ;;  %676 = vmatpush1.bf16.msra.mxu1 %v277_v5 }
  0x15   : > { %294 = vmatprep.subr.bf16.mxu0 %v707_v4  ;;  %674 = vmatprep.subr.bf16.mxu1 %v707_v4 }
  0x18   : > { %295 = vmatpush1.bf16.msra.mxu0 %v709_v6  ;;  %677 = vmatpush1.bf16.msra.mxu1 %v709_v6 }
  0x19   : > { %296 = vmatprep.subr.bf16.mxu0 %v710_v7  ;;  %675 = vmatprep.subr.bf16.mxu1 %v710_v7 }
  0x1c   : > { %297 = vmatpush1.bf16.msra.mxu0 %v712_v8  ;;  %678 = vmatpush1.bf16.msra.mxu1 %v712_v8 }
  0x1f   : > { %649 = vmatmul.mubr.msk.bf16.vlgmr.msra.gmra.mxu0 %vm262_vm1, %v713_v9  ;;  %651 = vmatmul.mubr.msk.bf16.vlgmr.msra.gmra.mxu1 %vm262_vm1, %v714_v10 }
  0x20   : > { %324 = vmatprep.mubr.bf16.mxu0 %v777_v0  ;;  %344 = vmatprep.mubr.bf16.mxu1 %v777_v0 }
  0x27   : > { %650 = vmatmul.mubr.msk.bf16.gmra.mxu0 %vm262_vm1, %v715_v11  ;;  %652 = vmatmul.mubr.msk.bf16.gmra.mxu1 %vm262_vm1, %v716_v12 }
  0xdf   : > { %v316_v13 = vpop.f32.mrf.mxu0  ;;  %v336_v14 = vpop.f32.mrf.mxu1 }
  0xe1   : > { %v318_v15 = vpop.f32.mrf.mxu0  ;;  %v827_v16 = vpop.f32.mrf.mxu1 }
  0xe3   : > { %v320_v17 = vpop.f32.mrf.mxu0  ;;  %v340_v18 = vpop.f32.mrf.mxu1 }
  0xe5   : > { %v322_v19 = vpop.f32.mrf.mxu0  ;;  %v829_v20 = vpop.f32.mrf.mxu1 }
  0xe7   : > { %v326_v21 = vpop.f32.mrf.mxu0  ;;  %v346_v22 = vpop.f32.mrf.mxu1 }
  0xe8   : > { %v355_v23 = vmax.f32 %v316_v13, %v326_v21 }
  0xe9   : > { %v328_v24 = vpop.f32.mrf.mxu0  ;;  %v831_v25 = vpop.f32.mrf.mxu1 }
  0xea   : > { %v368_v26 = vmax.f32 %v318_v15, %v328_v24  ;;  %v357_v28 = vmax.f32 %v355_v23, %v336_v14 }
  0xeb   : > { %v330_v27 = vpop.f32.mrf.mxu0  ;;  %v350_v30 = vpop.f32.mrf.mxu1 }
  0xec   : > { %v356_v29 = vmax.f32 %v320_v17, %v330_v27  ;;  %v370_v32 = vmax.f32 %v368_v26, %v827_v16  ;;  %v359_v35 = vmax.f32 %v357_v28, %v346_v22 }
  0xed   : > { %v332_v31 = vpop.f32.mrf.mxu0  ;;  %v835_v38 = vpop.f32.mrf.mxu1 }
  0xee   : > { %v358_v33 = vmax.f32 %v356_v29, %v340_v18  ;;  %v369_v34 = vmax.f32 %v322_v19, %v332_v31  ;;  %v372_v39 = vmax.f32 %v370_v32, %v831_v25 }
  0xf0   : > { %v360_v36 = vmax.f32 %v358_v33, %v350_v30  ;;  %v371_v37 = vmax.f32 %v369_v34, %v829_v20 }
  0xf2   : > { %v361_v40 = vmax.f32 %v359_v35, %v360_v36  ;;  %v373_v41 = vmax.f32 %v371_v37, %v835_v38 }
  0xf4   : > { %v362_v42 = vrot.slane %v361_v40, 4  ;;  %v374_v43 = vmax.f32 %v372_v39, %v373_v41 }
  0xf6   : > { %v363_v44 = vmax.f32 %v361_v40, %v362_v42  ;;  %v375_v45 = vrot.slane %v374_v43, 4 }
  0xf8   : > { %v364_v46 = vrot.slane %v363_v44, 2  ;;  %v376_v47 = vmax.f32 %v374_v43, %v375_v45 }
  0xfa   : > { %v365_v48 = vmax.f32 %v363_v44, %v364_v46  ;;  %v377_v49 = vrot.slane %v376_v47, 2 }
  0xfc   : > { %v366_v50 = vrot.slane %v365_v48, 1  ;;  %v378_v51 = vmax.f32 %v376_v47, %v377_v49 }
  0xfe   : > { %v367_v52 = vmax.f32 %v365_v48, %v366_v50  ;;  %v379_v53 = vrot.slane %v378_v51, 1 }
 0x100   : > { %v381_v54 = vsub.f32 %v316_v13, %v367_v52  ;;  %v383_v55 = vsub.f32 %v320_v17, %v367_v52  ;;  %v385_v56 = vsub.f32 %v326_v21, %v367_v52  ;;  %v387_v57 = vsub.f32 %v330_v27, %v367_v52 }
 0x101   : > { %v389_v58 = vsub.f32 %v336_v14, %v367_v52  ;;  %v380_v61 = vmax.f32 %v378_v51, %v379_v53  ;;  %v391_v62 = vsub.f32 %v340_v18, %v367_v52  ;;  %v393_v3 = vsub.f32 %v346_v22, %v367_v52 }
 0x102   : > { %v397_v59 = vmul.f32 1.442695, %v381_v54  ;;  %v401_v60 = vmul.f32 1.442695, %v383_v55  ;;  %v405_v63 = vmul.f32 1.442695, %v385_v56  ;;  %v395_v7 = vsub.f32 %v350_v30, %v367_v52 }
 0x103   : > { %v382_v0 = vsub.f32 %v318_v15, %v380_v61  ;;  %v409_v1 = vmul.f32 1.442695, %v387_v57  ;;  %v384_v2 = vsub.f32 %v322_v19, %v380_v61  ;;  %v413_v4 = vmul.f32 1.442695, %v389_v58 }
 0x104   : > { %717 = vpow2.f32 %v397_v59  ;;  %v417_v5 = vmul.f32 1.442695, %v391_v62  ;;  %v386_v6 = vsub.f32 %v328_v24, %v380_v61  ;;  %v388_v9 = vsub.f32 %v332_v31, %v380_v61 }
 0x105   : > { %719 = vpow2.f32 %v401_v60  ;;  %v399_v8 = vmul.f32 1.442695, %v382_v0  ;;  %v403_v10 = vmul.f32 1.442695, %v384_v2  ;;  %v421_v11 = vmul.f32 1.442695, %v393_v3 }
 0x106   : > { %721 = vpow2.f32 %v405_v63  ;;  %v390_v12 = vsub.f32 %v827_v16, %v380_v61  ;;  %v407_v13 = vmul.f32 1.442695, %v386_v6  ;;  %v425_v14 = vmul.f32 1.442695, %v395_v7 }
 0x107   : > { %723 = vpow2.f32 %v409_v1  ;;  %v392_v15 = vsub.f32 %v829_v20, %v380_v61  ;;  %v411_v17 = vmul.f32 1.442695, %v388_v9  ;;  %v394_v18 = vsub.f32 %v831_v25, %v380_v61 }
 0x108   : > { %725 = vpow2.f32 %v413_v4  ;;  %v415_v19 = vmul.f32 1.442695, %v390_v12  ;;  %v396_v22 = vsub.f32 %v835_v38, %v380_v61 }
 0x109   : > { %727 = vpow2.f32 %v417_v5  ;;  %v419_v23 = vmul.f32 1.442695, %v392_v15  ;;  %v423_v26 = vmul.f32 1.442695, %v394_v18 }
 0x10a   : > { %729 = vpow2.f32 %v399_v8  ;;  %v427_v20 = vmul.f32 1.442695, %v396_v22 }
 0x10b   : > { %731 = vpow2.f32 %v403_v10 }
 0x10c   : > { %733 = vpow2.f32 %v421_v11 }
 0x10d   : > { %735 = vpow2.f32 %v407_v13 }
 0x10e   : > { %737 = vpow2.f32 %v425_v14 }
 0x10f   : > { %739 = vpow2.f32 %v411_v17 }
 0x110   : > { %741 = vpow2.f32 %v415_v19 }
 0x111   : > { %v718_v21 = vpop.eup %717  ;;  %743 = vpow2.f32 %v419_v23 }
 0x112   : > { %v720_v24 = vpop.eup %719  ;;  %745 = vpow2.f32 %v423_v26 }
 0x113   : > { %v429_v16 = vadd.f32 %v720_v24, %v718_v21  ;;  %v722_v27 = vpop.eup %721  ;;  %747 = vpow2.f32 %v427_v20 }
 0x114   : > { %v724_v29 = vpop.eup %723 }
 0x115   : > { %v430_v28 = vadd.f32 %v722_v27, %v429_v16  ;;  %v726_v30 = vpop.eup %725 }
 0x116   : > { %v728_v25 = vpop.eup %727 }
 0x117   : > { %v431_v31 = vadd.f32 %v724_v29, %v430_v28  ;;  %v730_v32 = vpop.eup %729 }
 0x118   : > { %v732_v34 = vpop.eup %731 }
 0x119   : > { %v432_v33 = vadd.f32 %v726_v30, %v431_v31  ;;  %v734_v35 = vpop.eup %733  ;;  %v442_v37 = vadd.f32 %v732_v34, %v730_v32 }
 0x11a   : > { %v736_v38 = vpop.eup %735 }
 0x11b   : > { %v433_v36 = vadd.f32 %v728_v25, %v432_v33  ;;  %v738_v39 = vpop.eup %737  ;;  %v443_v41 = vadd.f32 %v736_v38, %v442_v37 }
 0x11c   : > { %v740_v42 = vpop.eup %739 }
 0x11d   : > { %v434_v40 = vadd.f32 %v734_v35, %v433_v36  ;;  %v444_v44 = vadd.f32 %v740_v42, %v443_v41  ;;  %v742_v45 = vpop.eup %741 }
 0x11e   : > { %v744_v48 = vpop.eup %743 }
 0x11f   : > { %v435_v43 = vadd.f32 %v738_v39, %v434_v40  ;;  %v445_v47 = vadd.f32 %v742_v45, %v444_v44  ;;  %v746_v51 = vpop.eup %745 }
 0x120   : > { %v748_v54 = vpop.eup %747 }
 0x121   : > { %v436_v46 = vrot.slane %v435_v43, 4  ;;  %v446_v50 = vadd.f32 %v744_v48, %v445_v47 }
 0x123   : > { %v437_v49 = vadd.f32 %v436_v46, %v435_v43  ;;  %v447_v53 = vadd.f32 %v746_v51, %v446_v50 }
 0x125   : > { %v438_v52 = vrot.slane %v437_v49, 2  ;;  %v448_v56 = vadd.f32 %v748_v54, %v447_v53 }
 0x127   : > { %v439_v55 = vadd.f32 %v438_v52, %v437_v49  ;;  %v449_v58 = vrot.slane %v448_v56, 4 }
 0x129   : > { %v440_v57 = vrot.slane %v439_v55, 1  ;;  %v450_v59 = vadd.f32 %v449_v58, %v448_v56 }
 0x12b   : > { %v441_v60 = vadd.f32 %v440_v57, %v439_v55  ;;  %v451_v61 = vrot.slane %v450_v59, 2 }
 0x12d   : > { %v452_v62 = vadd.f32 %v451_v61, %v450_v59  ;;  %749 = vrcp.f32 %v441_v60 }
 0x12f   : > { %v453_v63 = vrot.slane %v452_v62, 1 }
 0x131   : > { %v454_v0 = vadd.f32 %v453_v63, %v452_v62 }
 0x133   : > { %751 = vrcp.f32 %v454_v0 }
 0x13a   : > { %v750_v1 = vpop.eup %749 }
 0x13b   : > { %v457_v2 = vmul.f32 %v750_v1, %v718_v21  ;;  %v459_v3 = vmul.f32 %v750_v1, %v720_v24  ;;  %v461_v4 = vmul.f32 %v750_v1, %v722_v27  ;;  %v463_v5 = vmul.f32 %v750_v1, %v724_v29 }
 0x13c   : > { %v465_v7 = vmul.f32 %v750_v1, %v726_v30  ;;  %v467_v8 = vmul.f32 %v750_v1, %v728_v25  ;;  %v469_v9 = vmul.f32 %v750_v1, %v734_v35  ;;  %v471_v10 = vmul.f32 %v750_v1, %v738_v39 }
 0x140   : > { %v752_v6 = vpop.eup %751 }
 0x141   : > { %v458_v11 = vmul.f32 %v752_v6, %v730_v32  ;;  %v460_v12 = vmul.f32 %v752_v6, %v732_v34  ;;  %v462_v13 = vmul.f32 %v752_v6, %v736_v38  ;;  %v464_v14 = vmul.f32 %v752_v6, %v740_v42 }
 0x142   : > { %v466_v15 = vmul.f32 %v752_v6, %v742_v45  ;;  %v468_v17 = vmul.f32 %v752_v6, %v744_v48  ;;  %v470_v18 = vmul.f32 %v752_v6, %v746_v51  ;;  %v472_v19 = vmul.f32 %v752_v6, %v748_v54 }
 0x143   : > { %v665_v21 = vpack.c.bf16 %v458_v11, %v457_v2  ;;  %v666_v22 = vpack.c.bf16 %v460_v12, %v459_v3  ;;  %v667_v23 = vpack.c.bf16 %v462_v13, %v461_v4  ;;  %v668_v24 = vpack.c.bf16 %v464_v14, %v463_v5 }
 0x144   : > { %v669_v16 = vpack.c.bf16 %v466_v15, %v465_v7  ;;  %v670_v26 = vpack.c.bf16 %v468_v17, %v467_v8  ;;  %v671_v27 = vpack.c.bf16 %v470_v18, %v469_v9  ;;  %v672_v28 = vpack.c.bf16 %v472_v19, %v471_v10 }
 0x145   : > { %521 = vst [vmem:[%s201_s24] sm:$0xff] %v665_v21  ;;  %522 = vst [vmem:[%s201_s24 + $0x8] sm:$0xff] %v666_v22 }
 0x146   : > { %523 = vst [vmem:[%s201_s24 + $0x10] sm:$0xff] %v667_v23  ;;  %524 = vst [vmem:[%s201_s24 + $0x18] sm:$0xff] %v668_v24 }
 0x147   : > { %525 = vst [vmem:[%s201_s24 + $0x20] sm:$0xff] %v669_v16  ;;  %526 = vst [vmem:[%s201_s24 + $0x28] sm:$0xff] %v670_v26 }
 0x148   : > { %527 = vst [vmem:[%s201_s24 + $0x30] sm:$0xff] %v671_v27  ;;  %528 = vst [vmem:[%s201_s24 + $0x38] sm:$0xff] %v672_v28 }
 0x149 PF: > { %s12_s11 = sadd.s32 1, %s775_s11   ;;  %s859_s9 = smov %s771_s10 }
 0x14a   : > { %p9_p5 = scmp.ge.s32.totalorder %s12_s11, 4   ;;  %s860_s10 = smov %s862_s12 }
 0x14c   :  { %11 = sbr.rel (!%p9_p5) target bundleno = 2 (0x2), region = 61 }

// kernel: recurrent_projection.19
= control target key start
LH: loop header
LB: loop body
LE: loop exit
PB: predicated region body
PF: predicated region fallthrough
CT: control target
= control target key end

     0   :  { %s1393_s15 = smov 0   ;;  %s1395_s16 = smov 0   ;;  %s1520_s0 = inlined_call_operand.vmem [shape: bf16[2,32,576], index: 0, kind: input, shape index: {}]   ;;  %s1521_s1 = inlined_call_operand.vmem [shape: bf16[2,576,256], index: 1, kind: input, shape index: {}]   ;;  %s1522_s2 = inlined_call_operand.vmem [shape: f32[32,1], index: 2, kind: input, shape index: {}, may-alias: {2,3}]   ;;  %s1523_s3 = inlined_call_operand.vmem [shape: f32[32,1], index: 3, kind: input, shape index: {}, may-alias: {2,3}]   ;;  %s1524_s4 = inlined_call_operand.vmem [shape: f32[2,32,256], index: 4, kind: output, shape index: {}]  }
   0x1   :  { %s1397_s17 = smov 0  }
   0x2 LB: > { %s33_s2 = sadd.s32 1, %s1361_s16  ;;  %p1094_p0 = scmp.ge.s32.totalorder %s1365_s17, 1  ;;  %s1365_s17 = sphi %s1397_s17, %s14_s17   ;;  %s1361_s16 = sphi %s1395_s16, %s1526_s16   ;;  %s1357_s15 = sphi %s1393_s15, %s1525_s15  }
   0x3   : > { %p35_p1 = scmp.ge.s32.totalorder %s33_s2, 2  ;;  %p215_p2 = scmp.lt.s32.totalorder %s1365_s17, 3 }
   0x5   : > { %s1528_s2 = smov (%p35_p1, %s33_s2), 0  ;;  %p216_p3 = pnand %p1094_p0, %p215_p2 }
   0x6   : > { %p264_p4 = scmp.lt.s32.totalorder (!%p216_p3), %s1357_s15, 1 }
   0x7   : > { %219 = sbr.rel (%p216_p3) target bundleno = 302 (0x12e), region = 36 }
   0xc   : > { %s1530_s15 = smov (!%p264_p4, %s1357_s15), 1  ;;  %vm794_vm0 = vcmask 523264  }
   0xd   : > { %s1195_s3 = smul.u32 576, %s1530_s15  ;;  %s1185_s25 = sshll.u32 %s1530_s15, 6 }
   0xe   : > { %s1194_s21 = smul.u32 80, %s1530_s15  ;;  %s297_s28 = scalar_lea.vmem %s1524_s4, %s1185_s25 }
   0xf   : > { %s1417_s20 = scalar_lea.vmem %s1521_s1, %s1195_s3 }
  0x10   : > { %v1221_v0 = vld [vmem:[%s1417_s20 + $0x74] ss:$8 sps:$4 sm:$0xff]   ;;  %v1225_v2 = vld [vmem:[%s1417_s20 + $0x70] ss:$8 sps:$4 sm:$0xff]   ;;  %v1227_v4 = vld [vmem:[%s1417_s20 + $0x64] ss:$8 sps:$4 sm:$0xff]   ;;  %s1468_s24 = scalar_lea.vmem %s1520_s0, %s1194_s21 }
  0x11   : > { %v1223_v1 = vld [vmem:[%s1417_s20 + $0x174] ss:$8 sps:$4 sm:$0xff]   ;;  %801 = vmatprep.subr.bf16.mxu0 %v1221_v0  ;;  %v1226_v3 = vld [vmem:[%s1417_s20 + $0x170] ss:$8 sps:$4 sm:$0xff]   ;;  %v1229_v5 = vld [vmem:[%s1417_s20 + $0x164] ss:$8 sps:$4 sm:$0xff]  }
  0x12   : > { %854 = vmatprep.subr.bf16.mxu1 %v1223_v1  ;;  %802 = vmatpush1.bf16.msra.mxu0 %v1225_v2  ;;  %v1231_v6 = vld [vmem:[%s1417_s20 + $0x60] ss:$8 sps:$4 sm:$0xff]   ;;  %v1233_v8 = vld [vmem:[%s1417_s20 + $0x54] ss:$8 sps:$4 sm:$0xff]   ;;  %v1237_v10 = vld [vmem:[%s1417_s20 + $0x50] ss:$8 sps:$4 sm:$0xff]  }
  0x13   : > { %855 = vmatpush1.bf16.msra.mxu1 %v1226_v3  ;;  %803 = vmatprep.subr.bf16.mxu0 %v1227_v4  ;;  %v1232_v7 = vld [vmem:[%s1417_s20 + $0x160] ss:$8 sps:$4 sm:$0xff]   ;;  %v1235_v9 = vld [vmem:[%s1417_s20 + $0x154] ss:$8 sps:$4 sm:$0xff]   ;;  %v1238_v11 = vld [vmem:[%s1417_s20 + $0x150] ss:$8 sps:$4 sm:$0xff]  }
  0x14   : > { %856 = vmatprep.subr.bf16.mxu1 %v1229_v5  ;;  %v1239_v12 = vld [vmem:[%s1417_s20 + $0x44] ss:$8 sps:$4 sm:$0xff]   ;;  %v1243_v14 = vld [vmem:[%s1417_s20 + $0x40] ss:$8 sps:$4 sm:$0xff]   ;;  %v1245_v16 = vld [vmem:[%s1417_s20 + $0x34] ss:$8 sps:$4 sm:$0xff]  }
  0x15   : > { %v1241_v13 = vld [vmem:[%s1417_s20 + $0x144] ss:$8 sps:$4 sm:$0xff]   ;;  %v1244_v15 = vld [vmem:[%s1417_s20 + $0x140] ss:$8 sps:$4 sm:$0xff]   ;;  %v1247_v17 = vld [vmem:[%s1417_s20 + $0x134] ss:$8 sps:$4 sm:$0xff]  }
  0x16   : > { %804 = vmatpush1.bf16.msra.mxu0 %v1231_v6  ;;  %v1249_v18 = vld [vmem:[%s1417_s20 + $0x30] ss:$8 sps:$4 sm:$0xff]   ;;  %v1251_v20 = vld [vmem:[%s1417_s20 + $0x24] ss:$8 sps:$4 sm:$0xff]   ;;  %v1255_v22 = vld [vmem:[%s1417_s20 + $0x20] ss:$8 sps:$4 sm:$0xff]  }
  0x17   : > { %857 = vmatpush1.bf16.msra.mxu1 %v1232_v7  ;;  %805 = vmatprep.subr.bf16.mxu0 %v1233_v8  ;;  %v1250_v19 = vld [vmem:[%s1417_s20 + $0x130] ss:$8 sps:$4 sm:$0xff]   ;;  %v1253_v21 = vld [vmem:[%s1417_s20 + $0x124] ss:$8 sps:$4 sm:$0xff]   ;;  %v1256_v23 = vld [vmem:[%s1417_s20 + $0x120] ss:$8 sps:$4 sm:$0xff]  }
  0x18   : > { %858 = vmatprep.subr.bf16.mxu1 %v1235_v9  ;;  %v1257_v24 = vld [vmem:[%s1417_s20 + $0x14] ss:$8 sps:$4 sm:$0xff]   ;;  %v1261_v26 = vld [vmem:[%s1417_s20 + $0x10] ss:$8 sps:$4 sm:$0xff]   ;;  %v1263_v28 = vld [vmem:[%s1417_s20 + $0x4] ss:$8 sps:$4 sm:$0xff]  }
  0x19   : > { %v1259_v25 = vld [vmem:[%s1417_s20 + $0x114] ss:$8 sps:$4 sm:$0xff]   ;;  %v1262_v27 = vld [vmem:[%s1417_s20 + $0x110] ss:$8 sps:$4 sm:$0xff]   ;;  %v1265_v29 = vld [vmem:[%s1417_s20 + $0x104] ss:$8 sps:$4 sm:$0xff]  }
  0x1a   : > { %806 = vmatpush1.bf16.msra.mxu0 %v1237_v10  ;;  %v1267_v30 = vld [vmem:[%s1417_s20] ss:$8 sps:$4 sm:$0xff]   ;;  %v1269_v32 = vld [vmem:[%s1417_s20 + $0xf4] ss:$8 sps:$4 sm:$0xff]   ;;  %v1273_v34 = vld [vmem:[%s1417_s20 + $0xf0] ss:$8 sps:$4 sm:$0xff]  }
  0x1b   : > { %859 = vmatpush1.bf16.msra.mxu1 %v1238_v11  ;;  %807 = vmatprep.subr.bf16.mxu0 %v1239_v12  ;;  %v1268_v31 = vld [vmem:[%s1417_s20 + $0x100] ss:$8 sps:$4 sm:$0xff]   ;;  %v1271_v33 = vld [vmem:[%s1417_s20 + $0x1f4] ss:$8 sps:$4 sm:$0xff]   ;;  %v1274_v35 = vld [vmem:[%s1417_s20 + $0x1f0] ss:$8 sps:$4 sm:$0xff]  }
  0x1c   : > { %860 = vmatprep.subr.bf16.mxu1 %v1241_v13  ;;  %v1275_v36 = vld [vmem:[%s1417_s20 + $0xe4] ss:$8 sps:$4 sm:$0xff]   ;;  %v1279_v38 = vld [vmem:[%s1417_s20 + $0xe0] ss:$8 sps:$4 sm:$0xff]   ;;  %v1281_v40 = vld [vmem:[%s1417_s20 + $0xd4] ss:$8 sps:$4 sm:$0xff]  }
  0x1d   : > { %v1277_v37 = vld [vmem:[%s1417_s20 + $0x1e4] ss:$8 sps:$4 sm:$0xff]   ;;  %v1280_v39 = vld [vmem:[%s1417_s20 + $0x1e0] ss:$8 sps:$4 sm:$0xff]   ;;  %v1283_v41 = vld [vmem:[%s1417_s20 + $0x1d4] ss:$8 sps:$4 sm:$0xff]  }
  0x1e   : > { %808 = vmatpush1.bf16.msra.mxu0 %v1243_v14  ;;  %v1285_v42 = vld [vmem:[%s1417_s20 + $0xd0] ss:$8 sps:$4 sm:$0xff]   ;;  %v1287_v44 = vld [vmem:[%s1417_s20 + $0xc4] ss:$8 sps:$4 sm:$0xff]   ;;  %v1291_v46 = vld [vmem:[%s1417_s20 + $0xc0] ss:$8 sps:$4 sm:$0xff]  }
  0x1f   : > { %861 = vmatpush1.bf16.msra.mxu1 %v1244_v15  ;;  %809 = vmatprep.subr.bf16.mxu0 %v1245_v16  ;;  %v1286_v43 = vld [vmem:[%s1417_s20 + $0x1d0] ss:$8 sps:$4 sm:$0xff]   ;;  %v1289_v45 = vld [vmem:[%s1417_s20 + $0x1c4] ss:$8 sps:$4 sm:$0xff]   ;;  %v1292_v47 = vld [vmem:[%s1417_s20 + $0x1c0] ss:$8 sps:$4 sm:$0xff]  }
  0x20   : > { %862 = vmatprep.subr.bf16.mxu1 %v1247_v17  ;;  %v1293_v48 = vld [vmem:[%s1417_s20 + $0xb4] ss:$8 sps:$4 sm:$0xff]   ;;  %v1319_v49 = vld [vmem:[%s1468_s24 + $0x4] ss:$20 sps:$4 sm:$0xff]   ;;  %v1322_v51 = vld [vmem:[%s1468_s24 + $0xc] ss:$20 sps:$4 sm:$0xff]  }
  0x21   : > { %v1295_v50 = vld [vmem:[%s1417_s20 + $0x1b4] ss:$8 sps:$4 sm:$0xff]   ;;  %833 = vmatprep.mubr.bf16.mxu0 %v1319_v49  ;;  %v1297_v52 = vld [vmem:[%s1417_s20 + $0xb0] ss:$8 sps:$4 sm:$0xff]   ;;  %886 = vmatprep.mubr.bf16.mxu1 %v1322_v51  ;;  %v1299_v54 = vld [vmem:[%s1417_s20 + $0xa4] ss:$8 sps:$4 sm:$0xff]  }
  0x22   : > { %810 = vmatpush1.bf16.msra.mxu0 %v1249_v18  ;;  %v1298_v53 = vld [vmem:[%s1417_s20 + $0x1b0] ss:$8 sps:$4 sm:$0xff]   ;;  %v1301_v55 = vld [vmem:[%s1417_s20 + $0x1a4] ss:$8 sps:$4 sm:$0xff]   ;;  %v1303_v56 = vld [vmem:[%s1417_s20 + $0xa0] ss:$8 sps:$4 sm:$0xff]  }
  0x23   : > { %863 = vmatpush1.bf16.msra.mxu1 %v1250_v19  ;;  %811 = vmatprep.subr.bf16.mxu0 %v1251_v20  ;;  %v1304_v57 = vld [vmem:[%s1417_s20 + $0x1a0] ss:$8 sps:$4 sm:$0xff]   ;;  %v1305_v58 = vld [vmem:[%s1417_s20 + $0x94] ss:$8 sps:$4 sm:$0xff]   ;;  %v1309_v60 = vld [vmem:[%s1417_s20 + $0x90] ss:$8 sps:$4 sm:$0xff]  }
  0x24   : > { %864 = vmatprep.subr.bf16.mxu1 %v1253_v21  ;;  %v1307_v59 = vld [vmem:[%s1417_s20 + $0x194] ss:$8 sps:$4 sm:$0xff]   ;;  %v1310_v61 = vld [vmem:[%s1417_s20 + $0x190] ss:$8 sps:$4 sm:$0xff]   ;;  %v1311_v62 = vld [vmem:[%s1417_s20 + $0x84] ss:$8 sps:$4 sm:$0xff]  }
  0x25   : > { %v1313_v63 = vld [vmem:[%s1417_s20 + $0x184] ss:$8 sps:$4 sm:$0xff]   ;;  %v1315_v0 = vld [vmem:[%s1417_s20 + $0x80] ss:$8 sps:$4 sm:$0xff]   ;;  %v1325_v2 = vld [vmem:[%s1417_s20 + $0x234] ss:$8 sps:$4 sm:$0xff]  }
  0x26   : > { %812 = vmatpush1.bf16.msra.mxu0 %v1255_v22  ;;  %v1316_v1 = vld [vmem:[%s1417_s20 + $0x180] ss:$8 sps:$4 sm:$0xff]   ;;  %v1323_v5 = vld [vmem:[%s1417_s20 + $0x230] ss:$8 sps:$4 sm:$0xff]   ;;  %v1328_v6 = vld [vmem:[%s1417_s20 + $0x224] ss:$8 sps:$4 sm:$0xff]  }
  0x27   : > { %865 = vmatpush1.bf16.msra.mxu1 %v1256_v23  ;;  %813 = vmatprep.subr.bf16.mxu0 %v1257_v24  ;;  %v1317_v3 = vld [vmem:[%s1468_s24] ss:$20 sps:$4 sm:$0xff]   ;;  %v1320_v4 = vld [vmem:[%s1468_s24 + $0x8] ss:$20 sps:$4 sm:$0xff]   ;;  %v1334_v12 = vld [vmem:[%s1468_s24 + $0x30] ss:$20 sps:$4 sm:$0xff]  }
  0x28   : > { %866 = vmatprep.subr.bf16.mxu1 %v1259_v25  ;;  %v1329_v7 = vld [vmem:[%s1468_s24 + $0x2c] ss:$20 sps:$4 sm:$0xff]   ;;  %v1331_v8 = vld [vmem:[%s1468_s24 + $0x34] ss:$20 sps:$4 sm:$0xff]   ;;  %v1335_v13 = vld [vmem:[%s1417_s20 + $0x210] ss:$8 sps:$4 sm:$0xff]  }
  0x29   : > { %v1326_v9 = vld [vmem:[%s1417_s20 + $0x220] ss:$8 sps:$4 sm:$0xff]   ;;  %v1337_v10 = vld [vmem:[%s1417_s20 + $0x214] ss:$8 sps:$4 sm:$0xff]   ;;  %v1340_v14 = vld [vmem:[%s1417_s20 + $0x204] ss:$8 sps:$4 sm:$0xff]  }
  0x2a   : > { %814 = vmatpush1.bf16.msra.mxu0 %v1261_v26  ;;  %v1333_v11 = vld [vmem:[%s1468_s24 + $0x28] ss:$20 sps:$4 sm:$0xff]   ;;  %v1367_v16 = vmov 0   ;;  %v1341_v17 = vld [vmem:[%s1468_s24 + $0x10] ss:$20 sps:$4 sm:$0xff]  }
  0x2b   : > { %867 = vmatpush1.bf16.msra.mxu1 %v1262_v27  ;;  %815 = vmatprep.subr.bf16.mxu0 %v1263_v28  ;;  %v1338_v15 = vld [vmem:[%s1417_s20 + $0x200] ss:$8 sps:$4 sm:$0xff]   ;;  %v1342_v18 = vld [vmem:[%s1468_s24 + $0x38] ss:$20 sps:$4 sm:$0xff]  }
  0x2c   : > { %868 = vmatprep.subr.bf16.mxu1 %v1265_v29 }
  0x2e   : > { %816 = vmatpush1.bf16.msra.mxu0 %v1267_v30 }
  0x2f   : > { %869 = vmatpush1.bf16.msra.mxu1 %v1268_v31  ;;  %817 = vmatprep.subr.bf16.mxu0 %v1269_v32 }
  0x30   : > { %870 = vmatprep.subr.bf16.mxu1 %v1271_v33 }
  0x32   : > { %818 = vmatpush2.bf16.msra.mxu0 %v1273_v34 }
  0x33   : > { %871 = vmatpush2.bf16.msra.mxu1 %v1274_v35  ;;  %819 = vmatprep.subr.bf16.mxu0 %v1275_v36 }
  0x34   : > { %872 = vmatprep.subr.bf16.mxu1 %v1277_v37 }
  0x36   : > { %820 = vmatpush2.bf16.msra.mxu0 %v1279_v38 }
  0x37   : > { %873 = vmatpush2.bf16.msra.mxu1 %v1280_v39  ;;  %821 = vmatprep.subr.bf16.mxu0 %v1281_v40 }
  0x38   : > { %874 = vmatprep.subr.bf16.mxu1 %v1283_v41 }
  0x3a   : > { %822 = vmatpush2.bf16.msra.mxu0 %v1285_v42 }
  0x3b   : > { %875 = vmatpush2.bf16.msra.mxu1 %v1286_v43  ;;  %823 = vmatprep.subr.bf16.mxu0 %v1287_v44 }
  0x3c   : > { %876 = vmatprep.subr.bf16.mxu1 %v1289_v45 }
  0x3e   : > { %824 = vmatpush2.bf16.msra.mxu0 %v1291_v46 }
  0x3f   : > { %877 = vmatpush2.bf16.msra.mxu1 %v1292_v47  ;;  %825 = vmatprep.subr.bf16.mxu0 %v1293_v48 }
  0x40   : > { %878 = vmatprep.subr.bf16.mxu1 %v1295_v50 }
  0x42   : > { %826 = vmatpush2.bf16.msra.mxu0 %v1297_v52 }
  0x43   : > { %879 = vmatpush2.bf16.msra.mxu1 %v1298_v53  ;;  %827 = vmatprep.subr.bf16.mxu0 %v1299_v54 }
  0x44   : > { %880 = vmatprep.subr.bf16.mxu1 %v1301_v55 }
  0x46   : > { %828 = vmatpush2.bf16.msra.mxu0 %v1303_v56 }
  0x47   : > { %881 = vmatpush2.bf16.msra.mxu1 %v1304_v57  ;;  %829 = vmatprep.subr.bf16.mxu0 %v1305_v58 }
  0x48   : > { %882 = vmatprep.subr.bf16.mxu1 %v1307_v59 }
  0x4a   : > { %830 = vmatpush2.bf16.msra.mxu0 %v1309_v60 }
  0x4b   : > { %883 = vmatpush2.bf16.msra.mxu1 %v1310_v61  ;;  %831 = vmatprep.subr.bf16.mxu0 %v1311_v62 }
  0x4c   : > { %884 = vmatprep.subr.bf16.mxu1 %v1313_v63 }
  0x4e   : > { %832 = vmatpush2.bf16.msra.mxu0 %v1315_v0 }
  0x4f   : > { %885 = vmatpush2.bf16.msra.mxu1 %v1316_v1  ;;  %915 = vmatprep.subr.bf16.mxu0 %v1325_v2 }
  0x50   : > { %1186 = vmatprep.subr.bf16.mxu1 %v1325_v2 }
  0x51   : > { %834 = vmatmul.mubr.bf16.vlgmr.msra.gmra.mxu0 %v1317_v3 }
  0x52   : > { %887 = vmatmul.mubr.bf16.vlgmr.msra.gmra.mxu1 %v1320_v4  ;;  %916 = vmatpush1.bf16.msra.mxu0 %v1323_v5 }
  0x53   : > { %1190 = vmatpush1.bf16.msra.mxu1 %v1323_v5  ;;  %917 = vmatprep.subr.bf16.mxu0 %v1328_v6 }
  0x54   : > { %1187 = vmatprep.subr.bf16.mxu1 %v1328_v6  ;;  %843 = vmatprep.mubr.bf16.mxu0 %v1329_v7 }
  0x55   : > { %896 = vmatprep.mubr.bf16.mxu1 %v1331_v8 }
  0x56   : > { %918 = vmatpush1.bf16.msra.mxu0 %v1326_v9 }
  0x57   : > { %1191 = vmatpush1.bf16.msra.mxu1 %v1326_v9  ;;  %919 = vmatprep.subr.bf16.mxu0 %v1337_v10 }
  0x58   : > { %1188 = vmatprep.subr.bf16.mxu1 %v1337_v10 }
  0x59   : > { %844 = vmatmul.mubr.bf16.gmra.mxu0 %v1333_v11 }
  0x5a   : > { %897 = vmatmul.mubr.bf16.gmra.mxu1 %v1334_v12  ;;  %920 = vmatpush1.bf16.msra.mxu0 %v1335_v13 }
  0x5b   : > { %1192 = vmatpush1.bf16.msra.mxu1 %v1335_v13  ;;  %921 = vmatprep.subr.bf16.mxu0 %v1340_v14 }
  0x5c   : > { %1189 = vmatprep.subr.bf16.mxu1 %v1340_v14  ;;  %939 = vmatprep.mubr.bf16.mxu0 %v1367_v16 }
  0x5d   : > { %949 = vmatprep.mubr.bf16.mxu1 %v1367_v16 }
  0x5e   : > { %922 = vmatpush1.bf16.msra.mxu0 %v1338_v15 }
  0x5f   : > { %1193 = vmatpush1.bf16.msra.mxu1 %v1338_v15 }
  0x61   : > { %1181 = vmatmul.mubr.msk.bf16.vlgmr.msra.gmra.mxu0 %vm794_vm0, %v1341_v17 }
  0x62   : > { %1182 = vmatmul.mubr.msk.bf16.vlgmr.msra.gmra.mxu1 %vm794_vm0, %v1342_v18 }
 0x111   : > { %v835_v19 = vpop.f32.mrf.mxu0 }
 0x112   : > { %v888_v20 = vpop.f32.mrf.mxu1 }
 0x113   : > { %v837_v21 = vpop.f32.mrf.mxu0  ;;  %v889_v35 = vadd.f32 %v888_v20, %v835_v19 }
 0x114   : > { %v890_v22 = vpop.f32.mrf.mxu1 }
 0x115   : > { %v839_v23 = vpop.f32.mrf.mxu0  ;;  %v891_v39 = vadd.f32 %v890_v22, %v837_v21 }
 0x116   : > { %v892_v24 = vpop.f32.mrf.mxu1 }
 0x117   : > { %v841_v25 = vpop.f32.mrf.mxu0  ;;  %v893_v43 = vadd.f32 %v892_v24, %v839_v23 }
 0x118   : > { %v894_v26 = vpop.f32.mrf.mxu1 }
 0x119   : > { %v845_v27 = vpop.f32.mrf.mxu0  ;;  %v895_v51 = vadd.f32 %v894_v26, %v841_v25 }
 0x11a   : > { %v898_v28 = vpop.f32.mrf.mxu1 }
 0x11b   : > { %v847_v29 = vpop.f32.mrf.mxu0  ;;  %v899_v36 = vadd.f32 %v898_v28, %v845_v27 }
 0x11c   : > { %v900_v30 = vpop.f32.mrf.mxu1 }
 0x11d   : > { %v849_v31 = vpop.f32.mrf.mxu0  ;;  %v901_v40 = vadd.f32 %v900_v30, %v847_v29 }
 0x11e   : > { %v902_v32 = vpop.f32.mrf.mxu1 }
 0x11f   : > { %v851_v33 = vpop.f32.mrf.mxu0  ;;  %v903_v44 = vadd.f32 %v902_v32, %v849_v31 }
 0x120   : > { %v904_v34 = vpop.f32.mrf.mxu1 }
 0x121   : > { %v941_v37 = vpop.f32.mrf.mxu0  ;;  %v905_v52 = vadd.f32 %v904_v34, %v851_v33 }
 0x122   : > { %v951_v38 = vpop.f32.mrf.mxu1  ;;  %v942_v41 = vadd.f32 %v941_v37, %v889_v35 }
 0x123   : > { %v952_v42 = vadd.f32 %v951_v38, %v899_v36  ;;  %v943_v45 = vpop.f32.mrf.mxu0 }
 0x124   : > { %v953_v46 = vpop.f32.mrf.mxu1  ;;  %v960_v47 = vmul.f32 0.16666667, %v942_v41  ;;  %v944_v49 = vadd.f32 %v943_v45, %v891_v39 }
 0x125   : > { %v964_v48 = vmul.f32 0.16666667, %v952_v42  ;;  %v954_v50 = vadd.f32 %v953_v46, %v901_v40  ;;  %v945_v53 = vpop.f32.mrf.mxu0 }
 0x126   : > { %v955_v54 = vpop.f32.mrf.mxu1  ;;  %968 = vst [vmem:[%s297_s28] sm:$0xff] %v960_v47  ;;  %v961_v55 = vmul.f32 0.16666667, %v944_v49  ;;  %v946_v57 = vadd.f32 %v945_v53, %v893_v43 }
 0x127   : > { %972 = vst [vmem:[%s297_s28 + $0x20] sm:$0xff] %v964_v48  ;;  %v965_v56 = vmul.f32 0.16666667, %v954_v50  ;;  %v956_v58 = vadd.f32 %v955_v54, %v903_v44  ;;  %v947_v59 = vpop.f32.mrf.mxu0 }
 0x128   : > { %v957_v60 = vpop.f32.mrf.mxu1  ;;  %969 = vst [vmem:[%s297_s28 + $0x8] sm:$0xff] %v961_v55  ;;  %v962_v61 = vmul.f32 0.16666667, %v946_v57  ;;  %v948_v63 = vadd.f32 %v947_v59, %v895_v51 }
 0x129   : > { %973 = vst [vmem:[%s297_s28 + $0x28] sm:$0xff] %v965_v56  ;;  %v966_v62 = vmul.f32 0.16666667, %v956_v58  ;;  %v958_v0 = vadd.f32 %v957_v60, %v905_v52 }
 0x12a   : > { %970 = vst [vmem:[%s297_s28 + $0x10] sm:$0xff] %v962_v61  ;;  %v963_v1 = vmul.f32 0.16666667, %v948_v63 }
 0x12b   : > { %974 = vst [vmem:[%s297_s28 + $0x30] sm:$0xff] %v966_v62  ;;  %v967_v2 = vmul.f32 0.16666667, %v958_v0 }
 0x12c   : > { %971 = vst [vmem:[%s297_s28 + $0x18] sm:$0xff] %v963_v1 }
 0x12d   : > { %975 = vst [vmem:[%s297_s28 + $0x38] sm:$0xff] %v967_v2 }
 0x12e PF: > { %s14_s17 = sadd.s32 1, %s1365_s17   ;;  %s1525_s15 = smov %s1361_s16 }
 0x12f   : > { %p11_p5 = scmp.ge.s32.totalorder %s14_s17, 4   ;;  %s1526_s16 = smov %s1528_s2 }
 0x131   :  { %13 = sbr.rel (!%p11_p5) target bundleno = 2 (0x2), region = 69 }

// kernel: recurrent_projection.13
= control target key start
LH: loop header
LB: loop body
LE: loop exit
PB: predicated region body
PF: predicated region fallthrough
CT: control target
= control target key end

     0   :  { %s607_s15 = smov 0   ;;  %s609_s16 = smov 0   ;;  %s659_s0 = inlined_call_operand.vmem [shape: bf16[1,16,8], index: 0, kind: input, shape index: {}]   ;;  %s660_s1 = inlined_call_operand.vmem [shape: bf16[2,8,256], index: 1, kind: input, shape index: {}]   ;;  %s661_s2 = inlined_call_operand.vmem [shape: f32[16,1], index: 2, kind: input, shape index: {}]   ;;  %s662_s3 = inlined_call_operand.vmem [shape: f32[16,1], index: 3, kind: input, shape index: {}]   ;;  %s663_s4 = inlined_call_operand.vmem [shape: bf16[2,16,256], index: 4, kind: output, shape index: {}]  }
   0x1   :  { %s611_s17 = smov 0  }
   0x2 LB: > { %s33_s18 = sadd.s32 1, %s575_s16  ;;  %p509_p0 = scmp.ge.s32.totalorder %s579_s17, 1  ;;  %s579_s17 = sphi %s611_s17, %s14_s17   ;;  %s575_s16 = sphi %s609_s16, %s665_s16   ;;  %s571_s15 = sphi %s607_s15, %s664_s15  }
   0x3   : > { %p35_p1 = scmp.ge.s32.totalorder %s33_s18, 2  ;;  %p205_p2 = scmp.lt.s32.totalorder %s579_s17, 3 }
   0x5   : > { %s667_s18 = smov (%p35_p1, %s33_s18), 0  ;;  %p206_p3 = pnand %p509_p0, %p205_p2 }
   0x6   : > { %p252_p4 = scmp.lt.s32.totalorder (!%p206_p3), %s571_s15, 1 }
   0x7   : > { %209 = sbr.rel (%p206_p3) target bundleno = 229 (0xe5), region = 36 }
   0xc   : > { %v581_v0 = vmov 0   ;;  %v279_v1 = vld [vmem:[%s661_s2] sm:$0xff]  ;;  %s669_s15 = smov (!%p252_p4, %s571_s15), 1  ;;  %v280_v3 = vld [vmem:[%s661_s2 + $0x8] sm:$0xff]  ;;  %vm305_vm0 = vcmask 1043456   ;;  %vm301_vm1 = vcmask 64512  }
   0xd   : > { %344 = vmatprep.mubr.bf16.mxu0 %v581_v0  ;;  %552 = vset.pattern.permute.xlu0 %v581_v0  ;;  %v359_v2 = vld [vmem:[%s662_s3] sm:$0xff]  ;;  %s523_s25 = sshll.u32 %s669_s15, 3  ;;  %v360_v4 = vld [vmem:[%s662_s3 + $0x8] sm:$0xff]  ;;  %s524_s7 = sshll.u32 %s669_s15, 4 }
   0xe   : > { %283 = vperm.xlu0 %552, %v279_v1   ;;  %553 = vset.pattern.permute.xlu1 %v581_v0  ;;  %s263_s30 = scalar_lea.vmem %s660_s1, %s523_s25  ;;  %v556_v9 = vld [vmem:[%s659_s0] sm:$0xff]   ;;  %s273_s10 = scalar_lea.vmem %s663_s4, %s524_s7 }
   0xf   : > { %363 = vperm.xlu1 %553, %v359_v2   ;;  %v278_v5 = vld [vmem:[%s263_s30] sm:$0xff] }
  0x10   : > { %v516_v6 = vcombine.high %v278_v5, %v278_v5  ;;  %v515_v7 = vcombine.low %v278_v5, %v278_v5 }
  0x12   : > { %288 = vperm.xlu0 %552, %v280_v3   ;;  %517 = vmatprep.subr.msk.bf16.mxu0 %vm305_vm0, %v516_v6  ;;  %v307_v8 = vsel %vm305_vm0, %v515_v7, 0 }
  0x13   : > { %368 = vperm.xlu1 %553, %v360_v4   ;;  %327 = vmatpush1.bf16.msra.mxu0 %v307_v8 }
  0x16   : > { %518 = vmatmul.mubr.msk.bf16.vlgmr.msra.gmra.mxu0 %vm301_vm1, %v556_v9 }
  0x89   : > { %v284_v10 = vpop.permute.xlu0 %283 }
  0x8a   : > { %v364_v11 = vpop.permute.xlu1 %363 }
  0x8d   : > { %v289_v17 = vpop.permute.xlu0 %288 }
  0x8e   : > { %v369_v21 = vpop.permute.xlu1 %368 }
  0xd6   : > { %v346_v12 = vpop.f32.mrf.mxu0 }
  0xd7   : > { %v347_v13 = vadd.f32 %v346_v12, %v284_v10 }
  0xd8   : > { %v348_v14 = vpop.f32.mrf.mxu0 }
  0xd9   : > { %v371_v15 = vmul.f32 %v364_v11, %v347_v13  ;;  %v349_v16 = vadd.f32 %v348_v14, %v284_v10  ;;  %vm355_vm2 = vcmp.gt.f32.partialorder %v347_v13, 0.0 }
  0xda   : > { %v350_v18 = vpop.f32.mrf.mxu0 }
  0xdb   : > { %vm356_vm3 = vcmp.gt.f32.partialorder %v349_v16, 0.0  ;;  %v372_v19 = vmul.f32 %v364_v11, %v349_v16  ;;  %v351_v20 = vadd.f32 %v350_v18, %v289_v17  ;;  %v375_v23 = vsel %vm355_vm2, %v347_v13, %v371_v15 }
  0xdc   : > { %v352_v22 = vpop.f32.mrf.mxu0 }
  0xdd   : > { %v376_v24 = vsel %vm356_vm3, %v349_v16, %v372_v19  ;;  %v373_v25 = vmul.f32 %v369_v21, %v351_v20  ;;  %v353_v26 = vadd.f32 %v352_v22, %v289_v17  ;;  %vm357_vm4 = vcmp.gt.f32.partialorder %v351_v20, 0.0 }
  0xde   : > { %v525_v27 = vpack.c.bf16 %v376_v24, %v375_v23 }
  0xdf   : > { %vm358_vm5 = vcmp.gt.f32.partialorder %v353_v26, 0.0  ;;  %v374_v28 = vmul.f32 %v369_v21, %v353_v26  ;;  %v377_v29 = vsel %vm357_vm4, %v351_v20, %v373_v25 }
  0xe0   : > { %391 = vst [vmem:[%s273_s10] sm:$0xff] %v525_v27 }
  0xe1   : > { %v378_v30 = vsel %vm358_vm5, %v353_v26, %v374_v28 }
  0xe2   : > { %v526_v31 = vpack.c.bf16 %v378_v30, %v377_v29 }
  0xe4   : > { %392 = vst [vmem:[%s273_s10 + $0x8] sm:$0xff] %v526_v31 }
  0xe5 PF: > { %s14_s17 = sadd.s32 1, %s579_s17   ;;  %s664_s15 = smov %s575_s16 }
  0xe6   : > { %p11_p5 = scmp.ge.s32.totalorder %s14_s17, 4   ;;  %s665_s16 = smov %s667_s18 }
  0xe8   :  { %13 = sbr.rel (!%p11_p5) target bundleno = 2 (0x2), region = 69 }

// kernel: recurrent_projection.14
= control target key start
LH: loop header
LB: loop body
LE: loop exit
PB: predicated region body
PF: predicated region fallthrough
CT: control target
= control target key end

     0   :  { %s2156_s12 = smov 0   ;;  %s2158_s13 = smov 0   ;;  %s2872_s0 = inlined_call_operand.vmem [shape: bf16[2,256,4], index: 0, kind: input, shape index: {}]   ;;  %s2873_s1 = inlined_call_operand.vmem [shape: bf16[2,4,256], index: 1, kind: input, shape index: {}]   ;;  %s2874_s2 = inlined_call_operand.vmem [shape: bf16[2,256,8], index: 2, kind: input, shape index: {}]   ;;  %s2875_s3 = inlined_call_operand.vmem [shape: bf16[2,256,8], index: 3, kind: output, shape index: {}]  }
   0x1   :  { %s2160_s14 = smov 0   ;;  %s2162_s15 = smov 0  }
   0x2   :  { %s2164_s16 = smov 0  }
   0x3 LB: > { %s28_s17 = sadd.s32 1, %s2123_s14  ;;  %s32_s18 = sadd.s32 1, %s2127_s15  ;;  %s2131_s16 = sphi %s2164_s16, %s13_s16   ;;  %s2127_s15 = sphi %s2162_s15, %s2937_s15   ;;  %s2123_s14 = sphi %s2160_s14, %s2936_s14   ;;  %s2119_s13 = sphi %s2158_s13, %s2935_s13   ;;  %s2115_s12 = sphi %s2156_s12, %s2934_s12  }
   0x4   : > { %p30_p0 = scmp.ge.s32.totalorder %s28_s17, 2  ;;  %p1735_p1 = scmp.ge.s32.totalorder %s2131_s16, 1 }
   0x5   : > { %p199_p2 = scmp.lt.s32.totalorder %s2131_s16, 5 }
   0x6   : > { %s2939_s17 = smov (%p30_p0, %s28_s17), 0  ;;  %s2941_s18 = smov (!%p30_p0, %s32_s18), %s2127_s15 }
   0x7   : > { %p200_p3 = pnand %p1735_p1, %p199_p2  ;;  %p34_p4 = scmp.ge.s32.totalorder %s2941_s18, 2 }
   0x9   : > { %s2943_s18 = smov (%p34_p4, %s2941_s18), 0  ;;  %203 = sbr.rel (%p200_p3) target bundleno = 884 (0x374), region = 32 }
   0xe   : > { %s1736_s19 = sshll.u32 %s2115_s12, 4  ;;  %p250_p5 = scmp.lt.s32.totalorder %s2119_s13, 1  ;;  %v2133_v0 = vmov 0   ;;  %vm435_vm0 = vcmask 1041408   ;;  %vm410_vm1 = vcmask 31744   ;;  %vm294_vm2 = vcmask 7168  }
   0xf   : > { %p252_p6 = scmp.lt.s32.totalorder %s1736_s19, 31  ;;  %474 = vmatprep.mubr.bf16.mxu0 %v2133_v0  ;;  %1939 = vset.pattern.permute.xlu0 %v2133_v0  ;;  %v2134_v12 = vmov -inf   ;;  %v2876_v40 = vmov 0.0   ;;  %vm327_vm3 = vcmask 64512   ;;  %vm1585_vm4 = vcmask 60416  }
  0x10   : > { %s2945_s13 = smov (!%p250_p5, %s2119_s13), 1  ;;  %1940 = vset.pattern.permute.xlu1 %v2133_v0  ;;  %297 = vst.msk [vmem:[#allocation2 + $0x10] sm:$0xff] %vm294_vm2, %v2134_v12  ;;  %295 = vst.msk [vmem:[#allocation2] sm:$0xff] %vm294_vm2, %v2134_v12 }
  0x11   : > { %s2947_s19 = smov (!%p252_p6, %s1736_s19), 31  ;;  %s1737_s20 = sshll.u32 %s2945_s13, 5  ;;  %296 = vst.msk [vmem:[#allocation2 + $0x8] sm:$0xff] %vm294_vm2, %v2134_v12  ;;  %298 = vst.msk [vmem:[#allocation2 + $0x18] sm:$0xff] %vm294_vm2, %v2134_v12 }
  0x12   : > { %s1798_s21 = sshll.u32 %s2945_s13, 2  ;;  %s2186_s22 = sadd.s32 %s1737_s20, %s2947_s19  ;;  %299 = vst.msk [vmem:[#allocation2 + $0x20] sm:$0xff] %vm294_vm2, %v2134_v12  ;;  %300 = vst.msk [vmem:[#allocation2 + $0x28] sm:$0xff] %vm294_vm2, %v2134_v12 }
  0x13   : > { %s267_s25 = scalar_lea.vmem %s2873_s1, %s1798_s21  ;;  %s1738_s26 = sshll.u32 %s2186_s22, 2  ;;  %301 = vst.msk [vmem:[#allocation2 + $0x30] sm:$0xff] %vm294_vm2, %v2134_v12  ;;  %302 = vst.msk [vmem:[#allocation2 + $0x38] sm:$0xff] %vm294_vm2, %v2134_v12 }
  0x14   : > { %v1754_v1 = vld.sshfl [vmem:[%s267_s25] sm:$0x33 pattern:$0x76325410]  ;;  %s257_s29 = scalar_lea.vmem %s2872_s0, %s1738_s26  ;;  %s1799_s30 = sshll.u32 %s2945_s13, 7  ;;  %303 = vst.msk [vmem:[#allocation2 + $0x40] sm:$0xff] %vm294_vm2, %v2134_v12 }
  0x15   : > { %v409_v2 = vcombine.high %v1754_v1, %v1754_v1  ;;  %v437_v3 = vsel %vm435_vm0, %v1754_v1, 0  ;;  %v1941_v4 = vld [vmem:[%s257_s29] sm:$0xff]   ;;  %s2201_s6 = scalar_lea.vmem %s2874_s2, %s1799_s30  ;;  %v1942_v5 = vld [vmem:[%s257_s29 + $0x8] sm:$0xff]   ;;  %v1943_v6 = vld [vmem:[%s257_s29 + $0x10] sm:$0xff]   ;;  %304 = vst.msk [vmem:[#allocation2 + $0x48] sm:$0xff] %vm294_vm2, %v2134_v12  ;;  %s2823_s9 = scalar_lea.vmem %s2875_s3, %s1738_s26 }
  0x16   : > { %v1944_v7 = vld [vmem:[%s257_s29 + $0x18] sm:$0xff]   ;;  %v1945_v8 = vld [vmem:[%s257_s29 + $0x20] sm:$0xff]   ;;  %v1946_v9 = vld [vmem:[%s257_s29 + $0x28] sm:$0xff]   ;;  %305 = vst.msk [vmem:[#allocation2 + $0x50] sm:$0xff] %vm294_vm2, %v2134_v12 }
  0x17   : > { %1755 = vmatprep.subr.msk.bf16.mxu0 %vm435_vm0, %v409_v2  ;;  %v1947_v10 = vld [vmem:[%s257_s29 + $0x30] sm:$0xff]   ;;  %v1948_v11 = vld [vmem:[%s257_s29 + $0x38] sm:$0xff]   ;;  %306 = vst.msk [vmem:[#allocation2 + $0x58] sm:$0xff] %vm294_vm2, %v2134_v12  ;;  %307 = vst.msk [vmem:[#allocation2 + $0x60] sm:$0xff] %vm294_vm2, %v2134_v12 }
  0x18   : > { %457 = vmatpush1.bf16.msra.mxu0 %v437_v3  ;;  %308 = vst.msk [vmem:[#allocation2 + $0x68] sm:$0xff] %vm294_vm2, %v2134_v12  ;;  %309 = vst.msk [vmem:[#allocation2 + $0x70] sm:$0xff] %vm294_vm2, %v2134_v12  ;;  %v1949_v62 = vld [vmem:[%s2201_s6 + $0x78] sm:$0xff]   ;;  %v1952_v1 = vld [vmem:[%s2201_s6 + $0x30] sm:$0xff]  }
  0x19   : > { %310 = vst.msk [vmem:[#allocation2 + $0x78] sm:$0xff] %vm294_vm2, %v2134_v12  ;;  %311 = vst.msk [vmem:[#allocation3] sm:$0xff] %vm294_vm2, %v2876_v40  ;;  %v1950_v63 = vld [vmem:[%s2201_s6 + $0x38] sm:$0xff]   ;;  %1880 = vmatprep.subr.bf16.mxu1 %v1949_v62  ;;  %1816 = vmatprep.subr.bf16.mxu0 %v1949_v62  ;;  %v2358_v2 = vld [vmem:[#allocation2 + $0x10] sm:$0xff] }
  0x1a   : > { %312 = vst.msk [vmem:[#allocation3 + $0x8] sm:$0xff] %vm294_vm2, %v2876_v40  ;;  %313 = vst.msk [vmem:[#allocation3 + $0x10] sm:$0xff] %vm294_vm2, %v2876_v40  ;;  %1888 = vmatpush3.bf16.msra.mxu1 %v1950_v63  ;;  %v1953_v3 = vld [vmem:[%s2201_s6 + $0x68] sm:$0xff]  }
  0x1b   : > { %1756 = vmatmul.mubr.msk.bf16.vlgmr.msra.gmra.mxu0 %vm410_vm1, %v1941_v4  ;;  %314 = vst.msk [vmem:[#allocation3 + $0x18] sm:$0xff] %vm294_vm2, %v2876_v40  ;;  %315 = vst.msk [vmem:[#allocation3 + $0x20] sm:$0xff] %vm294_vm2, %v2876_v40  ;;  %v1962_v62 = vld [vmem:[%s2201_s6 + $0x8] sm:$0xff]  }
  0x1c   : > { %484 = vmatprep.mubr.bf16.mxu0 %v2133_v0  ;;  %316 = vst.msk [vmem:[#allocation3 + $0x28] sm:$0xff] %vm294_vm2, %v2876_v40  ;;  %317 = vst.msk [vmem:[#allocation3 + $0x30] sm:$0xff] %vm294_vm2, %v2876_v40  ;;  %1817 = vmatpush3.bf16.msra.mxu0 %v1950_v63 }
  0x1d   : > { %318 = vst.msk [vmem:[#allocation3 + $0x38] sm:$0xff] %vm294_vm2, %v2876_v40  ;;  %319 = vst.msk [vmem:[#allocation3 + $0x40] sm:$0xff] %vm294_vm2, %v2876_v40 }
  0x1e   : > { %320 = vst.msk [vmem:[#allocation3 + $0x48] sm:$0xff] %vm294_vm2, %v2876_v40  ;;  %321 = vst.msk [vmem:[#allocation3 + $0x50] sm:$0xff] %vm294_vm2, %v2876_v40 }
  0x1f   : > { %322 = vst.msk [vmem:[#allocation3 + $0x58] sm:$0xff] %vm294_vm2, %v2876_v40  ;;  %323 = vst.msk [vmem:[#allocation3 + $0x60] sm:$0xff] %vm294_vm2, %v2876_v40 }
  0x20   : > { %324 = vst.msk [vmem:[#allocation3 + $0x68] sm:$0xff] %vm294_vm2, %v2876_v40  ;;  %325 = vst.msk [vmem:[#allocation3 + $0x70] sm:$0xff] %vm294_vm2, %v2876_v40 }
  0x21   : > { %326 = vst.msk [vmem:[#allocation3 + $0x78] sm:$0xff] %vm294_vm2, %v2876_v40  ;;  %v2493_v40 = vld [vmem:[#allocation2 + $0x68] sm:$0xff] }
  0x22   : > { %2898 = vst [vmem:[#allocation12_spill] sm:$0xff] %v2493_v40 }
  0x23   : > { %1757 = vmatmul.mubr.msk.bf16.gmra.mxu0 %vm410_vm1, %v1942_v5  ;;  %v1954_v5 = vld [vmem:[%s2201_s6 + $0x28] sm:$0xff]  }
  0x24   : > { %494 = vmatprep.mubr.bf16.mxu0 %v2133_v0 }
  0x2b   : > { %1758 = vmatmul.mubr.msk.bf16.gmra.mxu0 %vm410_vm1, %v1943_v6 }
  0x2c   : > { %504 = vmatprep.mubr.bf16.mxu0 %v2133_v0 }
  0x33   : > { %1759 = vmatmul.mubr.msk.bf16.gmra.mxu0 %vm410_vm1, %v1944_v7  ;;  %v2365_v7 = vld [vmem:[#allocation2 + $0x18] sm:$0xff] }
  0x34   : > { %514 = vmatprep.mubr.bf16.mxu0 %v2133_v0 }
  0x3b   : > { %1760 = vmatmul.mubr.msk.bf16.gmra.mxu0 %vm410_vm1, %v1945_v8 }
  0x3c   : > { %524 = vmatprep.mubr.bf16.mxu0 %v2133_v0 }
  0x43   : > { %1761 = vmatmul.mubr.msk.bf16.gmra.mxu0 %vm410_vm1, %v1946_v9  ;;  %v1955_v9 = vld [vmem:[%s2201_s6 + $0x60] sm:$0xff]  }
  0x44   : > { %534 = vmatprep.mubr.bf16.mxu0 %v2133_v0 }
  0x4b   : > { %1762 = vmatmul.mubr.msk.bf16.gmra.mxu0 %vm410_vm1, %v1947_v10 }
  0x4c   : > { %544 = vmatprep.mubr.bf16.mxu0 %v2133_v0  ;;  %v1951_v0 = vld [vmem:[%s2201_s6 + $0x70] sm:$0xff]  }
  0x4d   : > { %1881 = vmatprep.subr.bf16.mxu1 %v1951_v0  ;;  %1818 = vmatprep.subr.bf16.mxu0 %v1951_v0  ;;  %v2413_v0 = vld [vmem:[#allocation2 + $0x38] sm:$0xff] }
  0x4e   : > { %1889 = vmatpush3.bf16.msra.mxu1 %v1952_v1  ;;  %1819 = vmatpush3.bf16.msra.mxu0 %v1952_v1 }
  0x4f   : > { %1882 = vmatprep.subr.bf16.mxu1 %v1953_v3  ;;  %1820 = vmatprep.subr.bf16.mxu0 %v1953_v3  ;;  %v1963_v3 = vld [vmem:[%s2201_s6 + $0x40] sm:$0xff]  }
  0x52   : > { %1890 = vmatpush3.bf16.msra.mxu1 %v1954_v5  ;;  %1821 = vmatpush3.bf16.msra.mxu0 %v1954_v5  ;;  %v1964_v5 = vld [vmem:[%s2201_s6] sm:$0xff]  }
  0x53   : > { %1763 = vmatmul.mubr.msk.bf16.gmra.mxu0 %vm410_vm1, %v1948_v11  ;;  %v1956_v11 = vld [vmem:[%s2201_s6 + $0x20] sm:$0xff]   ;;  %1883 = vmatprep.subr.bf16.mxu1 %v1955_v9 }
  0x54   : > { %1822 = vmatprep.subr.bf16.mxu0 %v1955_v9 }
  0x56   : > { %1891 = vmatpush3.bf16.msra.mxu1 %v1956_v11  ;;  %1823 = vmatpush3.bf16.msra.mxu0 %v1956_v11  ;;  %v2462_v11 = vld [vmem:[#allocation2 + $0x58] sm:$0xff] }
  0x57   : > { %2894 = vst [vmem:[#allocation8_spill] sm:$0xff] %v2462_v11 }
  0xdb   : > { %v2226_v13 = vpop.f32.mrf.mxu0 }
  0xdd   : > { %v2228_v14 = vpop.f32.mrf.mxu0 }
  0xde   : > { %v571_v48 = vmax.f32 %v2226_v13, %v2228_v14 }
  0xdf   : > { %v2230_v15 = vpop.f32.mrf.mxu0 }
  0xe1   : > { %v2232_v16 = vpop.f32.mrf.mxu0 }
  0xe2   : > { %v574_v44 = vmax.f32 %v2230_v15, %v2232_v16 }
  0xe3   : > { %v2234_v17 = vpop.f32.mrf.mxu0 }
  0xe5   : > { %v2236_v18 = vpop.f32.mrf.mxu0 }
  0xe6   : > { %v577_v19 = vmax.f32 %v2234_v17, %v2236_v18 }
  0xe7   : > { %v2240_v20 = vpop.f32.mrf.mxu0 }
  0xe8   : > { %578 = vmax.xlane.f32.xlu0 %v577_v19  ;;  %v2377_v19 = vld [vmem:[#allocation2 + $0x20] sm:$0xff] }
  0xe9   : > { %v2242_v21 = vpop.f32.mrf.mxu0 }
  0xea   : > { %v580_v22 = vmax.f32 %v2240_v20, %v2242_v21 }
  0xeb   : > { %v2246_v23 = vpop.f32.mrf.mxu0 }
  0xec   : > { %581 = vmax.xlane.f32.xlu0 %v580_v22  ;;  %v2479_v22 = vld [vmem:[#allocation2 + $0x60] sm:$0xff] }
  0xed   : > { %v2248_v24 = vpop.f32.mrf.mxu0  ;;  %2896 = vst [vmem:[#allocation10_spill] sm:$0xff] %v2479_v22 }
  0xee   : > { %v583_v25 = vmax.f32 %v2246_v23, %v2248_v24 }
  0xef   : > { %v2252_v26 = vpop.f32.mrf.mxu0 }
  0xf0   : > { %584 = vmax.xlane.f32.xlu1 %v583_v25  ;;  %v1957_v25 = vld [vmem:[%s2201_s6 + $0x58] sm:$0xff]  }
  0xf1   : > { %v2254_v27 = vpop.f32.mrf.mxu0  ;;  %1884 = vmatprep.subr.bf16.mxu1 %v1957_v25  ;;  %1824 = vmatprep.subr.bf16.mxu0 %v1957_v25 }
  0xf2   : > { %v586_v28 = vmax.f32 %v2252_v26, %v2254_v27 }
  0xf3   : > { %v2258_v29 = vpop.f32.mrf.mxu0 }
  0xf4   : > { %587 = vmax.xlane.f32.xlu1 %v586_v28 }
  0xf5   : > { %v2260_v30 = vpop.f32.mrf.mxu0 }
  0xf6   : > { %v589_v31 = vmax.f32 %v2258_v29, %v2260_v30 }
  0xf7   : > { %v2264_v32 = vpop.f32.mrf.mxu0 }
  0xf8   : > { %590 = vmax.xlane.f32.xlu0 %v589_v31  ;;  %v1958_v31 = vld [vmem:[%s2201_s6 + $0x18] sm:$0xff]  }
  0xf9   : > { %v2266_v33 = vpop.f32.mrf.mxu0  ;;  %1892 = vmatpush3.bf16.msra.mxu1 %v1958_v31  ;;  %1825 = vmatpush3.bf16.msra.mxu0 %v1958_v31  ;;  %v2435_v31 = vld [vmem:[#allocation2 + $0x48] sm:$0xff] }
  0xfa   : > { %v592_v34 = vmax.f32 %v2264_v32, %v2266_v33  ;;  %2891 = vst [vmem:[#allocation5_spill] sm:$0xff] %v2435_v31 }
  0xfb   : > { %v2270_v35 = vpop.f32.mrf.mxu0 }
  0xfc   : > { %593 = vmax.xlane.f32.xlu1 %v592_v34 }
  0xfd   : > { %v2272_v36 = vpop.f32.mrf.mxu0 }
  0xfe   : > { %v595_v37 = vmax.f32 %v2270_v35, %v2272_v36 }
  0xff   : > { %v2276_v38 = vpop.f32.mrf.mxu0 }
 0x100   : > { %596 = vmax.xlane.f32.xlu0 %v595_v37  ;;  %v2389_v37 = vld [vmem:[#allocation2 + $0x28] sm:$0xff] }
 0x101   : > { %v2278_v39 = vpop.f32.mrf.mxu0 }
 0x102   : > { %v598_v41 = vmax.f32 %v2276_v38, %v2278_v39 }
 0x103   : > { %v2314_v42 = vpop.f32.mrf.mxu0 }
 0x104   : > { %599 = vmax.xlane.f32.xlu1 %v598_v41 }
 0x105   : > { %v2316_v43 = vpop.f32.mrf.mxu0 }
 0x106   : > { %v601_v45 = vmax.f32 %v2314_v42, %v2316_v43 }
 0x107   : > { %v2322_v46 = vpop.f32.mrf.mxu0 }
 0x108   : > { %575 = vmax.xlane.f32.xlu1 %v574_v44  ;;  %602 = vmax.xlane.f32.xlu0 %v601_v45  ;;  %v1959_v44 = vld [vmem:[%s2201_s6 + $0x50] sm:$0xff]  }
 0x109   : > { %v2324_v47 = vpop.f32.mrf.mxu0  ;;  %1885 = vmatprep.subr.bf16.mxu1 %v1959_v44  ;;  %1826 = vmatprep.subr.bf16.mxu0 %v1959_v44 }
 0x10a   : > { %v604_v49 = vmax.f32 %v2322_v46, %v2324_v47 }
 0x10b   : > { %v2330_v50 = vpop.f32.mrf.mxu0 }
 0x10c   : > { %572 = vmax.xlane.f32.xlu0 %v571_v48  ;;  %605 = vmax.xlane.f32.xlu1 %v604_v49  ;;  %v1960_v48 = vld [vmem:[%s2201_s6 + $0x10] sm:$0xff]  }
 0x10d   : > { %v2332_v51 = vpop.f32.mrf.mxu0  ;;  %1893 = vmatpush3.bf16.msra.mxu1 %v1960_v48  ;;  %1827 = vmatpush3.bf16.msra.mxu0 %v1960_v48 }
 0x10e   : > { %v607_v52 = vmax.f32 %v2330_v50, %v2332_v51 }
 0x10f   : > { %v2336_v53 = vpop.f32.mrf.mxu0 }
 0x110   : > { %608 = vmax.xlane.f32.xlu0 %v607_v52  ;;  %v2401_v52 = vld [vmem:[#allocation2 + $0x30] sm:$0xff] }
 0x111   : > { %v2338_v54 = vpop.f32.mrf.mxu0 }
 0x112   : > { %v610_v55 = vmax.f32 %v2336_v53, %v2338_v54 }
 0x113   : > { %v2342_v56 = vpop.f32.mrf.mxu0 }
 0x114   : > { %611 = vmax.xlane.f32.xlu1 %v610_v55 }
 0x115   : > { %v2344_v57 = vpop.f32.mrf.mxu0 }
 0x116   : > { %v613_v58 = vmax.f32 %v2342_v56, %v2344_v57 }
 0x117   : > { %v2348_v59 = vpop.f32.mrf.mxu0 }
 0x118   : > { %614 = vmax.xlane.f32.xlu0 %v613_v58  ;;  %v1961_v58 = vld [vmem:[%s2201_s6 + $0x48] sm:$0xff]  }
 0x119   : > { %v2350_v60 = vpop.f32.mrf.mxu0  ;;  %1886 = vmatprep.subr.bf16.mxu1 %v1961_v58  ;;  %1828 = vmatprep.subr.bf16.mxu0 %v1961_v58  ;;  %v2445_v58 = vld [vmem:[#allocation2 + $0x8] sm:$0xff] }
 0x11a   : > { %v616_v61 = vmax.f32 %v2348_v59, %v2350_v60  ;;  %1894 = vmatpush3.bf16.msra.mxu1 %v1962_v62  ;;  %1829 = vmatpush3.bf16.msra.mxu0 %v1962_v62  ;;  %v2503_v62 = vld [vmem:[#allocation2 + $0x70] sm:$0xff] }
 0x11b   : > { %1887 = vmatprep.subr.bf16.mxu1 %v1963_v3  ;;  %1830 = vmatprep.subr.bf16.mxu0 %v1963_v3  ;;  %2900 = vst [vmem:[#allocation14_spill] sm:$0xff] %v2503_v62 }
 0x11c   : > { %617 = vmax.xlane.f32.xlu1 %v616_v61 }
 0x11e   : > { %1895 = vmatpush3.bf16.msra.mxu1 %v1964_v5  ;;  %1831 = vmatpush3.bf16.msra.mxu0 %v1964_v5 }
 0x171   : > { %v579_v4 = vpop.xlane.xlu0 %578 }
 0x172   : > { %v2363_v6 = vmax.f32 %v2358_v2, %v579_v4 }
 0x174   : > { %1360 = vst.msk [vmem:[#allocation2 + $0x10] sm:$0xff] %vm294_vm2, %v2363_v6  ;;  %695 = vperm.xlu0 %1939, %v2363_v6  }
 0x175   : > { %v582_v10 = vpop.xlane.xlu0 %581 }
 0x176   : > { %v2375_v12 = vmax.f32 %v2365_v7, %v582_v10  ;;  %v2425_v10 = vld [vmem:[#allocation2 + $0x40] sm:$0xff] }
 0x178   : > { %1361 = vst.msk [vmem:[#allocation2 + $0x18] sm:$0xff] %vm294_vm2, %v2375_v12  ;;  %700 = vperm.xlu1 %1940, %v2375_v12  }
 0x179   : > { %v585_v28 = vpop.xlane.xlu1 %584 }
 0x17a   : > { %v2387_v34 = vmax.f32 %v2377_v19, %v585_v28 }
 0x17c   : > { %1362 = vst.msk [vmem:[#allocation2 + $0x20] sm:$0xff] %vm294_vm2, %v2387_v34  ;;  %705 = vperm.xlu1 %1940, %v2387_v34  }
 0x17d   : > { %v588_v45 = vpop.xlane.xlu1 %587 }
 0x17e   : > { %v2399_v49 = vmax.f32 %v2389_v37, %v588_v45 }
 0x180   : > { %1363 = vst.msk [vmem:[#allocation2 + $0x28] sm:$0xff] %vm294_vm2, %v2399_v49  ;;  %710 = vperm.xlu1 %1940, %v2399_v49  }
 0x181   : > { %v591_v61 = vpop.xlane.xlu0 %590 }
 0x182   : > { %v2411_v63 = vmax.f32 %v2401_v52, %v591_v61  ;;  %v2447_v61 = vld [vmem:[#allocation2 + $0x50] sm:$0xff] }
 0x184   : > { %1364 = vst.msk [vmem:[#allocation2 + $0x30] sm:$0xff] %vm294_vm2, %v2411_v63  ;;  %715 = vperm.xlu1 %1940, %v2411_v63  }
 0x185   : > { %v594_v4 = vpop.xlane.xlu1 %593 }
 0x186   : > { %v2423_v9 = vmax.f32 %v2413_v0, %v594_v4 }
 0x188   : > { %1365 = vst.msk [vmem:[#allocation2 + $0x38] sm:$0xff] %vm294_vm2, %v2423_v9  ;;  %720 = vperm.xlu1 %1940, %v2423_v9  }
 0x189   : > { %v597_v25 = vpop.xlane.xlu0 %596 }
 0x18a   : > { %v2433_v28 = vmax.f32 %v2425_v10, %v597_v25 }
 0x18c   : > { %1366 = vst.msk [vmem:[#allocation2 + $0x40] sm:$0xff] %vm294_vm2, %v2433_v28  ;;  %725 = vperm.xlu1 %1940, %v2433_v28  }
 0x18d   : > { %v600_v45 = vpop.xlane.xlu1 %599 }
 0x18e   : > { %v2443_v48 = vmax.f32 %v2435_v31, %v600_v45  ;;  %v2460_v45 = vld [vmem:[#allocation2] sm:$0xff] }
 0x190   : > { %2892 = vst [vmem:[#allocation6_spill] sm:$0xff] %v2443_v48  ;;  %1367 = vst.msk [vmem:[#allocation2 + $0x48] sm:$0xff] %vm294_vm2, %v2443_v48  ;;  %730 = vperm.xlu1 %1940, %v2443_v48  }
 0x191   : > { %v576_v3 = vpop.xlane.xlu1 %575  ;;  %v603_v4 = vpop.xlane.xlu0 %602 }
 0x192   : > { %v2455_v5 = vmax.f32 %v2445_v58, %v576_v3  ;;  %v2458_v25 = vmax.f32 %v2447_v61, %v603_v4 }
 0x194   : > { %2893 = vst [vmem:[#allocation7_spill] sm:$0xff] %v2458_v25  ;;  %1359 = vst.msk [vmem:[#allocation2 + $0x8] sm:$0xff] %vm294_vm2, %v2455_v5  ;;  %735 = vperm.xlu1 %1940, %v2458_v25  }
 0x195   : > { %1368 = vst.msk [vmem:[#allocation2 + $0x50] sm:$0xff] %vm294_vm2, %v2458_v25  ;;  %v573_v3 = vpop.xlane.xlu0 %572  ;;  %v606_v4 = vpop.xlane.xlu1 %605 }
 0x196   : > { %v2474_v55 = vmax.f32 %v2460_v45, %v573_v3  ;;  %v2477_v1 = vmax.f32 %v2462_v11, %v606_v4  ;;  %v2514_v11 = vld [vmem:[#allocation2 + $0x78] sm:$0xff] }
 0x197   : > { %2902 = vst [vmem:[#allocation16_spill] sm:$0xff] %v2514_v11 }
 0x198   : > { %2895 = vst [vmem:[#allocation9_spill] sm:$0xff] %v2477_v1  ;;  %1358 = vst.msk [vmem:[#allocation2] sm:$0xff] %vm294_vm2, %v2474_v55  ;;  %740 = vperm.xlu0 %1939, %v2477_v1  }
 0x199   : > { %1369 = vst.msk [vmem:[#allocation2 + $0x58] sm:$0xff] %vm294_vm2, %v2477_v1  ;;  %v609_v3 = vpop.xlane.xlu0 %608 }
 0x19a   : > { %v2491_v4 = vmax.f32 %v2479_v22, %v609_v3 }
 0x19c   : > { %2897 = vst [vmem:[#allocation11_spill] sm:$0xff] %v2491_v4  ;;  %1370 = vst.msk [vmem:[#allocation2 + $0x60] sm:$0xff] %vm294_vm2, %v2491_v4  ;;  %745 = vperm.xlu1 %1940, %v2491_v4  }
 0x19d   : > { %v612_v44 = vpop.xlane.xlu1 %611 }
 0x19e   : > { %v2501_v8 = vmax.f32 %v2493_v40, %v612_v44 }
 0x1a0   : > { %2899 = vst [vmem:[#allocation13_spill] sm:$0xff] %v2501_v8  ;;  %1371 = vst.msk [vmem:[#allocation2 + $0x68] sm:$0xff] %vm294_vm2, %v2501_v8  ;;  %750 = vperm.xlu0 %1939, %v2501_v8   ;;  %685 = vperm.xlu1 %1940, %v2474_v55  }
 0x1a1   : > { %v615_v41 = vpop.xlane.xlu0 %614 }
 0x1a2   : > { %v2512_v1 = vmax.f32 %v2503_v62, %v615_v41 }
 0x1a4   : > { %2901 = vst [vmem:[#allocation15_spill] sm:$0xff] %v2512_v1  ;;  %1372 = vst.msk [vmem:[#allocation2 + $0x70] sm:$0xff] %vm294_vm2, %v2512_v1  ;;  %690 = vperm.xlu0 %1939, %v2455_v5   ;;  %755 = vperm.xlu1 %1940, %v2512_v1  }
 0x1a5   : > { %v618_v3 = vpop.xlane.xlu1 %617 }
 0x1a6   : > { %v2523_v8 = vmax.f32 %v2514_v11, %v618_v3 }
 0x1a8   : > { %2903 = vst [vmem:[#allocation17_spill] sm:$0xff] %v2523_v8  ;;  %1373 = vst.msk [vmem:[#allocation2 + $0x78] sm:$0xff] %vm294_vm2, %v2523_v8  ;;  %760 = vperm.xlu0 %1939, %v2523_v8  }
 0x1ef   : > { %v696_v44 = vpop.permute.xlu0 %695 }
 0x1f0   : > { %v767_v40 = vsub.f32 %v2234_v17, %v696_v44  ;;  %v768_v62 = vsub.f32 %v2236_v18, %v696_v44 }
 0x1f2   : > { %v803_v4 = vmul.f32 1.442695, %v767_v40  ;;  %v805_v22 = vmul.f32 1.442695, %v768_v62 }
 0x1f3   : > { %v701_v1 = vpop.permute.xlu1 %700 }
 0x1f4   : > { %v769_v48 = vsub.f32 %v2240_v20, %v701_v1  ;;  %v770_v3 = vsub.f32 %v2242_v21, %v701_v1  ;;  %1965 = vpow2.f32 %v803_v4 }
 0x1f5   : > { %1967 = vpow2.f32 %v805_v22 }
 0x1f6   : > { %v807_v31 = vmul.f32 1.442695, %v769_v48  ;;  %v809_v41 = vmul.f32 1.442695, %v770_v3 }
 0x1f7   : > { %v706_v11 = vpop.permute.xlu1 %705 }
 0x1f8   : > { %1969 = vpow2.f32 %v807_v31  ;;  %v771_v8 = vsub.f32 %v2246_v23, %v706_v11  ;;  %v772_v25 = vsub.f32 %v2248_v24, %v706_v11 }
 0x1f9   : > { %1971 = vpow2.f32 %v809_v41 }
 0x1fa   : > { %v811_v17 = vmul.f32 1.442695, %v771_v8  ;;  %v813_v18 = vmul.f32 1.442695, %v772_v25 }
 0x1fb   : > { %v711_v40 = vpop.permute.xlu1 %710 }
 0x1fc   : > { %v773_v62 = vsub.f32 %v2252_v26, %v711_v40  ;;  %v774_v20 = vsub.f32 %v2254_v27, %v711_v40  ;;  %1973 = vpow2.f32 %v811_v17 }
 0x1fd   : > { %1975 = vpow2.f32 %v813_v18 }
 0x1fe   : > { %v815_v21 = vmul.f32 1.442695, %v773_v62  ;;  %v817_v1 = vmul.f32 1.442695, %v774_v20 }
 0x1ff   : > { %v716_v48 = vpop.permute.xlu1 %715 }
 0x200   : > { %1977 = vpow2.f32 %v815_v21  ;;  %v775_v22 = vsub.f32 %v2258_v29, %v716_v48  ;;  %v776_v23 = vsub.f32 %v2260_v30, %v716_v48 }
 0x201   : > { %1979 = vpow2.f32 %v817_v1  ;;  %v2540_v11 = vpop.eup %1965 }
 0x202   : > { %v819_v24 = vmul.f32 1.442695, %v775_v22  ;;  %v821_v8 = vmul.f32 1.442695, %v776_v23  ;;  %v2542_v25 = vpop.eup %1967 }
 0x203   : > { %v721_v31 = vpop.permute.xlu1 %720 }
 0x204   : > { %v777_v26 = vsub.f32 %v2264_v32, %v721_v31  ;;  %v778_v27 = vsub.f32 %v2266_v33, %v721_v31  ;;  %1981 = vpow2.f32 %v819_v24 }
 0x205   : > { %v2546_v4 = vpop.eup %1969  ;;  %1983 = vpow2.f32 %v821_v8 }
 0x206   : > { %v2548_v44 = vpop.eup %1971  ;;  %v823_v29 = vmul.f32 1.442695, %v777_v26  ;;  %v825_v41 = vmul.f32 1.442695, %v778_v27  ;;  %v1086_v30 = vpack.c.bf16 %v2546_v4, %v2540_v11 }
 0x207   : > { %v726_v3 = vpop.permute.xlu1 %725  ;;  %v1087_v17 = vpack.c.bf16 %v2548_v44, %v2542_v25 }
 0x208   : > { %1985 = vpow2.f32 %v823_v29  ;;  %v779_v32 = vsub.f32 %v2270_v35, %v726_v3  ;;  %v780_v33 = vsub.f32 %v2272_v36, %v726_v3 }
 0x209   : > { %1987 = vpow2.f32 %v825_v41  ;;  %1268 = vmatprep.mubr.bf16.mxu1 %v1087_v17  ;;  %v2556_v40 = vpop.eup %1973 }
 0x20a   : > { %v827_v18 = vmul.f32 1.442695, %v779_v32  ;;  %1269 = vmatmul.mubr.bf16.vlgmr.msra.gmra.mxu1 %v1086_v30  ;;  %v829_v62 = vmul.f32 1.442695, %v780_v33  ;;  %v2558_v21 = vpop.eup %1975 }
 0x20b   : > { %v731_v20 = vpop.permute.xlu1 %730 }
 0x20c   : > { %v781_v1 = vsub.f32 %v2276_v38, %v731_v20  ;;  %v782_v48 = vsub.f32 %v2278_v39, %v731_v20  ;;  %1989 = vpow2.f32 %v827_v18 }
 0x20d   : > { %v2562_v22 = vpop.eup %1977  ;;  %1991 = vpow2.f32 %v829_v62 }
 0x20e   : > { %v2564_v23 = vpop.eup %1979  ;;  %v831_v35 = vmul.f32 1.442695, %v781_v1  ;;  %v833_v36 = vmul.f32 1.442695, %v782_v48  ;;  %v1088_v24 = vpack.c.bf16 %v2562_v22, %v2556_v40 }
 0x20f   : > { %v736_v8 = vpop.permute.xlu1 %735  ;;  %v1089_v31 = vpack.c.bf16 %v2564_v23, %v2558_v21 }
 0x210   : > { %1993 = vpow2.f32 %v831_v35  ;;  %v783_v38 = vsub.f32 %v2314_v42, %v736_v8  ;;  %v784_v39 = vsub.f32 %v2316_v43, %v736_v8 }
 0x211   : > { %1995 = vpow2.f32 %v833_v36  ;;  %1276 = vmatprep.mubr.bf16.mxu1 %v1089_v31  ;;  %v2572_v27 = vpop.eup %1981 }
 0x212   : > { %v835_v26 = vmul.f32 1.442695, %v783_v38  ;;  %1277 = vmatmul.mubr.bf16.gmra.mxu1 %v1088_v24  ;;  %v837_v29 = vmul.f32 1.442695, %v784_v39  ;;  %v2574_v30 = vpop.eup %1983 }
 0x213   : > { %v741_v41 = vpop.permute.xlu0 %740 }
 0x214   : > { %v785_v3 = vsub.f32 %v2322_v46, %v741_v41  ;;  %v786_v17 = vsub.f32 %v2324_v47, %v741_v41  ;;  %1997 = vpow2.f32 %v835_v26 }
 0x215   : > { %v2578_v32 = vpop.eup %1985  ;;  %1999 = vpow2.f32 %v837_v29 }
 0x216   : > { %v2580_v33 = vpop.eup %1987  ;;  %v839_v42 = vmul.f32 1.442695, %v785_v3  ;;  %v841_v43 = vmul.f32 1.442695, %v786_v17  ;;  %v1090_v18 = vpack.c.bf16 %v2578_v32, %v2572_v27 }
 0x217   : > { %v746_v62 = vpop.permute.xlu1 %745  ;;  %v1091_v20 = vpack.c.bf16 %v2580_v33, %v2574_v30 }
 0x218   : > { %2001 = vpow2.f32 %v839_v42  ;;  %v787_v46 = vsub.f32 %v2330_v50, %v746_v62  ;;  %v788_v47 = vsub.f32 %v2332_v51, %v746_v62 }
 0x219   : > { %2003 = vpow2.f32 %v841_v43  ;;  %1284 = vmatprep.mubr.bf16.mxu1 %v1091_v20  ;;  %v2588_v48 = vpop.eup %1989 }
 0x21a   : > { %v843_v1 = vmul.f32 1.442695, %v787_v46  ;;  %1285 = vmatmul.mubr.bf16.gmra.mxu1 %v1090_v18  ;;  %v845_v35 = vmul.f32 1.442695, %v788_v47  ;;  %v2590_v8 = vpop.eup %1991 }
 0x21b   : > { %v751_v36 = vpop.permute.xlu0 %750  ;;  %v686_v24 = vpop.permute.xlu1 %685 }
 0x21c   : > { %v789_v31 = vsub.f32 %v2336_v53, %v751_v36  ;;  %v790_v38 = vsub.f32 %v2338_v54, %v751_v36  ;;  %v763_v39 = vsub.f32 %v2226_v13, %v686_v24  ;;  %2005 = vpow2.f32 %v843_v1 }
 0x21d   : > { %v2595_v50 = vpop.eup %1993  ;;  %v764_v51 = vsub.f32 %v2228_v14, %v686_v24  ;;  %2007 = vpow2.f32 %v845_v35 }
 0x21e   : > { %v2598_v26 = vpop.eup %1995  ;;  %v847_v29 = vmul.f32 1.442695, %v789_v31  ;;  %v849_v41 = vmul.f32 1.442695, %v790_v38  ;;  %v795_v3 = vmul.f32 1.442695, %v763_v39  ;;  %v1092_v17 = vpack.c.bf16 %v2595_v50, %v2588_v48 }
 0x21f   : > { %v797_v42 = vmul.f32 1.442695, %v764_v51  ;;  %v691_v53 = vpop.permute.xlu0 %690  ;;  %v756_v43 = vpop.permute.xlu1 %755  ;;  %v1093_v13 = vpack.c.bf16 %v2598_v26, %v2590_v8 }
 0x220   : > { %2009 = vpow2.f32 %v847_v29  ;;  %v765_v54 = vsub.f32 %v2230_v15, %v691_v53  ;;  %v766_v14 = vsub.f32 %v2232_v16, %v691_v53  ;;  %v791_v18 = vsub.f32 %v2342_v56, %v756_v43 }
 0x221   : > { %2011 = vpow2.f32 %v849_v41  ;;  %v792_v62 = vsub.f32 %v2344_v57, %v756_v43  ;;  %1292 = vmatprep.mubr.bf16.mxu1 %v1093_v13  ;;  %v2608_v1 = vpop.eup %1997 }
 0x222   : > { %2013 = vpow2.f32 %v795_v3  ;;  %v799_v20 = vmul.f32 1.442695, %v765_v54  ;;  %v801_v46 = vmul.f32 1.442695, %v766_v14  ;;  %v851_v47 = vmul.f32 1.442695, %v791_v18  ;;  %1293 = vmatmul.mubr.bf16.gmra.mxu1 %v1092_v17  ;;  %v2610_v24 = vpop.eup %1999 }
 0x223   : > { %2015 = vpow2.f32 %v797_v42  ;;  %v853_v35 = vmul.f32 1.442695, %v792_v62  ;;  %v761_v36 = vpop.permute.xlu0 %760 }
 0x224   : > { %2017 = vpow2.f32 %v799_v20  ;;  %v793_v15 = vsub.f32 %v2348_v59, %v761_v36  ;;  %v794_v16 = vsub.f32 %v2350_v60, %v761_v36 }
 0x225   : > { %v2002_v56 = vpop.eup %2001  ;;  %2019 = vpow2.f32 %v801_v46 }
 0x226   : > { %v2004_v57 = vpop.eup %2003  ;;  %2021 = vpow2.f32 %v851_v47  ;;  %v855_v31 = vmul.f32 1.442695, %v793_v15  ;;  %v857_v38 = vmul.f32 1.442695, %v794_v16  ;;  %v1094_v39 = vpack.c.bf16 %v2002_v56, %v2608_v1 }
 0x227   : > { %2023 = vpow2.f32 %v853_v35  ;;  %v1095_v51 = vpack.c.bf16 %v2004_v57, %v2610_v24  ;;  %v900_v35 = vadd.f32 %v2548_v44, %v2546_v4  ;;  %v897_v16 = vadd.f32 %v2542_v25, %v2540_v11 }
 0x228   : > { %2025 = vpow2.f32 %v855_v31  ;;  %v912_v4 = vadd.f32 %v2580_v33, %v2578_v32  ;;  %v909_v44 = vadd.f32 %v2574_v30, %v2572_v27  ;;  %v918_v11 = vadd.f32 %v2598_v26, %v2595_v50 }
 0x229   : > { %2027 = vpow2.f32 %v857_v38  ;;  %1300 = vmatprep.mubr.bf16.mxu1 %v1095_v51  ;;  %v2006_v29 = vpop.eup %2005  ;;  %v906_v38 = vadd.f32 %v2564_v23, %v2562_v22  ;;  %v915_v25 = vadd.f32 %v2590_v8, %v2588_v48  ;;  %v924_v22 = vadd.f32 %v2004_v57, %v2002_v56 }
 0x22a   : > { %1301 = vmatmul.mubr.bf16.gmra.mxu1 %v1094_v39  ;;  %v2008_v41 = vpop.eup %2007  ;;  %v903_v39 = vadd.f32 %v2558_v21, %v2556_v40  ;;  %v921_v40 = vadd.f32 %v2610_v24, %v2608_v1  ;;  %v2904_v30 = vsub.f32 %v2445_v58, %v2455_v5  ;;  %v2905_v48 = vsub.f32 %v2358_v2, %v2363_v6 }
 0x22b   : > { %v927_v23 = vadd.f32 %v2008_v41, %v2006_v29  ;;  %v2906_v50 = vsub.f32 %v2460_v45, %v2474_v55  ;;  %v2907_v1 = vmov 0.0   ;;  %v2908_v2 = vsub.f32 %v2377_v19, %v2387_v34 }
 0x22c   : > { %v653_v32 = vmul.f32 1.442695, %v2904_v30  ;;  %v655_v8 = vmul.f32 1.442695, %v2905_v48  ;;  %329 = vst.msk [vmem:[#allocation4 + $0x8] sm:$0xff] %vm327_vm3, %v2907_v1  ;;  %328 = vst.msk [vmem:[#allocation4] sm:$0xff] %vm327_vm3, %v2907_v1  ;;  %v2909_v55 = vsub.f32 %v2365_v7, %v2375_v12  ;;  %v2910_v5 = vsub.f32 %v2401_v52, %v2411_v63 }
 0x22d   : > { %v2010_v59 = vpop.eup %2009  ;;  %v651_v26 = vmul.f32 1.442695, %v2906_v50  ;;  %330 = vst.msk [vmem:[#allocation4 + $0x10] sm:$0xff] %vm327_vm3, %v2907_v1  ;;  %331 = vst.msk [vmem:[#allocation4 + $0x18] sm:$0xff] %vm327_vm3, %v2907_v1  ;;  %v659_v6 = vmul.f32 1.442695, %v2908_v2  ;;  %v2911_v24 = vsub.f32 %v2389_v37, %v2399_v49  ;;  %v2912_v19 = vsub.f32 %v2425_v10, %v2433_v28 }
 0x22e   : > { %v2012_v3 = vpop.eup %2011  ;;  %v1096_v60 = vpack.c.bf16 %v2010_v59, %v2006_v29  ;;  %2029 = vpow2.f32 %v653_v32  ;;  %332 = vst.msk [vmem:[#allocation4 + $0x20] sm:$0xff] %vm327_vm3, %v2907_v1  ;;  %333 = vst.msk [vmem:[#allocation4 + $0x28] sm:$0xff] %vm327_vm3, %v2907_v1  ;;  %v657_v58 = vmul.f32 1.442695, %v2909_v55  ;;  %v663_v45 = vmul.f32 1.442695, %v2910_v5 }
 0x22f   : > { %v2014_v17 = vpop.eup %2013  ;;  %v1097_v42 = vpack.c.bf16 %v2012_v3, %v2008_v41  ;;  %v930_v21 = vadd.f32 %v2012_v3, %v2010_v59  ;;  %334 = vst.msk [vmem:[#allocation4 + $0x30] sm:$0xff] %vm327_vm3, %v2907_v1  ;;  %335 = vst.msk [vmem:[#allocation4 + $0x38] sm:$0xff] %vm327_vm3, %v2907_v1  ;;  %2031 = vpow2.f32 %v655_v8  ;;  %v661_v56 = vmul.f32 1.442695, %v2911_v24  ;;  %v2914_v52 = vld [vmem:[#allocation7_spill] sm:$0xff]  ;;  %v2916_v37 = vld [vmem:[#allocation5_spill] sm:$0xff] }
 0x230   : > { %v2016_v53 = vpop.eup %2015  ;;  %336 = vst.msk [vmem:[#allocation4 + $0x40] sm:$0xff] %vm327_vm3, %v2907_v1  ;;  %337 = vst.msk [vmem:[#allocation4 + $0x48] sm:$0xff] %vm327_vm3, %v2907_v1  ;;  %2033 = vpow2.f32 %v651_v26  ;;  %v667_v34 = vmul.f32 1.442695, %v2912_v19  ;;  %v2913_v7 = vsub.f32 %v2413_v0, %v2423_v9  ;;  %v2915_v63 = vsub.f32 %v2447_v61, %v2914_v52  ;;  %v2917_v49 = vld [vmem:[#allocation6_spill] sm:$0xff]  ;;  %v2920_v3 = vld [vmem:[#allocation11_spill] sm:$0xff] }
 0x231   : > { %v2018_v43 = vpop.eup %2017  ;;  %1308 = vmatprep.mubr.bf16.mxu1 %v1097_v42  ;;  %v891_v13 = vadd.f32 %v2016_v53, %v2014_v17  ;;  %338 = vst.msk [vmem:[#allocation4 + $0x50] sm:$0xff] %vm327_vm3, %v2907_v1  ;;  %339 = vst.msk [vmem:[#allocation4 + $0x58] sm:$0xff] %vm327_vm3, %v2907_v1  ;;  %2035 = vpow2.f32 %v659_v6  ;;  %v2918_v41 = vsub.f32 %v2916_v37, %v2917_v49  ;;  %v2919_v59 = vld [vmem:[#allocation10_spill] sm:$0xff]  ;;  %v2922_v9 = vld [vmem:[#allocation8_spill] sm:$0xff] }
 0x232   : > { %v2020_v54 = vpop.eup %2019  ;;  %1309 = vmatmul.mubr.bf16.gmra.mxu1 %v1096_v60  ;;  %v1084_v14 = vpack.c.bf16 %v2018_v43, %v2014_v17  ;;  %340 = vst.msk [vmem:[#allocation4 + $0x60] sm:$0xff] %vm327_vm3, %v2907_v1  ;;  %341 = vst.msk [vmem:[#allocation4 + $0x68] sm:$0xff] %vm327_vm3, %v2907_v1  ;;  %2037 = vpow2.f32 %v657_v58  ;;  %v665_v12 = vmul.f32 1.442695, %v2913_v7  ;;  %v671_v51 = vmul.f32 1.442695, %v2915_v63 }
 0x233   : > { %v2022_v18 = vpop.eup %2021  ;;  %892 = vadd.xlane.f32.xlu1 %v891_v13  ;;  %v894_v62 = vadd.f32 %v2020_v54, %v2018_v43  ;;  %v1085_v20 = vpack.c.bf16 %v2020_v54, %v2016_v53  ;;  %342 = vst.msk [vmem:[#allocation4 + $0x70] sm:$0xff] %vm327_vm3, %v2907_v1  ;;  %343 = vst.msk [vmem:[#allocation4 + $0x78] sm:$0xff] %vm327_vm3, %v2907_v1  ;;  %2039 = vpow2.f32 %v663_v45  ;;  %v669_v10 = vmul.f32 1.442695, %v2918_v41  ;;  %v2923_v61 = vld [vmem:[#allocation9_spill] sm:$0xff]  ;;  %v2925_v13 = vld [vmem:[#allocation14_spill] sm:$0xff] }
 0x234   : > { %v2024_v46 = vpop.eup %2023  ;;  %2041 = vpow2.f32 %v661_v56  ;;  %v2921_v60 = vsub.f32 %v2919_v59, %v2920_v3  ;;  %v2924_v42 = vsub.f32 %v2922_v9, %v2923_v61  ;;  %v2926_v54 = vld [vmem:[#allocation15_spill] sm:$0xff]  ;;  %v860_v30 = vld [vmem:[#allocation3 + $0x8] sm:$0xff]  ;;  %v862_v48 = vld [vmem:[#allocation3 + $0x18] sm:$0xff] }
 0x235   : > { %v2026_v47 = vpop.eup %2025  ;;  %895 = vadd.xlane.f32.xlu0 %v894_v62  ;;  %1260 = vmatprep.mubr.bf16.mxu0 %v1085_v20  ;;  %v933_v33 = vadd.f32 %v2024_v46, %v2022_v18  ;;  %2043 = vpow2.f32 %v667_v34  ;;  %v2928_v20 = vld [vmem:[#allocation12_spill] sm:$0xff]  ;;  %v861_v1 = vld [vmem:[#allocation3 + $0x10] sm:$0xff]  ;;  %v864_v58 = vld [vmem:[#allocation3 + $0x28] sm:$0xff] }
 0x236   : > { %v2028_v36 = vpop.eup %2027  ;;  %1261 = vmatmul.mubr.bf16.vlgmr.msra.gmra.mxu0 %v1084_v14  ;;  %v1098_v15 = vpack.c.bf16 %v2026_v47, %v2022_v18  ;;  %2045 = vpow2.f32 %v665_v12  ;;  %v675_v17 = vmul.f32 1.442695, %v2921_v60  ;;  %v673_v53 = vmul.f32 1.442695, %v2924_v42  ;;  %v863_v56 = vld [vmem:[#allocation3 + $0x20] sm:$0xff] }
 0x237   : > { %901 = vadd.xlane.f32.xlu1 %v900_v35  ;;  %v1099_v31 = vpack.c.bf16 %v2028_v36, %v2024_v46  ;;  %v936_v27 = vadd.f32 %v2028_v36, %v2026_v47  ;;  %2047 = vpow2.f32 %v671_v51  ;;  %v2927_v14 = vsub.f32 %v2925_v13, %v2926_v54  ;;  %v2929_v46 = vld [vmem:[#allocation13_spill] sm:$0xff]  ;;  %v865_v51 = vld [vmem:[#allocation3 + $0x30] sm:$0xff]  ;;  %v870_v13 = vld [vmem:[#allocation3 + $0x58] sm:$0xff] }
 0x238   : > { %2049 = vpow2.f32 %v669_v10  ;;  %v2930_v47 = vsub.f32 %v2928_v20, %v2929_v46  ;;  %v868_v10 = vld [vmem:[#allocation3 + $0x48] sm:$0xff]  ;;  %v869_v46 = vld [vmem:[#allocation3 + $0x50] sm:$0xff] }
 0x239   : > { %898 = vadd.xlane.f32.xlu0 %v897_v16  ;;  %1316 = vmatprep.mubr.bf16.mxu1 %v1099_v31  ;;  %2051 = vpow2.f32 %v675_v17  ;;  %v679_v18 = vmul.f32 1.442695, %v2927_v14  ;;  %v2931_v16 = vld [vmem:[#allocation16_spill] sm:$0xff]  ;;  %v2932_v31 = vld [vmem:[#allocation17_spill] sm:$0xff] }
 0x23a   : > { %1317 = vmatmul.mubr.bf16.gmra.mxu1 %v1098_v15  ;;  %2053 = vpow2.f32 %v673_v53  ;;  %v677_v35 = vmul.f32 1.442695, %v2930_v47 }
 0x23b   : > { %907 = vadd.xlane.f32.xlu1 %v906_v38  ;;  %v2030_v57 = vpop.eup %2029  ;;  %2055 = vpow2.f32 %v679_v18  ;;  %v2933_v38 = vsub.f32 %v2931_v16, %v2932_v31 }
 0x23c   : > { %v2032_v29 = vpop.eup %2031  ;;  %2057 = vpow2.f32 %v677_v35  ;;  %v876_v50 = vmul.f32 %v2030_v57, %v860_v30  ;;  %v871_v30 = vld [vmem:[#allocation3 + $0x60] sm:$0xff] }
 0x23d   : > { %904 = vadd.xlane.f32.xlu0 %v903_v39  ;;  %v2034_v28 = vpop.eup %2033  ;;  %v681_v39 = vmul.f32 1.442695, %v2933_v38  ;;  %v877_v45 = vmul.f32 %v2032_v29, %v861_v1  ;;  %v872_v38 = vld [vmem:[#allocation3 + $0x68] sm:$0xff] }
 0x23e   : > { %v2702_v0 = vpop.eup %2035 }
 0x23f   : > { %913 = vadd.xlane.f32.xlu1 %v912_v4  ;;  %v2038_v43 = vpop.eup %2037  ;;  %2059 = vpow2.f32 %v681_v39  ;;  %v879_v52 = vmul.f32 %v2702_v0, %v863_v56 }
 0x240   : > { %v2711_v62 = vpop.eup %2039  ;;  %v878_v6 = vmul.f32 %v2038_v43, %v862_v48 }
 0x241   : > { %910 = vadd.xlane.f32.xlu0 %v909_v44  ;;  %v2042_v36 = vpop.eup %2041  ;;  %v881_v3 = vmul.f32 %v2711_v62, %v865_v51 }
 0x242   : > { %v2717_v15 = vpop.eup %2043  ;;  %v880_v34 = vmul.f32 %v2042_v36, %v864_v58 }
 0x243   : > { %919 = vadd.xlane.f32.xlu1 %v918_v11  ;;  %v2046_v4 = vpop.eup %2045 }
 0x244   : > { %v2723_v44 = vpop.eup %2047 }
 0x245   : > { %916 = vadd.xlane.f32.xlu0 %v915_v25  ;;  %v2050_v11 = vpop.eup %2049 }
 0x246   : > { %v2726_v25 = vpop.eup %2051  ;;  %v884_v42 = vmul.f32 %v2050_v11, %v868_v10 }
 0x247   : > { %925 = vadd.xlane.f32.xlu1 %v924_v22  ;;  %v2729_v22 = vpop.eup %2053 }
 0x249   : > { %922 = vadd.xlane.f32.xlu0 %v921_v40  ;;  %v2731_v40 = vpop.eup %2055 }
 0x24b   : > { %931 = vadd.xlane.f32.xlu1 %v930_v21  ;;  %v2735_v21 = vpop.eup %2057 }
 0x24d   : > { %928 = vadd.xlane.f32.xlu0 %v927_v23  ;;  %v2738_v23 = vpop.eup %2059 }
 0x24f   : > { %937 = vadd.xlane.f32.xlu1 %v936_v27  ;;  %v859_v27 = vld [vmem:[#allocation3] sm:$0xff] }
 0x250   : > { %v875_v32 = vmul.f32 %v2034_v28, %v859_v27 }
 0x251   : > { %934 = vadd.xlane.f32.xlu0 %v933_v33 }
 0x260   : > { %995 = vperm.xlu1 %1940, %v2030_v57   ;;  %v866_v57 = vld [vmem:[#allocation3 + $0x38] sm:$0xff] }
 0x264   : > { %1000 = vperm.xlu1 %1940, %v2032_v29   ;;  %v882_v29 = vmul.f32 %v2046_v4, %v866_v57 }
 0x267   : > { %990 = vperm.xlu0 %1939, %v2034_v28  }
 0x268   : > { %1010 = vperm.xlu1 %1940, %v2702_v0   ;;  %v867_v0 = vld [vmem:[#allocation3 + $0x40] sm:$0xff] }
 0x269   : > { %v883_v18 = vmul.f32 %v2717_v15, %v867_v0 }
 0x26b   : > { %1005 = vperm.xlu0 %1939, %v2038_v43  }
 0x26c   : > { %1020 = vperm.xlu1 %1940, %v2711_v62  }
 0x26f   : > { %1015 = vperm.xlu0 %1939, %v2042_v36   ;;  %v886_v36 = vmul.f32 %v2729_v22, %v870_v13 }
 0x270   : > { %1030 = vperm.xlu1 %1940, %v2717_v15  }
 0x273   : > { %1025 = vperm.xlu0 %1939, %v2046_v4   ;;  %v885_v4 = vmul.f32 %v2723_v44, %v869_v46 }
 0x274   : > { %1040 = vperm.xlu1 %1940, %v2723_v44  }
 0x277   : > { %1035 = vperm.xlu0 %1939, %v2050_v11  }
 0x278   : > { %1050 = vperm.xlu1 %1940, %v2726_v25  }
 0x27b   : > { %1045 = vperm.xlu0 %1939, %v2729_v22  }
 0x27c   : > { %1060 = vperm.xlu1 %1940, %v2731_v40  }
 0x27f   : > { %1055 = vperm.xlu0 %1939, %v2735_v21  }
 0x283   : > { %1065 = vperm.xlu0 %1939, %v2738_v23  }
 0x2bc   : > { %v893_v33 = vpop.xlane.xlu1 %892 }
 0x2bd   : > { %v939_v8 = vadd.f32 %v893_v33, %v875_v32  ;;  %v888_v33 = vmul.f32 %v2735_v21, %v872_v38 }
 0x2be   : > { %v896_v26 = vpop.xlane.xlu0 %895 }
 0x2bf   : > { %956 = vst.msk [vmem:[#allocation3] sm:$0xff] %vm294_vm2, %v939_v8  ;;  %v940_v2 = vadd.f32 %v896_v26, %v876_v50  ;;  %v874_v26 = vld [vmem:[#allocation3 + $0x78] sm:$0xff] }
 0x2c0   : > { %v902_v55 = vpop.xlane.xlu1 %901 }
 0x2c1   : > { %957 = vst.msk [vmem:[#allocation3 + $0x8] sm:$0xff] %vm294_vm2, %v940_v2  ;;  %v942_v5 = vadd.f32 %v902_v55, %v878_v6  ;;  %v887_v2 = vmul.f32 %v2726_v25, %v871_v30 }
 0x2c2   : > { %v899_v24 = vpop.xlane.xlu0 %898 }
 0x2c3   : > { %959 = vst.msk [vmem:[#allocation3 + $0x18] sm:$0xff] %vm294_vm2, %v942_v5  ;;  %v941_v19 = vadd.f32 %v899_v24, %v877_v45  ;;  %v873_v5 = vld [vmem:[#allocation3 + $0x70] sm:$0xff]  ;;  %v890_v24 = vmul.f32 %v2738_v23, %v874_v26 }
 0x2c4   : > { %v908_v7 = vpop.xlane.xlu1 %907  ;;  %v889_v57 = vmul.f32 %v2731_v40, %v873_v5 }
 0x2c5   : > { %958 = vst.msk [vmem:[#allocation3 + $0x10] sm:$0xff] %vm294_vm2, %v941_v19  ;;  %v944_v12 = vadd.f32 %v908_v7, %v880_v34 }
 0x2c6   : > { %v905_v63 = vpop.xlane.xlu0 %904  ;;  %v1393_v37 = vld [vmem:[#allocation3] sm:$0xff] }
 0x2c7   : > { %961 = vst.msk [vmem:[#allocation3 + $0x28] sm:$0xff] %vm294_vm2, %v944_v12  ;;  %v943_v49 = vadd.f32 %v905_v63, %v879_v52  ;;  %2061 = vrcp.f32 %v1393_v37 }
 0x2c8   : > { %v914_v41 = vpop.xlane.xlu1 %913  ;;  %v1394_v28 = vld [vmem:[#allocation3 + $0x8] sm:$0xff] }
 0x2c9   : > { %960 = vst.msk [vmem:[#allocation3 + $0x20] sm:$0xff] %vm294_vm2, %v943_v49  ;;  %v946_v59 = vadd.f32 %v914_v41, %v882_v29  ;;  %2063 = vrcp.f32 %v1394_v28  ;;  %v974_v28 = vld [vmem:[#allocation4 + $0x10] sm:$0xff] }
 0x2ca   : > { %v2749_v60 = vpop.f32.mrf.mxu1  ;;  %v911_v17 = vpop.xlane.xlu0 %910  ;;  %v1396_v9 = vld [vmem:[#allocation3 + $0x18] sm:$0xff] }
 0x2cb   : > { %963 = vst.msk [vmem:[#allocation3 + $0x38] sm:$0xff] %vm294_vm2, %v946_v59  ;;  %v945_v61 = vadd.f32 %v911_v17, %v881_v3  ;;  %2065 = vrcp.f32 %v1396_v9 }
 0x2cc   : > { %v920_v53 = vpop.xlane.xlu1 %919  ;;  %v2752_v43 = vpop.f32.mrf.mxu1  ;;  %v1395_v54 = vld [vmem:[#allocation3 + $0x10] sm:$0xff] }
 0x2cd   : > { %962 = vst.msk [vmem:[#allocation3 + $0x30] sm:$0xff] %vm294_vm2, %v945_v61  ;;  %v948_v14 = vadd.f32 %v920_v53, %v884_v42  ;;  %2067 = vrcp.f32 %v1395_v54  ;;  %v1840_v61 = vadd.f32 %v2752_v43, %v2749_v60 }
 0x2ce   : > { %v2756_v62 = vpop.f32.mrf.mxu1  ;;  %v917_v20 = vpop.xlane.xlu0 %916  ;;  %v1398_v47 = vld [vmem:[#allocation3 + $0x28] sm:$0xff] }
 0x2cf   : > { %965 = vst.msk [vmem:[#allocation3 + $0x48] sm:$0xff] %vm294_vm2, %v948_v14  ;;  %v947_v35 = vadd.f32 %v917_v20, %v883_v18  ;;  %2069 = vrcp.f32 %v1398_v47  ;;  %v976_v14 = vld [vmem:[#allocation4 + $0x20] sm:$0xff] }
 0x2d0   : > { %v926_v16 = vpop.xlane.xlu1 %925  ;;  %v2760_v31 = vpop.f32.mrf.mxu1  ;;  %v1397_v39 = vld [vmem:[#allocation3 + $0x20] sm:$0xff] }
 0x2d1   : > { %964 = vst.msk [vmem:[#allocation3 + $0x40] sm:$0xff] %vm294_vm2, %v947_v35  ;;  %v950_v15 = vadd.f32 %v926_v16, %v886_v36  ;;  %2071 = vrcp.f32 %v1397_v39  ;;  %v975_v35 = vld [vmem:[#allocation4 + $0x18] sm:$0xff] }
 0x2d2   : > { %v2764_v11 = vpop.f32.mrf.mxu1  ;;  %v923_v27 = vpop.xlane.xlu0 %922  ;;  %v1400_v32 = vld [vmem:[#allocation3 + $0x38] sm:$0xff] }
 0x2d3   : > { %967 = vst.msk [vmem:[#allocation3 + $0x58] sm:$0xff] %vm294_vm2, %v950_v15  ;;  %v949_v22 = vadd.f32 %v923_v27, %v885_v4  ;;  %2073 = vrcp.f32 %v1400_v32  ;;  %v978_v4 = vld [vmem:[#allocation4 + $0x30] sm:$0xff]  ;;  %v1843_v27 = vadd.f32 %v2760_v31, %v2756_v62 }
 0x2d4   : > { %v2062_v48 = vpop.eup %2061  ;;  %v932_v8 = vpop.xlane.xlu1 %931  ;;  %v1399_v1 = vld [vmem:[#allocation3 + $0x30] sm:$0xff] }
 0x2d5   : > { %v2768_v50 = vpop.f32.mrf.mxu1  ;;  %966 = vst.msk [vmem:[#allocation3 + $0x50] sm:$0xff] %vm294_vm2, %v949_v22  ;;  %v952_v44 = vadd.f32 %v932_v8, %v888_v33  ;;  %1427 = vperm.xlu1 %1940, %v2062_v48   ;;  %2075 = vrcp.f32 %v1399_v1  ;;  %v977_v48 = vld [vmem:[#allocation4 + $0x28] sm:$0xff] }
 0x2d6   : > { %v2064_v6 = vpop.eup %2063  ;;  %v929_v58 = vpop.xlane.xlu0 %928  ;;  %v1402_v21 = vld [vmem:[#allocation3 + $0x48] sm:$0xff]  ;;  %v1846_v60 = vadd.f32 %v2768_v50, %v2764_v11 }
 0x2d7   : > { %v2772_v55 = vpop.f32.mrf.mxu1  ;;  %969 = vst.msk [vmem:[#allocation3 + $0x68] sm:$0xff] %vm294_vm2, %v952_v44  ;;  %v951_v45 = vadd.f32 %v929_v58, %v887_v2  ;;  %1432 = vperm.xlu0 %1939, %v2064_v6   ;;  %2077 = vrcp.f32 %v1402_v21  ;;  %v980_v6 = vld [vmem:[#allocation4 + $0x40] sm:$0xff] }
 0x2d8   : > { %v938_v56 = vpop.xlane.xlu1 %937  ;;  %v1401_v34 = vld [vmem:[#allocation3 + $0x40] sm:$0xff]  ;;  %v2066_v7 = vpop.eup %2065 }
 0x2d9   : > { %v2776_v19 = vpop.f32.mrf.mxu1  ;;  %968 = vst.msk [vmem:[#allocation3 + $0x60] sm:$0xff] %vm294_vm2, %v951_v45  ;;  %v954_v25 = vadd.f32 %v938_v56, %v890_v24  ;;  %2079 = vrcp.f32 %v1401_v34  ;;  %v979_v45 = vld [vmem:[#allocation4 + $0x38] sm:$0xff] }
 0x2da   : > { %v2068_v12 = vpop.eup %2067  ;;  %v935_v63 = vpop.xlane.xlu0 %934  ;;  %v1404_v51 = vld [vmem:[#allocation3 + $0x58] sm:$0xff]  ;;  %v1849_v62 = vadd.f32 %v2776_v19, %v2772_v55 }
 0x2db   : > { %v1850_v52 = vpop.f32.mrf.mxu1  ;;  %971 = vst.msk [vmem:[#allocation3 + $0x78] sm:$0xff] %vm294_vm2, %v954_v25  ;;  %v953_v23 = vadd.f32 %v935_v63, %v889_v57  ;;  %1437 = vperm.xlu1 %1940, %v2068_v12   ;;  %1442 = vperm.xlu0 %1939, %v2066_v7   ;;  %2081 = vrcp.f32 %v1404_v51 }
 0x2dc   : > { %v2781_v37 = vpop.permute.xlu1 %995  ;;  %v1403_v29 = vld [vmem:[#allocation3 + $0x50] sm:$0xff]  ;;  %v2070_v41 = vpop.eup %2069 }
 0x2dd   : > { %v1851_v49 = vpop.f32.mrf.mxu1  ;;  %970 = vst.msk [vmem:[#allocation3 + $0x70] sm:$0xff] %vm294_vm2, %v953_v23  ;;  %2083 = vrcp.f32 %v1403_v29 }
 0x2de   : > { %v2072_v40 = vpop.eup %2071  ;;  %v1406_v59 = vld [vmem:[#allocation3 + $0x68] sm:$0xff]  ;;  %v1852_v11 = vadd.f32 %v1851_v49, %v1850_v52  ;;  %v982_v52 = vld [vmem:[#allocation4 + $0x50] sm:$0xff] }
 0x2df   : > { %v2784_v10 = vpop.f32.mrf.mxu1  ;;  %1447 = vperm.xlu1 %1940, %v2072_v40   ;;  %1452 = vperm.xlu0 %1939, %v2070_v41   ;;  %2085 = vrcp.f32 %v1406_v59  ;;  %v981_v49 = vld [vmem:[#allocation4 + $0x48] sm:$0xff] }
 0x2e0   : > { %v1001_v3 = vpop.permute.xlu1 %1000  ;;  %v1405_v0 = vld [vmem:[#allocation3 + $0x60] sm:$0xff]  ;;  %v2074_v9 = vpop.eup %2073 }
 0x2e1   : > { %v2786_v17 = vpop.f32.mrf.mxu1  ;;  %v1070_v42 = vmul.f32 %v1001_v3, %v974_v28  ;;  %2087 = vrcp.f32 %v1405_v0 }
 0x2e2   : > { %v2076_v53 = vpop.eup %2075  ;;  %v2790_v54 = vpop.permute.xlu0 %990  ;;  %v1408_v18 = vld [vmem:[#allocation3 + $0x78] sm:$0xff]  ;;  %v1855_v55 = vadd.f32 %v2786_v17, %v2784_v10 }
 0x2e3   : > { %v1856_v13 = vpop.f32.mrf.mxu1  ;;  %v1327_v20 = vadd.f32 %v1840_v61, %v1070_v42  ;;  %1457 = vperm.xlu1 %1940, %v2076_v53   ;;  %1462 = vperm.xlu0 %1939, %v2074_v9   ;;  %2089 = vrcp.f32 %v1408_v18  ;;  %v984_v9 = vld [vmem:[#allocation4 + $0x60] sm:$0xff] }
 0x2e4   : > { %v1011_v46 = vpop.permute.xlu1 %1010  ;;  %v1407_v36 = vld [vmem:[#allocation3 + $0x70] sm:$0xff]  ;;  %v2078_v16 = vpop.eup %2077 }
 0x2e5   : > { %v1857_v47 = vpop.f32.mrf.mxu1  ;;  %1344 = vst.msk [vmem:[#allocation4 + $0x10] sm:$0xff] %vm327_vm3, %v1327_v20  ;;  %v1072_v43 = vmul.f32 %v1011_v46, %v976_v14  ;;  %2091 = vrcp.f32 %v1407_v36  ;;  %v983_v20 = vld [vmem:[#allocation4 + $0x58] sm:$0xff]  ;;  %v972_v46 = vld [vmem:[#allocation4] sm:$0xff] }
 0x2e6   : > { %v2080_v38 = vpop.eup %2079  ;;  %v1006_v15 = vpop.permute.xlu0 %1005  ;;  %v1858_v56 = vadd.f32 %v1857_v47, %v1856_v13 }
 0x2e7   : > { %v1859_v39 = vpop.f32.mrf.mxu1  ;;  %v1329_v30 = vadd.f32 %v1846_v60, %v1072_v43  ;;  %v1071_v32 = vmul.f32 %v1006_v15, %v975_v35  ;;  %1467 = vperm.xlu1 %1940, %v2080_v38   ;;  %1472 = vperm.xlu0 %1939, %v2078_v16  }
 0x2e8   : > { %v1021_v22 = vpop.permute.xlu1 %1020  ;;  %v2082_v8 = vpop.eup %2081 }
 0x2e9   : > { %v1860_v33 = vpop.f32.mrf.mxu1  ;;  %1346 = vst.msk [vmem:[#allocation4 + $0x20] sm:$0xff] %vm327_vm3, %v1329_v30  ;;  %v1328_v50 = vadd.f32 %v1843_v27, %v1071_v32  ;;  %v1074_v26 = vmul.f32 %v1021_v22, %v978_v4  ;;  %v985_v27 = vld [vmem:[#allocation4 + $0x68] sm:$0xff] }
 0x2ea   : > { %v2084_v1 = vpop.eup %2083  ;;  %v1016_v2 = vpop.permute.xlu0 %1015  ;;  %v1861_v10 = vadd.f32 %v1860_v33, %v1859_v39  ;;  %v1068_v39 = vmul.f32 %v2790_v54, %v972_v46  ;;  %v973_v30 = vld [vmem:[#allocation4 + $0x8] sm:$0xff] }
 0x2eb   : > { %v1862_v44 = vpop.f32.mrf.mxu1  ;;  %1345 = vst.msk [vmem:[#allocation4 + $0x18] sm:$0xff] %vm327_vm3, %v1328_v50  ;;  %v1331_v31 = vadd.f32 %v1852_v11, %v1074_v26  ;;  %v1073_v58 = vmul.f32 %v1016_v2, %v977_v48  ;;  %1477 = vperm.xlu1 %1940, %v2084_v1   ;;  %1482 = vperm.xlu0 %1939, %v2082_v8   ;;  %v986_v48 = vld [vmem:[#allocation4 + $0x70] sm:$0xff] }
 0x2ec   : > { %v1031_v5 = vpop.permute.xlu1 %1030  ;;  %v2086_v24 = vpop.eup %2085  ;;  %v1069_v54 = vmul.f32 %v2781_v37, %v973_v30 }
 0x2ed   : > { %v1863_v21 = vpop.f32.mrf.mxu1  ;;  %1348 = vst.msk [vmem:[#allocation4 + $0x30] sm:$0xff] %vm327_vm3, %v1331_v31  ;;  %v1330_v34 = vadd.f32 %v1849_v62, %v1073_v58  ;;  %v1076_v7 = vmul.f32 %v1031_v5, %v980_v6 }
 0x2ee   : > { %v2088_v25 = vpop.eup %2087  ;;  %v1026_v12 = vpop.permute.xlu0 %1025  ;;  %v1864_v41 = vadd.f32 %v1863_v21, %v1862_v44 }
 0x2ef   : > { %v1865_v57 = vpop.f32.mrf.mxu1  ;;  %1347 = vst.msk [vmem:[#allocation4 + $0x28] sm:$0xff] %vm327_vm3, %v1330_v34  ;;  %v1333_v19 = vadd.f32 %v1858_v56, %v1076_v7  ;;  %v1075_v63 = vmul.f32 %v1026_v12, %v979_v45  ;;  %1487 = vperm.xlu1 %1940, %v2088_v25   ;;  %1492 = vperm.xlu0 %1939, %v2086_v24   ;;  %v987_v45 = vld [vmem:[#allocation4 + $0x78] sm:$0xff] }
 0x2f0   : > { %v1041_v51 = vpop.permute.xlu1 %1040  ;;  %v2090_v29 = vpop.eup %2089 }
 0x2f1   : > { %v1866_v23 = vpop.f32.mrf.mxu1  ;;  %1350 = vst.msk [vmem:[#allocation4 + $0x40] sm:$0xff] %vm327_vm3, %v1333_v19  ;;  %v1332_v40 = vadd.f32 %v1855_v55, %v1075_v63  ;;  %v1078_v28 = vmul.f32 %v1041_v51, %v982_v52 }
 0x2f2   : > { %v2092_v59 = vpop.eup %2091  ;;  %v1036_v0 = vpop.permute.xlu0 %1035  ;;  %v1867_v60 = vadd.f32 %v1866_v23, %v1865_v57 }
 0x2f3   : > { %v1868_v3 = vpop.f32.mrf.mxu1  ;;  %1349 = vst.msk [vmem:[#allocation4 + $0x38] sm:$0xff] %vm327_vm3, %v1332_v40  ;;  %v1335_v17 = vadd.f32 %v1864_v41, %v1078_v28  ;;  %v1077_v61 = vmul.f32 %v1036_v0, %v981_v49  ;;  %1497 = vperm.xlu1 %1940, %v2092_v59   ;;  %1502 = vperm.xlu0 %1939, %v2090_v29   ;;  %v1380_v49 = vld [vmem:[#allocation4 + $0x18] sm:$0xff]  ;;  %v1379_v41 = vld [vmem:[#allocation4 + $0x10] sm:$0xff] }
 0x2f4   : > { %v1051_v42 = vpop.permute.xlu1 %1050  ;;  %v1383_v46 = vld [vmem:[#allocation4 + $0x30] sm:$0xff] }
 0x2f5   : > { %v1869_v53 = vpop.f32.mrf.mxu1  ;;  %1352 = vst.msk [vmem:[#allocation4 + $0x50] sm:$0xff] %vm327_vm3, %v1335_v17  ;;  %v1334_v13 = vadd.f32 %v1861_v10, %v1077_v61  ;;  %v1080_v14 = vmul.f32 %v1051_v42, %v984_v9  ;;  %v1381_v17 = vld [vmem:[#allocation4 + $0x20] sm:$0xff] }
 0x2f6   : > { %v1870_v18 = vadd.f32 %v1869_v53, %v1868_v3  ;;  %v1832_v47 = vpop.f32.mrf.mxu0  ;;  %v1046_v16 = vpop.permute.xlu0 %1045  ;;  %v1382_v9 = vld [vmem:[#allocation4 + $0x28] sm:$0xff] }
 0x2f7   : > { %v1871_v35 = vpop.f32.mrf.mxu1  ;;  %1351 = vst.msk [vmem:[#allocation4 + $0x48] sm:$0xff] %vm327_vm3, %v1334_v13  ;;  %v1079_v43 = vmul.f32 %v1046_v16, %v983_v20 }
 0x2f8   : > { %v1337_v36 = vadd.f32 %v1870_v18, %v1080_v14  ;;  %v1833_v38 = vpop.f32.mrf.mxu0  ;;  %v1061_v22 = vpop.permute.xlu1 %1060 }
 0x2f9   : > { %v1834_v15 = vadd.f32 %v1833_v38, %v1832_v47  ;;  %v1872_v4 = vpop.f32.mrf.mxu1  ;;  %v1336_v32 = vadd.f32 %v1867_v60, %v1079_v43  ;;  %v1082_v62 = vmul.f32 %v1061_v22, %v986_v48 }
 0x2fa   : > { %1354 = vst.msk [vmem:[#allocation4 + $0x60] sm:$0xff] %vm327_vm3, %v1337_v36  ;;  %v1835_v33 = vpop.f32.mrf.mxu0  ;;  %v1056_v50 = vpop.permute.xlu0 %1055  ;;  %v1873_v26 = vadd.f32 %v1872_v4, %v1871_v35  ;;  %v1384_v18 = vld [vmem:[#allocation4 + $0x38] sm:$0xff] }
 0x2fb   : > { %v1325_v8 = vadd.f32 %v1834_v15, %v1068_v39  ;;  %v1874_v11 = vpop.f32.mrf.mxu1  ;;  %1353 = vst.msk [vmem:[#allocation4 + $0x58] sm:$0xff] %vm327_vm3, %v1336_v32  ;;  %v1081_v1 = vmul.f32 %v1056_v50, %v985_v27  ;;  %v1385_v39 = vld [vmem:[#allocation4 + $0x40] sm:$0xff] }
 0x2fc   : > { %v1836_v44 = vpop.f32.mrf.mxu0  ;;  %v1387_v48 = vld [vmem:[#allocation4 + $0x50] sm:$0xff] }
 0x2fd   : > { %1342 = vst.msk [vmem:[#allocation4] sm:$0xff] %vm327_vm3, %v1325_v8  ;;  %v1837_v2 = vadd.f32 %v1836_v44, %v1835_v33  ;;  %v1875_v6 = vpop.f32.mrf.mxu1  ;;  %v1338_v31 = vadd.f32 %v1873_v26, %v1081_v1 }
 0x2fe   : > { %v1876_v58 = vadd.f32 %v1875_v6, %v1874_v11  ;;  %v1066_v24 = vpop.permute.xlu0 %1065  ;;  %v1386_v43 = vld [vmem:[#allocation4 + $0x48] sm:$0xff] }
 0x2ff   : > { %v1326_v5 = vadd.f32 %v1837_v2, %v1069_v54  ;;  %v1877_v21 = vpop.f32.mrf.mxu1  ;;  %1355 = vst.msk [vmem:[#allocation4 + $0x68] sm:$0xff] %vm327_vm3, %v1338_v31  ;;  %v1083_v37 = vmul.f32 %v1066_v24, %v987_v45 }
 0x300   : > { %v1339_v56 = vadd.f32 %v1876_v58, %v1082_v62 }
 0x301   : > { %1343 = vst.msk [vmem:[#allocation4 + $0x8] sm:$0xff] %vm327_vm3, %v1326_v5  ;;  %v1878_v34 = vpop.f32.mrf.mxu1  ;;  %v1389_v2 = vld [vmem:[#allocation4 + $0x60] sm:$0xff] }
 0x302   : > { %1356 = vst.msk [vmem:[#allocation4 + $0x70] sm:$0xff] %vm327_vm3, %v1339_v56  ;;  %v1879_v7 = vadd.f32 %v1878_v34, %v1877_v21  ;;  %v1388_v22 = vld [vmem:[#allocation4 + $0x58] sm:$0xff] }
 0x304   : > { %v1340_v25 = vadd.f32 %v1879_v7, %v1083_v37  ;;  %v1377_v57 = vld [vmem:[#allocation4] sm:$0xff] }
 0x306   : > { %1357 = vst.msk [vmem:[#allocation4 + $0x78] sm:$0xff] %vm327_vm3, %v1340_v25  ;;  %v1390_v44 = vld [vmem:[#allocation4 + $0x68] sm:$0xff] }
 0x308   : > { %v1378_v19 = vld [vmem:[#allocation4 + $0x8] sm:$0xff] }
 0x309   : > { %v1391_v24 = vld [vmem:[#allocation4 + $0x70] sm:$0xff] }
 0x30d   : > { %v1392_v21 = vld [vmem:[#allocation4 + $0x78] sm:$0xff] }
 0x350   : > { %v1428_v12 = vpop.permute.xlu1 %1427 }
 0x351   : > { %v1505_v52 = vmul.f32 %v1428_v12, %v1377_v57 }
 0x352   : > { %v1433_v55 = vpop.permute.xlu0 %1432 }
 0x353   : > { %v1800_v63 = vpack.c.bf16 %v1505_v52, %v1505_v52  ;;  %v1506_v51 = vmul.f32 %v1433_v55, %v1378_v19 }
 0x355   : > { %1586 = vst.msk [vmem:[%s2823_s9] sm:$0xf] %vm1585_vm4, %v1800_v63  ;;  %v1801_v23 = vpack.c.bf16 %v1506_v51, %v1506_v51 }
 0x356   : > { %v1443_v29 = vpop.permute.xlu0 %1442  ;;  %v1438_v40 = vpop.permute.xlu1 %1437 }
 0x357   : > { %1587 = vst.msk [vmem:[%s2823_s9 + $0x4] sm:$0xf] %vm1585_vm4, %v1801_v23  ;;  %v1508_v28 = vmul.f32 %v1443_v29, %v1380_v49  ;;  %v1507_v59 = vmul.f32 %v1438_v40, %v1379_v41 }
 0x359   : > { %v1803_v3 = vpack.c.bf16 %v1508_v28, %v1508_v28  ;;  %v1802_v0 = vpack.c.bf16 %v1507_v59, %v1507_v59 }
 0x35a   : > { %v1453_v10 = vpop.permute.xlu0 %1452  ;;  %v1448_v61 = vpop.permute.xlu1 %1447 }
 0x35b   : > { %1589 = vst.msk [vmem:[%s2823_s9 + $0xc] sm:$0xf] %vm1585_vm4, %v1803_v3  ;;  %1588 = vst.msk [vmem:[%s2823_s9 + $0x8] sm:$0xf] %vm1585_vm4, %v1802_v0  ;;  %v1510_v42 = vmul.f32 %v1453_v10, %v1382_v9  ;;  %v1509_v53 = vmul.f32 %v1448_v61, %v1381_v17 }
 0x35d   : > { %v1805_v13 = vpack.c.bf16 %v1510_v42, %v1510_v42  ;;  %v1804_v14 = vpack.c.bf16 %v1509_v53, %v1509_v53 }
 0x35e   : > { %v1463_v20 = vpop.permute.xlu0 %1462  ;;  %v1458_v47 = vpop.permute.xlu1 %1457 }
 0x35f   : > { %1591 = vst.msk [vmem:[%s2823_s9 + $0x14] sm:$0xf] %vm1585_vm4, %v1805_v13  ;;  %1590 = vst.msk [vmem:[%s2823_s9 + $0x10] sm:$0xf] %vm1585_vm4, %v1804_v14  ;;  %v1512_v35 = vmul.f32 %v1463_v20, %v1384_v18  ;;  %v1511_v36 = vmul.f32 %v1458_v47, %v1383_v46 }
 0x361   : > { %v1807_v16 = vpack.c.bf16 %v1512_v35, %v1512_v35  ;;  %v1806_v60 = vpack.c.bf16 %v1511_v36, %v1511_v36 }
 0x362   : > { %v1473_v38 = vpop.permute.xlu0 %1472  ;;  %v1468_v15 = vpop.permute.xlu1 %1467 }
 0x363   : > { %1593 = vst.msk [vmem:[%s2823_s9 + $0x1c] sm:$0xf] %vm1585_vm4, %v1807_v16  ;;  %1592 = vst.msk [vmem:[%s2823_s9 + $0x18] sm:$0xf] %vm1585_vm4, %v1806_v60  ;;  %v1514_v4 = vmul.f32 %v1473_v38, %v1386_v43  ;;  %v1513_v27 = vmul.f32 %v1468_v15, %v1385_v39 }
 0x365   : > { %v1809_v30 = vpack.c.bf16 %v1514_v4, %v1514_v4  ;;  %v1808_v32 = vpack.c.bf16 %v1513_v27, %v1513_v27 }
 0x366   : > { %v1483_v33 = vpop.permute.xlu0 %1482  ;;  %v1478_v8 = vpop.permute.xlu1 %1477 }
 0x367   : > { %1595 = vst.msk [vmem:[%s2823_s9 + $0x24] sm:$0xf] %vm1585_vm4, %v1809_v30  ;;  %1594 = vst.msk [vmem:[%s2823_s9 + $0x20] sm:$0xf] %vm1585_vm4, %v1808_v32  ;;  %v1516_v11 = vmul.f32 %v1483_v33, %v1388_v22  ;;  %v1515_v50 = vmul.f32 %v1478_v8, %v1387_v48 }
 0x369   : > { %v1811_v26 = vpack.c.bf16 %v1516_v11, %v1516_v11  ;;  %v1810_v1 = vpack.c.bf16 %v1515_v50, %v1515_v50 }
 0x36a   : > { %v1493_v54 = vpop.permute.xlu0 %1492  ;;  %v1488_v6 = vpop.permute.xlu1 %1487 }
 0x36b   : > { %1597 = vst.msk [vmem:[%s2823_s9 + $0x2c] sm:$0xf] %vm1585_vm4, %v1811_v26  ;;  %1596 = vst.msk [vmem:[%s2823_s9 + $0x28] sm:$0xf] %vm1585_vm4, %v1810_v1  ;;  %v1518_v62 = vmul.f32 %v1493_v54, %v1390_v44  ;;  %v1517_v31 = vmul.f32 %v1488_v6, %v1389_v2 }
 0x36d   : > { %v1813_v58 = vpack.c.bf16 %v1518_v62, %v1518_v62  ;;  %v1812_v5 = vpack.c.bf16 %v1517_v31, %v1517_v31 }
 0x36e   : > { %v1503_v45 = vpop.permute.xlu0 %1502  ;;  %v1498_v56 = vpop.permute.xlu1 %1497 }
 0x36f   : > { %1599 = vst.msk [vmem:[%s2823_s9 + $0x34] sm:$0xf] %vm1585_vm4, %v1813_v58  ;;  %1598 = vst.msk [vmem:[%s2823_s9 + $0x30] sm:$0xf] %vm1585_vm4, %v1812_v5  ;;  %v1520_v34 = vmul.f32 %v1503_v45, %v1392_v21  ;;  %v1519_v37 = vmul.f32 %v1498_v56, %v1391_v24 }
 0x371   : > { %v1815_v7 = vpack.c.bf16 %v1520_v34, %v1520_v34  ;;  %v1814_v25 = vpack.c.bf16 %v1519_v37, %v1519_v37 }
 0x373   : > { %1601 = vst.msk [vmem:[%s2823_s9 + $0x3c] sm:$0xf] %vm1585_vm4, %v1815_v7  ;;  %1600 = vst.msk [vmem:[%s2823_s9 + $0x38] sm:$0xf] %vm1585_vm4, %v1814_v25 }
 0x374 PF: > { %s13_s16 = sadd.s32 1, %s2131_s16   ;;  %s2934_s12 = smov %s2123_s14 }
 0x375   : > { %p10_p7 = scmp.ge.s32.totalorder %s13_s16, 6   ;;  %s2935_s13 = smov %s2127_s15 }
 0x376   : > { %s2936_s14 = smov %s2939_s17  ;;  %s2937_s15 = smov %s2943_s18 }
 0x377   :  { %12 = sbr.rel (!%p10_p7) target bundleno = 3 (0x3), region = 76 }

// kernel: tile.23
= control target key start
LH: loop header
LB: loop body
LE: loop exit
PB: predicated region body
PF: predicated region fallthrough
CT: control target
= control target key end

     0   :  { %s22_s0 = inlined_call_operand.vmem [shape: f32[8], index: 0, kind: input, shape index: {}]   ;;  %s23_s1 = inlined_call_operand.vmem [shape: f32[4,8], index: 1, kind: output, shape index: {}]  }
   0x1   :  { %v4_v0 = vld [vmem:[%s22_s0] ss:$0 sm:$0xff] }
   0x2   :  { %5 = vst [vmem:[%s23_s1] sm:$0xf] %v4_v0 }

// kernel: tile.0
= control target key start
LH: loop header
LB: loop body
LE: loop exit
PB: predicated region body
PF: predicated region fallthrough
CT: control target
= control target key end

     0   :  { %s67_s8 = smov 125   ;;  %vm8_vm0 = vcmask 7168   ;;  %s68_s11 = smov 126   ;;  %s118_s0 = inlined_call_operand.vmem [shape: f32[4,8], index: 0, kind: input, shape index: {}]   ;;  %s119_s1 = inlined_call_operand.vmem [shape: f32[32,1], index: 1, kind: output, shape index: {}]  }
   0x1   :  { %v5_v0 = vld [vmem:[%s118_s0] sm:$0xf]  ;;  %s66_s0 = smov 127   ;;  %s69_s12 = smov 124  }
   0x2   :  { %6 = vst [vmem:[#allocation0] sm:$0xf] %v5_v0  ;;  %s70_s13 = smov 123   ;;  %s71_s14 = smov 122  }
   0x3   :  { %s72_s15 = smov 121  }
   0x9   :  { %v10_v1 = vld [vmem:[#allocation0] sm:$0xf]  }
   0xa   :  { %v22_v2 = vld [vmem:[#allocation0] sm:$0xf]   ;;  %11 = vrot.lane.b32.xlu0 %v10_v1, %s66_s0 }
   0xb   :  { %23 = vrot.lane.b32.xlu1 %v22_v2, %s67_s8  ;;  %v16_v3 = vld [vmem:[#allocation0] sm:$0xf]  }
   0xc   :  { %v28_v4 = vld [vmem:[#allocation0] sm:$0xf]  }
   0xd   :  { %v7_v5 = vld [vmem:[#allocation0] sm:$0xf]  }
   0xe   :  { %9 = vst.msk [vmem:[%s119_s1] ss:$8 sm:$0xf] %vm8_vm0, %v7_v5   ;;  %17 = vrot.lane.b32.xlu0 %v16_v3, %s68_s11  ;;  %v34_v6 = vld [vmem:[#allocation0] sm:$0xf]  }
   0xf   :  { %29 = vrot.lane.b32.xlu1 %v28_v4, %s69_s12  ;;  %v40_v7 = vld [vmem:[#allocation0] sm:$0xf]  }
  0x10   :  { %v46_v8 = vld [vmem:[#allocation0] sm:$0xf]  }
  0x12   :  { %35 = vrot.lane.b32.xlu0 %v34_v6, %s70_s13 }
  0x13   :  { %41 = vrot.lane.b32.xlu1 %v40_v7, %s71_s14 }
  0x16   :  { %47 = vrot.lane.b32.xlu0 %v46_v8, %s72_s15 }
  0x7c   :  { %v12_v9 = vpop.permute.xlu0 %11  }
  0x7d   :  { %v24_v10 = vpop.permute.xlu1 %23   ;;  %52 = vst.msk [vmem:[%s119_s1 + $0x1] ss:$8 sm:$0xf] %vm8_vm0, %v12_v9  }
  0x7e   :  { %54 = vst.msk [vmem:[%s119_s1 + $0x3] ss:$8 sm:$0xf] %vm8_vm0, %v24_v10  }
  0x80   :  { %v18_v11 = vpop.permute.xlu0 %17  }
  0x81   :  { %v30_v12 = vpop.permute.xlu1 %29   ;;  %53 = vst.msk [vmem:[%s119_s1 + $0x2] ss:$8 sm:$0xf] %vm8_vm0, %v18_v11  }
  0x82   :  { %55 = vst.msk [vmem:[%s119_s1 + $0x4] ss:$8 sm:$0xf] %vm8_vm0, %v30_v12  }
  0x84   :  { %v36_v13 = vpop.permute.xlu0 %35  }
  0x85   :  { %v42_v14 = vpop.permute.xlu1 %41   ;;  %56 = vst.msk [vmem:[%s119_s1 + $0x5] ss:$8 sm:$0xf] %vm8_vm0, %v36_v13  }
  0x86   :  { %57 = vst.msk [vmem:[%s119_s1 + $0x6] ss:$8 sm:$0xf] %vm8_vm0, %v42_v14  }
  0x88   :  { %v48_v15 = vpop.permute.xlu0 %47  }
  0x89   :  { %58 = vst.msk [vmem:[%s119_s1 + $0x7] ss:$8 sm:$0xf] %vm8_vm0, %v48_v15  }

// kernel: recurrent_projection.15
= control target key start
LH: loop header
LB: loop body
LE: loop exit
PB: predicated region body
PF: predicated region fallthrough
CT: control target
= control target key end

     0   :  { %s738_s15 = smov 0   ;;  %s740_s16 = smov 0   ;;  %s826_s0 = inlined_call_operand.vmem [shape: bf16[1,32,72], index: 0, kind: input, shape index: {}]   ;;  %s827_s1 = inlined_call_operand.vmem [shape: bf16[2,72,256], index: 1, kind: input, shape index: {}]   ;;  %s828_s2 = inlined_call_operand.vmem [shape: f32[32,1], index: 2, kind: input, shape index: {}]   ;;  %s829_s3 = inlined_call_operand.vmem [shape: f32[32,1], index: 3, kind: input, shape index: {}]   ;;  %s830_s4 = inlined_call_operand.vmem [shape: f32[2,32,256], index: 4, kind: output, shape index: {}]  }
   0x1   :  { %s742_s17 = smov 0  }
   0x2 LB: > { %s33_s18 = sadd.s32 1, %s706_s16  ;;  %p612_p0 = scmp.ge.s32.totalorder %s710_s17, 1  ;;  %s710_s17 = sphi %s742_s17, %s14_s17   ;;  %s706_s16 = sphi %s740_s16, %s832_s16   ;;  %s702_s15 = sphi %s738_s15, %s831_s15  }
   0x3   : > { %p35_p1 = scmp.ge.s32.totalorder %s33_s18, 2  ;;  %p207_p2 = scmp.lt.s32.totalorder %s710_s17, 3 }
   0x5   : > { %s834_s18 = smov (%p35_p1, %s33_s18), 0  ;;  %p208_p3 = pnand %p612_p0, %p207_p2 }
   0x6   : > { %p256_p4 = scmp.lt.s32.totalorder (!%p208_p3), %s702_s15, 1 }
   0x7   : > { %211 = sbr.rel (%p208_p3) target bundleno = 246 (0xf6), region = 36 }
   0xc   : > { %v712_v0 = vmov 0   ;;  %s836_s15 = smov (!%p256_p4, %s702_s15), 1  ;;  %v296_v1 = vld [vmem:[%s828_s2 + $0x10] sm:$0xff]  ;;  %v294_v2 = vld [vmem:[%s828_s2] sm:$0xff]  ;;  %v297_v3 = vld [vmem:[%s828_s2 + $0x18] sm:$0xff]  ;;  %vm380_vm0 = vcmask 1043456  }
   0xd   : > { %419 = vmatprep.mubr.bf16.mxu0 %v712_v0  ;;  %429 = vmatprep.mubr.bf16.mxu1 %v712_v0  ;;  %s644_s23 = smul.u32 72, %s836_s15  ;;  %v295_v4 = vld [vmem:[%s828_s2 + $0x8] sm:$0xff]  ;;  %v448_v11 = vld [vmem:[%s829_s3] sm:$0xff]  ;;  %v451_v14 = vld [vmem:[%s829_s3 + $0x18] sm:$0xff]  ;;  %vm373_vm1 = vcmask 588800   ;;  %s633_s21 = sshll.u32 %s836_s15, 6 }
   0xe   : > { %671 = vset.pattern.permute.xlu1 %v712_v0  ;;  %670 = vset.pattern.permute.xlu0 %v712_v0  ;;  %v449_v9 = vld [vmem:[%s829_s3 + $0x8] sm:$0xff]  ;;  %v450_v15 = vld [vmem:[%s829_s3 + $0x10] sm:$0xff]  ;;  %v686_v21 = vld [vmem:[%s826_s0] sm:$0xff]   ;;  %s807_s24 = scalar_lea.vmem %s830_s4, %s633_s21 }
   0xf   : > { %310 = vperm.xlu1 %671, %v296_v1   ;;  %300 = vperm.xlu0 %670, %v294_v2   ;;  %s774_s30 = scalar_lea.vmem %s827_s1, %s644_s23  ;;  %v687_v22 = vld [vmem:[%s826_s0 + $0x8] sm:$0xff]  }
  0x10   : > { %v293_v5 = vld [vmem:[%s774_s30 + $0x40] sm:$0xff]  ;;  %v674_v8 = vld [vmem:[%s774_s30 + $0x34] ss:$8 sps:$4 sm:$0xff]   ;;  %v676_v12 = vld [vmem:[%s774_s30 + $0x30] ss:$8 sps:$4 sm:$0xff]  }
  0x11   : > { %v627_v6 = vcombine.high %v293_v5, %v293_v5  ;;  %v626_v7 = vcombine.low %v293_v5, %v293_v5  ;;  %v677_v13 = vld [vmem:[%s774_s30 + $0x24] ss:$8 sps:$4 sm:$0xff]   ;;  %v679_v16 = vld [vmem:[%s774_s30 + $0x20] ss:$8 sps:$4 sm:$0xff]   ;;  %v680_v17 = vld [vmem:[%s774_s30 + $0x14] ss:$8 sps:$4 sm:$0xff]  }
  0x12   : > { %v682_v18 = vld [vmem:[%s774_s30 + $0x10] ss:$8 sps:$4 sm:$0xff]   ;;  %v683_v19 = vld [vmem:[%s774_s30 + $0x4] ss:$8 sps:$4 sm:$0xff]   ;;  %v685_v20 = vld [vmem:[%s774_s30] ss:$8 sps:$4 sm:$0xff]  }
  0x13   : > { %315 = vperm.xlu1 %671, %v297_v3   ;;  %305 = vperm.xlu0 %670, %v295_v4   ;;  %v382_v10 = vsel %vm380_vm0, %v626_v7, 0 }
  0x14   : > { %628 = vmatprep.subr.msk.bf16.mxu0 %vm380_vm0, %v627_v6  ;;  %634 = vmatprep.subr.msk.bf16.mxu1 %vm380_vm0, %v627_v6 }
  0x15   : > { %394 = vmatpush1.bf16.msra.mxu0 %v382_v10  ;;  %639 = vmatpush1.bf16.msra.mxu1 %v382_v10 }
  0x16   : > { %395 = vmatprep.subr.bf16.mxu0 %v674_v8  ;;  %635 = vmatprep.subr.bf16.mxu1 %v674_v8 }
  0x17   : > { %459 = vperm.xlu1 %671, %v449_v9   ;;  %454 = vperm.xlu0 %670, %v448_v11  }
  0x19   : > { %396 = vmatpush1.bf16.msra.mxu0 %v676_v12  ;;  %640 = vmatpush1.bf16.msra.mxu1 %v676_v12 }
  0x1a   : > { %397 = vmatprep.subr.bf16.mxu0 %v677_v13  ;;  %636 = vmatprep.subr.bf16.mxu1 %v677_v13 }
  0x1b   : > { %469 = vperm.xlu1 %671, %v451_v14   ;;  %464 = vperm.xlu0 %670, %v450_v15  }
  0x1d   : > { %398 = vmatpush1.bf16.msra.mxu0 %v679_v16  ;;  %641 = vmatpush1.bf16.msra.mxu1 %v679_v16 }
  0x1e   : > { %399 = vmatprep.subr.bf16.mxu0 %v680_v17  ;;  %637 = vmatprep.subr.bf16.mxu1 %v680_v17 }
  0x21   : > { %400 = vmatpush1.bf16.msra.mxu0 %v682_v18  ;;  %642 = vmatpush1.bf16.msra.mxu1 %v682_v18 }
  0x22   : > { %401 = vmatprep.subr.bf16.mxu0 %v683_v19  ;;  %638 = vmatprep.subr.bf16.mxu1 %v683_v19 }
  0x25   : > { %402 = vmatpush1.bf16.msra.mxu0 %v685_v20  ;;  %643 = vmatpush1.bf16.msra.mxu1 %v685_v20 }
  0x28   : > { %629 = vmatmul.mubr.msk.bf16.vlgmr.msra.gmra.mxu0 %vm373_vm1, %v686_v21  ;;  %630 = vmatmul.mubr.msk.bf16.vlgmr.msra.gmra.mxu1 %vm373_vm1, %v687_v22 }
  0x8a   : > { %v301_v23 = vpop.permute.xlu0 %300  ;;  %v311_v24 = vpop.permute.xlu1 %310 }
  0x8e   : > { %v306_v25 = vpop.permute.xlu0 %305  ;;  %v316_v26 = vpop.permute.xlu1 %315 }
  0x92   : > { %v455_v27 = vpop.permute.xlu0 %454  ;;  %v460_v28 = vpop.permute.xlu1 %459 }
  0x96   : > { %v465_v31 = vpop.permute.xlu0 %464  ;;  %v470_v42 = vpop.permute.xlu1 %469 }
  0xe8   : > { %v421_v29 = vpop.f32.mrf.mxu0  ;;  %v431_v30 = vpop.f32.mrf.mxu1 }
  0xe9   : > { %v422_v32 = vadd.f32 %v421_v29, %v301_v23  ;;  %v432_v33 = vadd.f32 %v431_v30, %v311_v24 }
  0xea   : > { %v423_v34 = vpop.f32.mrf.mxu0  ;;  %v433_v35 = vpop.f32.mrf.mxu1 }
  0xeb   : > { %vm440_vm2 = vcmp.gt.f32.partialorder %v422_v32, 0.0  ;;  %v472_v36 = vmul.f32 %v455_v27, %v422_v32  ;;  %vm444_vm3 = vcmp.gt.f32.partialorder %v432_v33, 0.0  ;;  %v476_v37 = vmul.f32 %v465_v31, %v432_v33 }
  0xec   : > { %v424_v38 = vadd.f32 %v423_v34, %v301_v23  ;;  %v434_v39 = vadd.f32 %v433_v35, %v311_v24  ;;  %v425_v40 = vpop.f32.mrf.mxu0  ;;  %v435_v41 = vpop.f32.mrf.mxu1 }
  0xed   : > { %v480_v43 = vsel %vm440_vm2, %v422_v32, %v472_v36  ;;  %v484_v44 = vsel %vm444_vm3, %v432_v33, %v476_v37  ;;  %v426_v45 = vadd.f32 %v425_v40, %v306_v25  ;;  %v436_v46 = vadd.f32 %v435_v41, %v316_v26 }
  0xee   : > { %488 = vst [vmem:[%s807_s24] sm:$0xff] %v480_v43  ;;  %492 = vst [vmem:[%s807_s24 + $0x20] sm:$0xff] %v484_v44  ;;  %vm441_vm4 = vcmp.gt.f32.partialorder %v424_v38, 0.0  ;;  %v473_v47 = vmul.f32 %v455_v27, %v424_v38  ;;  %vm445_vm5 = vcmp.gt.f32.partialorder %v434_v39, 0.0  ;;  %v477_v48 = vmul.f32 %v465_v31, %v434_v39  ;;  %v427_v49 = vpop.f32.mrf.mxu0  ;;  %v437_v50 = vpop.f32.mrf.mxu1 }
  0xef   : > { %vm442_vm6 = vcmp.gt.f32.partialorder %v426_v45, 0.0  ;;  %v474_v51 = vmul.f32 %v460_v28, %v426_v45  ;;  %vm446_vm7 = vcmp.gt.f32.partialorder %v436_v46, 0.0  ;;  %v478_v52 = vmul.f32 %v470_v42, %v436_v46 }
  0xf0   : > { %v481_v53 = vsel %vm441_vm4, %v424_v38, %v473_v47  ;;  %v485_v54 = vsel %vm445_vm5, %v434_v39, %v477_v48  ;;  %v428_v55 = vadd.f32 %v427_v49, %v306_v25  ;;  %v438_v56 = vadd.f32 %v437_v50, %v316_v26 }
  0xf1   : > { %489 = vst [vmem:[%s807_s24 + $0x8] sm:$0xff] %v481_v53  ;;  %493 = vst [vmem:[%s807_s24 + $0x28] sm:$0xff] %v485_v54  ;;  %v482_v57 = vsel %vm442_vm6, %v426_v45, %v474_v51  ;;  %v486_v58 = vsel %vm446_vm7, %v436_v46, %v478_v52 }
  0xf2   : > { %490 = vst [vmem:[%s807_s24 + $0x10] sm:$0xff] %v482_v57  ;;  %494 = vst [vmem:[%s807_s24 + $0x30] sm:$0xff] %v486_v58  ;;  %vm443_vm8 = vcmp.gt.f32.partialorder %v428_v55, 0.0  ;;  %v475_v59 = vmul.f32 %v460_v28, %v428_v55  ;;  %vm447_vm9 = vcmp.gt.f32.partialorder %v438_v56, 0.0  ;;  %v479_v60 = vmul.f32 %v470_v42, %v438_v56 }
  0xf4   : > { %v483_v61 = vsel %vm443_vm8, %v428_v55, %v475_v59  ;;  %v487_v62 = vsel %vm447_vm9, %v438_v56, %v479_v60 }
  0xf5   : > { %491 = vst [vmem:[%s807_s24 + $0x18] sm:$0xff] %v483_v61  ;;  %495 = vst [vmem:[%s807_s24 + $0x38] sm:$0xff] %v487_v62 }
  0xf6 PF: > { %s14_s17 = sadd.s32 1, %s710_s17   ;;  %s831_s15 = smov %s706_s16 }
  0xf7   : > { %p11_p5 = scmp.ge.s32.totalorder %s14_s17, 4   ;;  %s832_s16 = smov %s834_s18 }
  0xf9   :  { %13 = sbr.rel (!%p11_p5) target bundleno = 2 (0x2), region = 69 }

// kernel: recurrent_projection.20
= control target key start
LH: loop header
LB: loop body
LE: loop exit
PB: predicated region body
PF: predicated region fallthrough
CT: control target
= control target key end

     0   :  { %s886_s15 = smov 0   ;;  %s888_s16 = smov 0   ;;  %s1045_s0 = inlined_call_operand.vmem [shape: bf16[1,8,72], index: 0, kind: input, shape index: {}]   ;;  %s1046_s1 = inlined_call_operand.vmem [shape: bf16[2,72,1024], index: 1, kind: input, shape index: {}]   ;;  %s1047_s2 = inlined_call_operand.vmem [shape: f32[8,1], index: 2, kind: input, shape index: {}]   ;;  %s1048_s3 = inlined_call_operand.vmem [shape: f32[8,1], index: 3, kind: input, shape index: {}]   ;;  %s1049_s4 = inlined_call_operand.vmem [shape: bf16[2,8,1024], index: 4, kind: output, shape index: {}]  }
   0x1   :  { %s890_s17 = smov 0   ;;  %s892_s18 = smov 0  }
   0x2   :  { %s894_s19 = smov 0   ;;  %s896_s20 = smov 0  }
   0x3   :  { %s898_s21 = smov 0  }
   0x4 LB: > { %s29_s22 = sadd.s32 1, %s850_s19  ;;  %s33_s23 = sadd.s32 1, %s854_s20  ;;  %s858_s21 = sphi %s898_s21, %s14_s21   ;;  %s854_s20 = sphi %s896_s20, %s1055_s20   ;;  %s850_s19 = sphi %s894_s19, %s1054_s19   ;;  %s846_s18 = sphi %s892_s18, %s1053_s18   ;;  %s842_s17 = sphi %s890_s17, %s1052_s17   ;;  %s838_s16 = sphi %s888_s16, %s1051_s16   ;;  %s834_s15 = sphi %s886_s15, %s1050_s15  }
   0x5   : > { %p31_p0 = scmp.ge.s32.totalorder %s29_s22, 2  ;;  %p77_p1 = scmp.ne.s32.totalorder %s838_s16, %s834_s15 }
   0x6   : > { %p78_p2 = scmp.eq.s32.totalorder %s858_s21, 0  ;;  %s70_s27 = sadd.s32 1, %s838_s16 }
   0x7   : > { %s1057_s22 = smov (%p31_p0, %s29_s22), 0  ;;  %s1059_s23 = smov (!%p31_p0, %s33_s23), %s854_s20 }
   0x8   : > { %p79_p3 = por %p78_p2, %p77_p1  ;;  %p35_p4 = scmp.ge.s32.totalorder %s1059_s23, 2 }
   0x9   : > { %s66_s24 = ssub.s32 %s850_s19, %s1057_s22  ;;  %p678_p6 = scmp.ge.s32.totalorder %s858_s21, 4 }
   0xa   : > { %s1061_s23 = smov (%p35_p4, %s1059_s23), 0 }
   0xb   : > { %s63_s25 = ssub.s32 %s854_s20, %s1061_s23  ;;  %186 = sbr.rel (%p678_p6) target bundleno = 33 (0x21), region = 28 }
   0xc   : > { %s67_s26 = sor.u32 %s66_s24, %s63_s25 }
   0xd   : > { %p68_p5 = scmp.eq.s32.totalorder %s67_s26, 0 }
   0xf   : > { %s937_s28 = scalar_select %p68_p5, %s838_s16, %s70_s27  }
  0x10   : > { %189 = sbr.rel (!%p79_p3) target bundleno = 33 (0x21), region = 32  ;;  %s191_s29 = sand.u32 (%p79_p3), 1, %s838_s16  }
  0x11   : > { %s715_s30 = smul.u32 (%p79_p3), 144, %s191_s29  ;;  %s679_s5 = sshll.u32 (%p79_p3), %s850_s19, 2 }
  0x12   : > { %s716_s6 = smul.u32 (%p79_p3), 72, %s854_s20 }
  0x13   : > { %s951_s12 = scalar_lea.vmem (%p79_p3), [#allocation2], %s715_s30 }
  0x14   : > { %s199_s7 = sadd.s32 (%p79_p3), %s716_s6, %s679_s5 }
  0x15   : > { %s680_s8 = sshll.u32 %s199_s7, 2 }
  0x16   : > { %s946_s11 = scalar_lea.vmem %s1046_s1, %s680_s8 }
  0x17   : > { %v214_v0 = vld [vmem:[%s946_s11] sm:$0xff]  ;;  %v216_v1 = vld [vmem:[%s946_s11 + $0x8] sm:$0xff] }
  0x18   : > { %v218_v2 = vld [vmem:[%s946_s11 + $0x20] sm:$0xff]  ;;  %215 = vst [vmem:[%s951_s12] sm:$0xff] %v214_v0  ;;  %217 = vst [vmem:[%s951_s12 + $0x8] sm:$0xff] %v216_v1  ;;  %v220_v3 = vld [vmem:[%s946_s11 + $0x28] sm:$0xff] }
  0x19   : > { %219 = vst [vmem:[%s951_s12 + $0x10] sm:$0xff] %v218_v2  ;;  %v222_v4 = vld [vmem:[%s946_s11 + $0x40] sm:$0xff]  ;;  %v224_v5 = vld [vmem:[%s946_s11 + $0x48] sm:$0xff]  ;;  %221 = vst [vmem:[%s951_s12 + $0x18] sm:$0xff] %v220_v3 }
  0x1a   : > { %223 = vst [vmem:[%s951_s12 + $0x20] sm:$0xff] %v222_v4  ;;  %225 = vst [vmem:[%s951_s12 + $0x28] sm:$0xff] %v224_v5  ;;  %v226_v6 = vld [vmem:[%s946_s11 + $0x60] sm:$0xff]  ;;  %v228_v7 = vld [vmem:[%s946_s11 + $0x68] sm:$0xff] }
  0x1b   : > { %v230_v8 = vld [vmem:[%s946_s11 + $0x80] sm:$0xff]  ;;  %227 = vst [vmem:[%s951_s12 + $0x30] sm:$0xff] %v226_v6  ;;  %229 = vst [vmem:[%s951_s12 + $0x38] sm:$0xff] %v228_v7  ;;  %v232_v9 = vld [vmem:[%s946_s11 + $0x88] sm:$0xff] }
  0x1c   : > { %231 = vst [vmem:[%s951_s12 + $0x40] sm:$0xff] %v230_v8  ;;  %v234_v10 = vld [vmem:[%s946_s11 + $0xa0] sm:$0xff]  ;;  %v236_v11 = vld [vmem:[%s946_s11 + $0xa8] sm:$0xff]  ;;  %233 = vst [vmem:[%s951_s12 + $0x48] sm:$0xff] %v232_v9 }
  0x1d   : > { %235 = vst [vmem:[%s951_s12 + $0x50] sm:$0xff] %v234_v10  ;;  %237 = vst [vmem:[%s951_s12 + $0x58] sm:$0xff] %v236_v11  ;;  %v238_v12 = vld [vmem:[%s946_s11 + $0xc0] sm:$0xff]  ;;  %v240_v13 = vld [vmem:[%s946_s11 + $0xc8] sm:$0xff] }
  0x1e   : > { %v242_v14 = vld [vmem:[%s946_s11 + $0xe0] sm:$0xff]  ;;  %239 = vst [vmem:[%s951_s12 + $0x60] sm:$0xff] %v238_v12  ;;  %241 = vst [vmem:[%s951_s12 + $0x68] sm:$0xff] %v240_v13  ;;  %v244_v15 = vld [vmem:[%s946_s11 + $0xe8] sm:$0xff] }
  0x1f   : > { %243 = vst [vmem:[%s951_s12 + $0x70] sm:$0xff] %v242_v14  ;;  %v246_v16 = vld [vmem:[%s946_s11 + $0x100] sm:$0xff]  ;;  %v248_v17 = vld [vmem:[%s946_s11 + $0x108] sm:$0xff]  ;;  %245 = vst [vmem:[%s951_s12 + $0x78] sm:$0xff] %v244_v15 }
  0x20   : > { %247 = vst [vmem:[%s951_s12 + $0x80] sm:$0xff] %v246_v16  ;;  %249 = vst [vmem:[%s951_s12 + $0x88] sm:$0xff] %v248_v17 }
  0x21 PF: > { %p681_p7 = scmp.ge.s32.totalorder %s858_s21, 1  ;;  %p254_p8 = scmp.lt.s32.totalorder %s858_s21, 5 }
  0x23   : > { %p255_p9 = pnand %p681_p7, %p254_p8 }
  0x24   : > { %s261_s13 = sand.u32 (!%p255_p9), 1, %s834_s15   ;;  %s682_s5 = sshll.u32 (!%p255_p9), %s842_s17, 2 }
  0x25   : > { %258 = sbr.rel (%p255_p9) target bundleno = 269 (0x10d), region = 55  ;;  %p301_p10 = scmp.lt.s32.totalorder (!%p255_p9), %s846_s18, 1 }
  0x26   : > { %s717_s14 = smul.u32 (!%p255_p9), 144, %s261_s13  ;;  %p303_p11 = scmp.lt.s32.totalorder (!%p255_p9), %s682_s5, 7 }
  0x28   : > { %s992_s26 = scalar_lea.vmem (!%p255_p9), [#allocation2], %s717_s14 }
  0x2a   : > { %v860_v18 = vmov 0   ;;  %v330_v19 = vld [vmem:[%s1047_s2] sm:$0xff]  ;;  %vm430_vm0 = vcmask 1043456   ;;  %v329_v21 = vld [vmem:[%s992_s26 + $0x88] sm:$0xff]  ;;  %vm426_vm1 = vcmask 588800   ;;  %s1063_s18 = smov (!%p301_p10, %s846_s18), 1 }
  0x2b   : > { %475 = vmatprep.mubr.bf16.mxu0 %v860_v18  ;;  %516 = vmatprep.mubr.bf16.mxu1 %v860_v18  ;;  %v328_v20 = vld [vmem:[%s992_s26 + $0x80] sm:$0xff]  ;;  %v704_v23 = vcombine.high %v329_v21, %v329_v21  ;;  %v703_v25 = vcombine.low %v329_v21, %v329_v21  ;;  %v782_v27 = vld [vmem:[%s992_s26 + $0x6c] ss:$16 sps:$4 sm:$0xff]   ;;  %v785_v32 = vld [vmem:[%s992_s26 + $0x68] ss:$16 sps:$4 sm:$0xff]   ;;  %s1065_s5 = smov (!%p303_p11, %s682_s5), 7 }
  0x2c   : > { %775 = vset.pattern.permute.xlu0 %v860_v18  ;;  %v702_v22 = vcombine.high %v328_v20, %v328_v20  ;;  %v701_v24 = vcombine.low %v328_v20, %v328_v20  ;;  %v780_v26 = vld [vmem:[%s992_s26 + $0x64] ss:$16 sps:$4 sm:$0xff]   ;;  %v784_v31 = vld [vmem:[%s992_s26 + $0x60] ss:$16 sps:$4 sm:$0xff]   ;;  %v788_v34 = vld [vmem:[%s992_s26 + $0x4c] ss:$16 sps:$4 sm:$0xff]  }
  0x2d   : > { %333 = vperm.xlu0 %775, %v330_v19   ;;  %v529_v28 = vld [vmem:[%s1048_s3] sm:$0xff]  ;;  %707 = vmatprep.subr.msk.bf16.mxu1 %vm430_vm0, %v704_v23  ;;  %v438_v30 = vsel %vm430_vm0, %v703_v25, 0  ;;  %v791_v36 = vld [vmem:[%s992_s26 + $0x48] ss:$16 sps:$4 sm:$0xff]   ;;  %v794_v38 = vld [vmem:[%s992_s26 + $0x2c] ss:$16 sps:$4 sm:$0xff]  }
  0x2e   : > { %705 = vmatprep.subr.msk.bf16.mxu0 %vm430_vm0, %v702_v22  ;;  %v432_v29 = vsel %vm430_vm0, %v701_v24, 0  ;;  %491 = vmatpush1.bf16.msra.mxu1 %v438_v30  ;;  %v786_v33 = vld [vmem:[%s992_s26 + $0x44] ss:$16 sps:$4 sm:$0xff]   ;;  %v790_v35 = vld [vmem:[%s992_s26 + $0x40] ss:$16 sps:$4 sm:$0xff]   ;;  %s683_s6 = sshll.u32 %s1063_s18, 3 }
  0x2f   : > { %450 = vmatpush1.bf16.msra.mxu0 %v432_v29  ;;  %492 = vmatprep.subr.bf16.mxu1 %v782_v27  ;;  %v792_v37 = vld [vmem:[%s992_s26 + $0x24] ss:$16 sps:$4 sm:$0xff]   ;;  %v796_v39 = vld [vmem:[%s992_s26 + $0x20] ss:$16 sps:$4 sm:$0xff]   ;;  %v797_v40 = vld [vmem:[%s992_s26 + $0x28] ss:$16 sps:$4 sm:$0xff]   ;;  %s306_s7 = sadd.s32 %s683_s6, %s1065_s5 }
  0x30   : > { %451 = vmatprep.subr.bf16.mxu0 %v780_v26  ;;  %v798_v41 = vld [vmem:[%s992_s26 + $0x4] ss:$16 sps:$4 sm:$0xff]   ;;  %v800_v42 = vld [vmem:[%s992_s26 + $0xc] ss:$16 sps:$4 sm:$0xff]   ;;  %v802_v43 = vld [vmem:[%s992_s26] ss:$16 sps:$4 sm:$0xff]  }
  0x31   : > { %532 = vperm.xlu0 %775, %v529_v28   ;;  %v803_v44 = vld [vmem:[%s992_s26 + $0x8] ss:$16 sps:$4 sm:$0xff]   ;;  %v311_v45 = vld [vmem:[%s1045_s0] sm:$0xf]  ;;  %s684_s17 = sshll.u32 %s306_s7, 2 }
  0x32   : > { %493 = vmatpush1.bf16.msra.mxu1 %v785_v32  ;;  %s308_s9 = scalar_lea.vmem %s1049_s4, %s684_s17 }
  0x33   : > { %452 = vmatpush1.bf16.msra.mxu0 %v784_v31  ;;  %494 = vmatprep.subr.bf16.mxu1 %v788_v34 }
  0x34   : > { %453 = vmatprep.subr.bf16.mxu0 %v786_v33 }
  0x36   : > { %495 = vmatpush1.bf16.msra.mxu1 %v791_v36 }
  0x37   : > { %454 = vmatpush1.bf16.msra.mxu0 %v790_v35  ;;  %496 = vmatprep.subr.bf16.mxu1 %v794_v38 }
  0x38   : > { %455 = vmatprep.subr.bf16.mxu0 %v792_v37 }
  0x3a   : > { %497 = vmatpush1.bf16.msra.mxu1 %v797_v40 }
  0x3b   : > { %456 = vmatpush1.bf16.msra.mxu0 %v796_v39  ;;  %498 = vmatprep.subr.bf16.mxu1 %v800_v42 }
  0x3c   : > { %457 = vmatprep.subr.bf16.mxu0 %v798_v41 }
  0x3e   : > { %499 = vmatpush1.bf16.msra.mxu1 %v803_v44 }
  0x3f   : > { %458 = vmatpush1.bf16.msra.mxu0 %v802_v43 }
  0x41   : > { %708 = vmatmul.mubr.msk.bf16.vlgmr.msra.gmra.mxu1 %vm426_vm1, %v311_v45 }
  0x42   : > { %706 = vmatmul.mubr.msk.bf16.vlgmr.msra.gmra.mxu0 %vm426_vm1, %v311_v45 }
  0xa8   : > { %v334_v46 = vpop.permute.xlu0 %333 }
  0xac   : > { %v533_v53 = vpop.permute.xlu0 %532 }
 0x101   : > { %v518_v48 = vpop.f32.mrf.mxu1 }
 0x102   : > { %v477_v47 = vpop.f32.mrf.mxu0  ;;  %v519_v50 = vadd.f32 %v518_v48, %v334_v46 }
 0x103   : > { %v478_v49 = vadd.f32 %v477_v47, %v334_v46  ;;  %v520_v52 = vpop.f32.mrf.mxu1 }
 0x104   : > { %v479_v51 = vpop.f32.mrf.mxu0  ;;  %v537_v55 = vmul.f32 %v533_v53, %v519_v50  ;;  %v521_v57 = vadd.f32 %v520_v52, %v334_v46  ;;  %vm527_vm3 = vcmp.gt.f32.partialorder %v519_v50, 0.0 }
 0x105   : > { %v535_v54 = vmul.f32 %v533_v53, %v478_v49  ;;  %v480_v56 = vadd.f32 %v479_v51, %v334_v46  ;;  %v522_v59 = vpop.f32.mrf.mxu1  ;;  %vm525_vm2 = vcmp.gt.f32.partialorder %v478_v49, 0.0 }
 0x106   : > { %v481_v58 = vpop.f32.mrf.mxu0  ;;  %vm528_vm5 = vcmp.gt.f32.partialorder %v521_v57, 0.0  ;;  %v538_v61 = vmul.f32 %v533_v53, %v521_v57  ;;  %v541_v1 = vsel %vm527_vm3, %v519_v50, %v537_v55 }
 0x107   : > { %vm526_vm4 = vcmp.gt.f32.partialorder %v480_v56, 0.0  ;;  %v536_v60 = vmul.f32 %v533_v53, %v480_v56  ;;  %v523_v63 = vpop.f32.mrf.mxu1  ;;  %v539_v0 = vsel %vm525_vm2, %v478_v49, %v535_v54 }
 0x108   : > { %v482_v62 = vpop.f32.mrf.mxu0  ;;  %v542_v3 = vsel %vm528_vm5, %v521_v57, %v538_v61 }
 0x109   : > { %v540_v2 = vsel %vm526_vm4, %v480_v56, %v536_v60  ;;  %v714_v5 = vpack.c.bf16 %v542_v3, %v541_v1 }
 0x10a   : > { %v713_v4 = vpack.c.bf16 %v540_v2, %v539_v0 }
 0x10b   : > { %560 = vst [vmem:[%s308_s9 + $0x8] sm:$0xff] %v714_v5 }
 0x10c   : > { %559 = vst [vmem:[%s308_s9] sm:$0xff] %v713_v4 }
 0x10d PF: > { %s14_s21 = sadd.s32 1, %s858_s21   ;;  %s1050_s15 = smov %s838_s16 }
 0x10e   : > { %p11_p12 = scmp.ge.s32.totalorder %s14_s21, 6   ;;  %s1051_s16 = smov %s937_s28 }
 0x10f   : > { %s1052_s17 = smov %s850_s19  ;;  %s1053_s18 = smov %s854_s20 }
 0x110   : > { %s1054_s19 = smov %s1057_s22  ;;  %s1055_s20 = smov %s1061_s23 }
 0x111   :  { %13 = sbr.rel (!%p11_p12) target bundleno = 4 (0x4), region = 97 }

// kernel: recurrent_projection.21
= control target key start
LH: loop header
LB: loop body
LE: loop exit
PB: predicated region body
PF: predicated region fallthrough
CT: control target
= control target key end

     0   :  { %s850_s15 = smov 0   ;;  %s852_s16 = smov 0   ;;  %s1006_s0 = inlined_call_operand.vmem [shape: bf16[1,8,72], index: 0, kind: input, shape index: {}]   ;;  %s1007_s1 = inlined_call_operand.vmem [shape: bf16[2,72,1024], index: 1, kind: input, shape index: {}]   ;;  %s1008_s2 = inlined_call_operand.vmem [shape: f32[8,1], index: 2, kind: input, shape index: {}]   ;;  %s1009_s3 = inlined_call_operand.vmem [shape: f32[8,1], index: 3, kind: input, shape index: {}]   ;;  %s1010_s4 = inlined_call_operand.vmem [shape: f32[2,8,1024], index: 4, kind: output, shape index: {}]  }
   0x1   :  { %s854_s17 = smov 0   ;;  %s856_s18 = smov 0  }
   0x2   :  { %s858_s19 = smov 0   ;;  %s860_s20 = smov 0  }
   0x3   :  { %s862_s21 = smov 0  }
   0x4 LB: > { %s29_s3 = sadd.s32 1, %s814_s19  ;;  %s33_s22 = sadd.s32 1, %s818_s20  ;;  %s822_s21 = sphi %s862_s21, %s14_s21   ;;  %s818_s20 = sphi %s860_s20, %s1016_s20   ;;  %s814_s19 = sphi %s858_s19, %s1015_s19   ;;  %s810_s18 = sphi %s856_s18, %s1014_s18   ;;  %s806_s17 = sphi %s854_s17, %s1013_s17   ;;  %s802_s16 = sphi %s852_s16, %s1012_s16   ;;  %s798_s15 = sphi %s850_s15, %s1011_s15  }
   0x5   : > { %p31_p0 = scmp.ge.s32.totalorder %s29_s3, 2  ;;  %p77_p1 = scmp.ne.s32.totalorder %s802_s16, %s798_s15 }
   0x6   : > { %p78_p2 = scmp.eq.s32.totalorder %s822_s21, 0  ;;  %s70_s26 = sadd.s32 1, %s802_s16 }
   0x7   : > { %s1018_s3 = smov (%p31_p0, %s29_s3), 0  ;;  %s1020_s22 = smov (!%p31_p0, %s33_s22), %s818_s20 }
   0x8   : > { %p79_p3 = por %p78_p2, %p77_p1  ;;  %p35_p4 = scmp.ge.s32.totalorder %s1020_s22, 2 }
   0x9   : > { %s66_s23 = ssub.s32 %s814_s19, %s1018_s3  ;;  %p646_p6 = scmp.ge.s32.totalorder %s822_s21, 4 }
   0xa   : > { %s1022_s22 = smov (%p35_p4, %s1020_s22), 0 }
   0xb   : > { %s63_s24 = ssub.s32 %s818_s20, %s1022_s22  ;;  %186 = sbr.rel (%p646_p6) target bundleno = 33 (0x21), region = 28 }
   0xc   : > { %s67_s25 = sor.u32 %s66_s23, %s63_s24 }
   0xd   : > { %p68_p5 = scmp.eq.s32.totalorder %s67_s25, 0 }
   0xf   : > { %s901_s27 = scalar_select %p68_p5, %s802_s16, %s70_s26  }
  0x10   : > { %189 = sbr.rel (!%p79_p3) target bundleno = 33 (0x21), region = 32  ;;  %s191_s28 = sand.u32 (%p79_p3), 1, %s802_s16  }
  0x11   : > { %s679_s29 = smul.u32 (%p79_p3), 144, %s191_s28  ;;  %s647_s30 = sshll.u32 (%p79_p3), %s814_s19, 2 }
  0x12   : > { %s680_s5 = smul.u32 (%p79_p3), 72, %s818_s20 }
  0x13   : > { %s915_s11 = scalar_lea.vmem (%p79_p3), [#allocation2], %s679_s29 }
  0x14   : > { %s199_s6 = sadd.s32 (%p79_p3), %s680_s5, %s647_s30 }
  0x15   : > { %s648_s7 = sshll.u32 %s199_s6, 2 }
  0x16   : > { %s910_s10 = scalar_lea.vmem %s1007_s1, %s648_s7 }
  0x17   : > { %v214_v0 = vld [vmem:[%s910_s10] sm:$0xff]  ;;  %v216_v1 = vld [vmem:[%s910_s10 + $0x8] sm:$0xff] }
  0x18   : > { %v218_v2 = vld [vmem:[%s910_s10 + $0x20] sm:$0xff]  ;;  %215 = vst [vmem:[%s915_s11] sm:$0xff] %v214_v0  ;;  %217 = vst [vmem:[%s915_s11 + $0x8] sm:$0xff] %v216_v1  ;;  %v220_v3 = vld [vmem:[%s910_s10 + $0x28] sm:$0xff] }
  0x19   : > { %219 = vst [vmem:[%s915_s11 + $0x10] sm:$0xff] %v218_v2  ;;  %v222_v4 = vld [vmem:[%s910_s10 + $0x40] sm:$0xff]  ;;  %v224_v5 = vld [vmem:[%s910_s10 + $0x48] sm:$0xff]  ;;  %221 = vst [vmem:[%s915_s11 + $0x18] sm:$0xff] %v220_v3 }
  0x1a   : > { %223 = vst [vmem:[%s915_s11 + $0x20] sm:$0xff] %v222_v4  ;;  %225 = vst [vmem:[%s915_s11 + $0x28] sm:$0xff] %v224_v5  ;;  %v226_v6 = vld [vmem:[%s910_s10 + $0x60] sm:$0xff]  ;;  %v228_v7 = vld [vmem:[%s910_s10 + $0x68] sm:$0xff] }
  0x1b   : > { %v230_v8 = vld [vmem:[%s910_s10 + $0x80] sm:$0xff]  ;;  %227 = vst [vmem:[%s915_s11 + $0x30] sm:$0xff] %v226_v6  ;;  %229 = vst [vmem:[%s915_s11 + $0x38] sm:$0xff] %v228_v7  ;;  %v232_v9 = vld [vmem:[%s910_s10 + $0x88] sm:$0xff] }
  0x1c   : > { %231 = vst [vmem:[%s915_s11 + $0x40] sm:$0xff] %v230_v8  ;;  %v234_v10 = vld [vmem:[%s910_s10 + $0xa0] sm:$0xff]  ;;  %v236_v11 = vld [vmem:[%s910_s10 + $0xa8] sm:$0xff]  ;;  %233 = vst [vmem:[%s915_s11 + $0x48] sm:$0xff] %v232_v9 }
  0x1d   : > { %235 = vst [vmem:[%s915_s11 + $0x50] sm:$0xff] %v234_v10  ;;  %237 = vst [vmem:[%s915_s11 + $0x58] sm:$0xff] %v236_v11  ;;  %v238_v12 = vld [vmem:[%s910_s10 + $0xc0] sm:$0xff]  ;;  %v240_v13 = vld [vmem:[%s910_s10 + $0xc8] sm:$0xff] }
  0x1e   : > { %v242_v14 = vld [vmem:[%s910_s10 + $0xe0] sm:$0xff]  ;;  %239 = vst [vmem:[%s915_s11 + $0x60] sm:$0xff] %v238_v12  ;;  %241 = vst [vmem:[%s915_s11 + $0x68] sm:$0xff] %v240_v13  ;;  %v244_v15 = vld [vmem:[%s910_s10 + $0xe8] sm:$0xff] }
  0x1f   : > { %243 = vst [vmem:[%s915_s11 + $0x70] sm:$0xff] %v242_v14  ;;  %v246_v16 = vld [vmem:[%s910_s10 + $0x100] sm:$0xff]  ;;  %v248_v17 = vld [vmem:[%s910_s10 + $0x108] sm:$0xff]  ;;  %245 = vst [vmem:[%s915_s11 + $0x78] sm:$0xff] %v244_v15 }
  0x20   : > { %247 = vst [vmem:[%s915_s11 + $0x80] sm:$0xff] %v246_v16  ;;  %249 = vst [vmem:[%s915_s11 + $0x88] sm:$0xff] %v248_v17 }
  0x21 PF: > { %p649_p7 = scmp.ge.s32.totalorder %s822_s21, 1  ;;  %p254_p8 = scmp.lt.s32.totalorder %s822_s21, 5 }
  0x23   : > { %p255_p9 = pnand %p649_p7, %p254_p8 }
  0x24   : > { %s261_s12 = sand.u32 (!%p255_p9), 1, %s798_s15   ;;  %s650_s26 = sshll.u32 (!%p255_p9), %s806_s17, 2 }
  0x25   : > { %258 = sbr.rel (%p255_p9) target bundleno = 265 (0x109), region = 55  ;;  %p301_p10 = scmp.lt.s32.totalorder (!%p255_p9), %s810_s18, 1 }
  0x26   : > { %s681_s13 = smul.u32 (!%p255_p9), 144, %s261_s12  ;;  %p303_p11 = scmp.lt.s32.totalorder (!%p255_p9), %s650_s26, 7 }
  0x28   : > { %s956_s24 = scalar_lea.vmem (!%p255_p9), [#allocation2], %s681_s13 }
  0x2a   : > { %v824_v18 = vmov 0   ;;  %v330_v19 = vld [vmem:[%s1008_s2] sm:$0xff]  ;;  %vm430_vm0 = vcmask 1043456   ;;  %v329_v21 = vld [vmem:[%s956_s24 + $0x88] sm:$0xff]  ;;  %vm426_vm1 = vcmask 588800   ;;  %s1024_s18 = smov (!%p301_p10, %s810_s18), 1 }
  0x2b   : > { %475 = vmatprep.mubr.bf16.mxu0 %v824_v18  ;;  %516 = vmatprep.mubr.bf16.mxu1 %v824_v18  ;;  %v328_v20 = vld [vmem:[%s956_s24 + $0x80] sm:$0xff]  ;;  %v672_v23 = vcombine.high %v329_v21, %v329_v21  ;;  %v671_v25 = vcombine.low %v329_v21, %v329_v21  ;;  %v746_v27 = vld [vmem:[%s956_s24 + $0x6c] ss:$16 sps:$4 sm:$0xff]   ;;  %v749_v31 = vld [vmem:[%s956_s24 + $0x68] ss:$16 sps:$4 sm:$0xff]   ;;  %s1026_s26 = smov (!%p303_p11, %s650_s26), 7 }
  0x2c   : > { %739 = vset.pattern.permute.xlu0 %v824_v18  ;;  %v670_v22 = vcombine.high %v328_v20, %v328_v20  ;;  %v669_v24 = vcombine.low %v328_v20, %v328_v20  ;;  %v744_v26 = vld [vmem:[%s956_s24 + $0x64] ss:$16 sps:$4 sm:$0xff]   ;;  %v748_v30 = vld [vmem:[%s956_s24 + $0x60] ss:$16 sps:$4 sm:$0xff]   ;;  %v752_v33 = vld [vmem:[%s956_s24 + $0x4c] ss:$16 sps:$4 sm:$0xff]  }
  0x2d   : > { %333 = vperm.xlu0 %739, %v330_v19   ;;  %675 = vmatprep.subr.msk.bf16.mxu1 %vm430_vm0, %v672_v23  ;;  %v438_v29 = vsel %vm430_vm0, %v671_v25, 0  ;;  %v750_v32 = vld [vmem:[%s956_s24 + $0x44] ss:$16 sps:$4 sm:$0xff]   ;;  %v754_v34 = vld [vmem:[%s956_s24 + $0x40] ss:$16 sps:$4 sm:$0xff]   ;;  %s651_s28 = sshll.u32 %s1024_s18, 3 }
  0x2e   : > { %673 = vmatprep.subr.msk.bf16.mxu0 %vm430_vm0, %v670_v22  ;;  %v432_v28 = vsel %vm430_vm0, %v669_v24, 0  ;;  %491 = vmatpush1.bf16.msra.mxu1 %v438_v29  ;;  %v755_v35 = vld [vmem:[%s956_s24 + $0x48] ss:$16 sps:$4 sm:$0xff]   ;;  %v756_v36 = vld [vmem:[%s956_s24 + $0x24] ss:$16 sps:$4 sm:$0xff]   ;;  %s306_s29 = sadd.s32 %s651_s28, %s1026_s26 }
  0x2f   : > { %450 = vmatpush1.bf16.msra.mxu0 %v432_v28  ;;  %492 = vmatprep.subr.bf16.mxu1 %v746_v27  ;;  %v758_v37 = vld [vmem:[%s956_s24 + $0x2c] ss:$16 sps:$4 sm:$0xff]   ;;  %v760_v38 = vld [vmem:[%s956_s24 + $0x20] ss:$16 sps:$4 sm:$0xff]   ;;  %v761_v39 = vld [vmem:[%s956_s24 + $0x28] ss:$16 sps:$4 sm:$0xff]  }
  0x30   : > { %451 = vmatprep.subr.bf16.mxu0 %v744_v26  ;;  %v762_v40 = vld [vmem:[%s956_s24 + $0x4] ss:$16 sps:$4 sm:$0xff]   ;;  %v764_v41 = vld [vmem:[%s956_s24 + $0xc] ss:$16 sps:$4 sm:$0xff]   ;;  %v766_v42 = vld [vmem:[%s956_s24] ss:$16 sps:$4 sm:$0xff]  }
  0x31   : > { %v767_v43 = vld [vmem:[%s956_s24 + $0x8] ss:$16 sps:$4 sm:$0xff]   ;;  %v311_v44 = vld [vmem:[%s1006_s0] sm:$0xf]  ;;  %s652_s30 = sshll.u32 %s306_s29, 3 }
  0x32   : > { %493 = vmatpush1.bf16.msra.mxu1 %v749_v31  ;;  %s308_s7 = scalar_lea.vmem %s1010_s4, %s652_s30 }
  0x33   : > { %452 = vmatpush1.bf16.msra.mxu0 %v748_v30  ;;  %494 = vmatprep.subr.bf16.mxu1 %v752_v33 }
  0x34   : > { %453 = vmatprep.subr.bf16.mxu0 %v750_v32 }
  0x36   : > { %495 = vmatpush1.bf16.msra.mxu1 %v755_v35 }
  0x37   : > { %454 = vmatpush1.bf16.msra.mxu0 %v754_v34  ;;  %496 = vmatprep.subr.bf16.mxu1 %v758_v37 }
  0x38   : > { %455 = vmatprep.subr.bf16.mxu0 %v756_v36 }
  0x3a   : > { %497 = vmatpush1.bf16.msra.mxu1 %v761_v39 }
  0x3b   : > { %456 = vmatpush1.bf16.msra.mxu0 %v760_v38  ;;  %498 = vmatprep.subr.bf16.mxu1 %v764_v41 }
  0x3c   : > { %457 = vmatprep.subr.bf16.mxu0 %v762_v40 }
  0x3e   : > { %499 = vmatpush1.bf16.msra.mxu1 %v767_v43 }
  0x3f   : > { %458 = vmatpush1.bf16.msra.mxu0 %v766_v42 }
  0x41   : > { %676 = vmatmul.mubr.msk.bf16.vlgmr.msra.gmra.mxu1 %vm426_vm1, %v311_v44 }
  0x42   : > { %674 = vmatmul.mubr.msk.bf16.vlgmr.msra.gmra.mxu0 %vm426_vm1, %v311_v44 }
  0xa8   : > { %v334_v45 = vpop.permute.xlu0 %333 }
 0x101   : > { %v518_v47 = vpop.f32.mrf.mxu1 }
 0x102   : > { %v477_v46 = vpop.f32.mrf.mxu0  ;;  %v519_v49 = vadd.f32 %v518_v47, %v334_v45 }
 0x103   : > { %v478_v48 = vadd.f32 %v477_v46, %v334_v45  ;;  %v520_v51 = vpop.f32.mrf.mxu1 }
 0x104   : > { %v479_v50 = vpop.f32.mrf.mxu0  ;;  %527 = vst [vmem:[%s308_s7 + $0x10] sm:$0xff] %v519_v49  ;;  %v521_v53 = vadd.f32 %v520_v51, %v334_v45 }
 0x105   : > { %525 = vst [vmem:[%s308_s7] sm:$0xff] %v478_v48  ;;  %v480_v52 = vadd.f32 %v479_v50, %v334_v45  ;;  %v522_v55 = vpop.f32.mrf.mxu1 }
 0x106   : > { %v481_v54 = vpop.f32.mrf.mxu0  ;;  %528 = vst [vmem:[%s308_s7 + $0x18] sm:$0xff] %v521_v53 }
 0x107   : > { %526 = vst [vmem:[%s308_s7 + $0x8] sm:$0xff] %v480_v52  ;;  %v523_v57 = vpop.f32.mrf.mxu1 }
 0x108   : > { %v482_v56 = vpop.f32.mrf.mxu0 }
 0x109 PF: > { %s14_s21 = sadd.s32 1, %s822_s21   ;;  %s1011_s15 = smov %s802_s16 }
 0x10a   : > { %p11_p12 = scmp.ge.s32.totalorder %s14_s21, 6   ;;  %s1012_s16 = smov %s901_s27 }
 0x10b   : > { %s1013_s17 = smov %s814_s19  ;;  %s1014_s18 = smov %s818_s20 }
 0x10c   : > { %s1015_s19 = smov %s1018_s3  ;;  %s1016_s20 = smov %s1022_s22 }
 0x10d   :  { %13 = sbr.rel (!%p11_p12) target bundleno = 4 (0x4), region = 97 }

// kernel: recurrent_projection.22
= control target key start
LH: loop header
LB: loop body
LE: loop exit
PB: predicated region body
PF: predicated region fallthrough
CT: control target
= control target key end

     0   :  { %s917_s15 = smov 0   ;;  %s919_s16 = smov 0   ;;  %s1010_s0 = inlined_call_operand.vmem [shape: bf16[1,8,288], index: 0, kind: input, shape index: {}]   ;;  %s1011_s1 = inlined_call_operand.vmem [shape: bf16[2,288,256], index: 1, kind: input, shape index: {}]   ;;  %s1012_s2 = inlined_call_operand.vmem [shape: f32[8,1], index: 2, kind: input, shape index: {}]   ;;  %s1013_s3 = inlined_call_operand.vmem [shape: f32[8,1], index: 3, kind: input, shape index: {}]   ;;  %s1014_s4 = inlined_call_operand.vmem [shape: f32[2,8,256], index: 4, kind: output, shape index: {}]  }
   0x1   :  { %s921_s17 = smov 0  }
   0x2 LB: > { %s33_s18 = sadd.s32 1, %s885_s16  ;;  %p736_p0 = scmp.ge.s32.totalorder %s889_s17, 1  ;;  %s889_s17 = sphi %s921_s17, %s14_s17   ;;  %s885_s16 = sphi %s919_s16, %s1016_s16   ;;  %s881_s15 = sphi %s917_s15, %s1015_s15  }
   0x3   : > { %p35_p1 = scmp.ge.s32.totalorder %s33_s18, 2  ;;  %p209_p2 = scmp.lt.s32.totalorder %s889_s17, 3 }
   0x5   : > { %s1018_s18 = smov (%p35_p1, %s33_s18), 0  ;;  %p210_p3 = pnand %p736_p0, %p209_p2 }
   0x6   : > { %p261_p4 = scmp.lt.s32.totalorder (!%p210_p3), %s881_s15, 1 }
   0x7   : > { %213 = sbr.rel (%p210_p3) target bundleno = 284 (0x11c), region = 36 }
   0xc   : > { %v891_v0 = vmov 0   ;;  %v938_v1 = vld [vmem:[%s1010_s0] sm:$0xff]  ;;  %s1020_s15 = smov (!%p261_p4, %s881_s15), 1  ;;  %v863_v24 = vld [vmem:[%s1010_s0 + $0x8] ss:$0 sps:$4 sm:$0xff]   ;;  %vm520_vm0 = vcmask 261120  }
   0xd   : > { %597 = vmatprep.mubr.bf16.mxu1 %v891_v0  ;;  %809 = vset.pattern.permute.xlu0 %v891_v0  ;;  %v324_v2 = vld [vmem:[%s1012_s2] sm:$0xff]  ;;  %v741_v3 = vcombine.high %v938_v1, %v938_v1  ;;  %s783_s25 = smul.u32 288, %s1020_s15  ;;  %v740_v42 = vcombine.low %v938_v1, %v938_v1  ;;  %s782_s5 = sshll.u32 %s1020_s15, 4 }
   0xe   : > { %327 = vperm.xlu0 %809, %v324_v2   ;;  %v608_v4 = vld [vmem:[%s1013_s3] sm:$0xff]  ;;  %s283_s8 = scalar_lea.vmem %s1014_s4, %s782_s5 }
   0xf   : > { %556 = vmatprep.mubr.bf16.mxu0 %v741_v3  ;;  %s954_s28 = scalar_lea.vmem %s1011_s1, %s783_s25 }
  0x10   : > { %v810_v5 = vld [vmem:[%s954_s28 + $0x74] ss:$8 sps:$4 sm:$0xff]   ;;  %v812_v6 = vld [vmem:[%s954_s28 + $0x70] ss:$8 sps:$4 sm:$0xff]   ;;  %v813_v7 = vld [vmem:[%s954_s28 + $0x64] ss:$8 sps:$4 sm:$0xff]  }
  0x11   : > { %524 = vmatprep.subr.bf16.mxu0 %v810_v5  ;;  %v815_v8 = vld [vmem:[%s954_s28 + $0x60] ss:$8 sps:$4 sm:$0xff]   ;;  %v816_v9 = vld [vmem:[%s954_s28 + $0x54] ss:$8 sps:$4 sm:$0xff]   ;;  %v818_v10 = vld [vmem:[%s954_s28 + $0x50] ss:$8 sps:$4 sm:$0xff]  }
  0x12   : > { %611 = vperm.xlu0 %809, %v608_v4   ;;  %525 = vmatpush1.bf16.msra.mxu0 %v812_v6  ;;  %v819_v11 = vld [vmem:[%s954_s28 + $0x44] ss:$8 sps:$4 sm:$0xff]   ;;  %v821_v12 = vld [vmem:[%s954_s28 + $0x40] ss:$8 sps:$4 sm:$0xff]   ;;  %v822_v13 = vld [vmem:[%s954_s28 + $0x34] ss:$8 sps:$4 sm:$0xff]  }
  0x13   : > { %526 = vmatprep.subr.bf16.mxu0 %v813_v7  ;;  %v824_v14 = vld [vmem:[%s954_s28 + $0x30] ss:$8 sps:$4 sm:$0xff]   ;;  %v825_v15 = vld [vmem:[%s954_s28 + $0x24] ss:$8 sps:$4 sm:$0xff]   ;;  %v827_v16 = vld [vmem:[%s954_s28 + $0x20] ss:$8 sps:$4 sm:$0xff]  }
  0x14   : > { %v851_v17 = vld [vmem:[%s954_s28 + $0x114] ss:$8 sps:$4 sm:$0xff]   ;;  %v854_v18 = vld [vmem:[%s954_s28 + $0x110] ss:$8 sps:$4 sm:$0xff]   ;;  %v857_v20 = vld [vmem:[%s954_s28 + $0x104] ss:$8 sps:$4 sm:$0xff]  }
  0x15   : > { %v828_v19 = vld [vmem:[%s954_s28 + $0x14] ss:$8 sps:$4 sm:$0xff]   ;;  %577 = vmatprep.subr.bf16.mxu1 %v851_v17  ;;  %v860_v21 = vld [vmem:[%s954_s28 + $0x100] ss:$8 sps:$4 sm:$0xff]   ;;  %v830_v22 = vld [vmem:[%s954_s28 + $0x10] ss:$8 sps:$4 sm:$0xff]  }
  0x16   : > { %527 = vmatpush1.bf16.msra.mxu0 %v815_v8  ;;  %578 = vmatpush1.bf16.msra.mxu1 %v854_v18  ;;  %v831_v23 = vld [vmem:[%s954_s28 + $0x4] ss:$8 sps:$4 sm:$0xff]   ;;  %v833_v25 = vld [vmem:[%s954_s28] ss:$8 sps:$4 sm:$0xff]   ;;  %v834_v26 = vld [vmem:[%s954_s28 + $0xf4] ss:$8 sps:$4 sm:$0xff]  }
  0x17   : > { %528 = vmatprep.subr.bf16.mxu0 %v816_v9  ;;  %579 = vmatprep.subr.bf16.mxu1 %v857_v20  ;;  %v836_v27 = vld [vmem:[%s954_s28 + $0xf0] ss:$8 sps:$4 sm:$0xff]   ;;  %v837_v28 = vld [vmem:[%s954_s28 + $0xe4] ss:$8 sps:$4 sm:$0xff]   ;;  %v839_v29 = vld [vmem:[%s954_s28 + $0xe0] ss:$8 sps:$4 sm:$0xff]  }
  0x18   : > { %v840_v30 = vld [vmem:[%s954_s28 + $0xd4] ss:$8 sps:$4 sm:$0xff]   ;;  %v842_v31 = vld [vmem:[%s954_s28 + $0xd0] ss:$8 sps:$4 sm:$0xff]   ;;  %v843_v32 = vld [vmem:[%s954_s28 + $0xc4] ss:$8 sps:$4 sm:$0xff]  }
  0x19   : > { %v845_v33 = vld [vmem:[%s954_s28 + $0xc0] ss:$8 sps:$4 sm:$0xff]   ;;  %v846_v34 = vld [vmem:[%s954_s28 + $0xb4] ss:$8 sps:$4 sm:$0xff]   ;;  %v848_v35 = vld [vmem:[%s954_s28 + $0xb0] ss:$8 sps:$4 sm:$0xff]  }
  0x1a   : > { %529 = vmatpush1.bf16.msra.mxu0 %v818_v10  ;;  %580 = vmatpush1.bf16.msra.mxu1 %v860_v21  ;;  %v849_v36 = vld [vmem:[%s954_s28 + $0xa4] ss:$8 sps:$4 sm:$0xff]   ;;  %v853_v37 = vld [vmem:[%s954_s28 + $0xa0] ss:$8 sps:$4 sm:$0xff]   ;;  %v855_v38 = vld [vmem:[%s954_s28 + $0x94] ss:$8 sps:$4 sm:$0xff]  }
  0x1b   : > { %530 = vmatprep.subr.bf16.mxu0 %v819_v11  ;;  %v859_v39 = vld [vmem:[%s954_s28 + $0x90] ss:$8 sps:$4 sm:$0xff]   ;;  %v861_v40 = vld [vmem:[%s954_s28 + $0x84] ss:$8 sps:$4 sm:$0xff]   ;;  %v864_v41 = vld [vmem:[%s954_s28 + $0x80] ss:$8 sps:$4 sm:$0xff]  }
  0x1d   : > { %779 = vmatmul.mubr.msk.bf16.vlgmr.msra.gmra.mxu1 %vm520_vm0, %v863_v24 }
  0x1e   : > { %531 = vmatpush1.bf16.msra.mxu0 %v821_v12 }
  0x1f   : > { %532 = vmatprep.subr.bf16.mxu0 %v822_v13 }
  0x22   : > { %533 = vmatpush1.bf16.msra.mxu0 %v824_v14 }
  0x23   : > { %534 = vmatprep.subr.bf16.mxu0 %v825_v15 }
  0x26   : > { %535 = vmatpush1.bf16.msra.mxu0 %v827_v16 }
  0x27   : > { %536 = vmatprep.subr.bf16.mxu0 %v828_v19 }
  0x2a   : > { %537 = vmatpush1.bf16.msra.mxu0 %v830_v22 }
  0x2b   : > { %538 = vmatprep.subr.bf16.mxu0 %v831_v23 }
  0x2e   : > { %539 = vmatpush1.bf16.msra.mxu0 %v833_v25 }
  0x2f   : > { %540 = vmatprep.subr.bf16.mxu0 %v834_v26 }
  0x32   : > { %541 = vmatpush2.bf16.msra.mxu0 %v836_v27 }
  0x33   : > { %542 = vmatprep.subr.bf16.mxu0 %v837_v28 }
  0x36   : > { %543 = vmatpush2.bf16.msra.mxu0 %v839_v29 }
  0x37   : > { %544 = vmatprep.subr.bf16.mxu0 %v840_v30 }
  0x3a   : > { %545 = vmatpush2.bf16.msra.mxu0 %v842_v31 }
  0x3b   : > { %546 = vmatprep.subr.bf16.mxu0 %v843_v32 }
  0x3e   : > { %547 = vmatpush2.bf16.msra.mxu0 %v845_v33 }
  0x3f   : > { %548 = vmatprep.subr.bf16.mxu0 %v846_v34 }
  0x42   : > { %549 = vmatpush2.bf16.msra.mxu0 %v848_v35 }
  0x43   : > { %550 = vmatprep.subr.bf16.mxu0 %v849_v36 }
  0x46   : > { %551 = vmatpush2.bf16.msra.mxu0 %v853_v37 }
  0x47   : > { %552 = vmatprep.subr.bf16.mxu0 %v855_v38 }
  0x4a   : > { %553 = vmatpush2.bf16.msra.mxu0 %v859_v39 }
  0x4b   : > { %554 = vmatprep.subr.bf16.mxu0 %v861_v40 }
  0x4e   : > { %555 = vmatpush2.bf16.msra.mxu0 %v864_v41 }
  0x51   : > { %557 = vmatmul.mubr.bf16.vlgmr.msra.gmra.mxu0 %v740_v42 }
  0x89   : > { %v328_v47 = vpop.permute.xlu0 %327 }
  0x8d   : > { %v612_v53 = vpop.permute.xlu0 %611 }
  0xdd   : > { %v599_v43 = vpop.f32.mrf.mxu1 }
  0xdf   : > { %v601_v44 = vpop.f32.mrf.mxu1 }
  0xe1   : > { %v603_v45 = vpop.f32.mrf.mxu1 }
  0xe3   : > { %v604_v46 = vpop.f32.mrf.mxu1 }
 0x111   : > { %v558_v48 = vpop.f32.mrf.mxu0 }
 0x112   : > { %v559_v49 = vadd.f32 %v558_v48, %v328_v47 }
 0x113   : > { %v560_v50 = vpop.f32.mrf.mxu0 }
 0x114   : > { %v600_v51 = vadd.f32 %v599_v43, %v559_v49  ;;  %v561_v52 = vadd.f32 %v560_v50, %v328_v47 }
 0x115   : > { %v562_v54 = vpop.f32.mrf.mxu0 }
 0x116   : > { %vm606_vm1 = vcmp.gt.f32.partialorder %v600_v51, 0.0  ;;  %v614_v55 = vmul.f32 %v612_v53, %v600_v51  ;;  %v602_v56 = vadd.f32 %v601_v44, %v561_v52 }
 0x117   : > { %v563_v57 = vpop.f32.mrf.mxu0 }
 0x118   : > { %v616_v58 = vsel %vm606_vm1, %v600_v51, %v614_v55  ;;  %vm607_vm2 = vcmp.gt.f32.partialorder %v602_v56, 0.0  ;;  %v615_v59 = vmul.f32 %v612_v53, %v602_v56 }
 0x119   : > { %618 = vst [vmem:[%s283_s8] sm:$0xff] %v616_v58 }
 0x11a   : > { %v617_v60 = vsel %vm607_vm2, %v602_v56, %v615_v59 }
 0x11b   : > { %619 = vst [vmem:[%s283_s8 + $0x8] sm:$0xff] %v617_v60 }
 0x11c PF: > { %s14_s17 = sadd.s32 1, %s889_s17   ;;  %s1015_s15 = smov %s885_s16 }
 0x11d   : > { %p11_p5 = scmp.ge.s32.totalorder %s14_s17, 4   ;;  %s1016_s16 = smov %s1018_s18 }
 0x11f   :  { %13 = sbr.rel (!%p11_p5) target bundleno = 2 (0x2), region = 69 }

// kernel: recurrent_projection.24
= control target key start
LH: loop header
LB: loop body
LE: loop exit
PB: predicated region body
PF: predicated region fallthrough
CT: control target
= control target key end

     0   :  { %s926_s15 = smov 0   ;;  %s928_s16 = smov 0   ;;  %s1019_s0 = inlined_call_operand.vmem [shape: bf16[1,8,288], index: 0, kind: input, shape index: {}]   ;;  %s1020_s1 = inlined_call_operand.vmem [shape: bf16[2,288,256], index: 1, kind: input, shape index: {}]   ;;  %s1021_s2 = inlined_call_operand.vmem [shape: f32[8,1], index: 2, kind: input, shape index: {}]   ;;  %s1022_s3 = inlined_call_operand.vmem [shape: f32[8,1], index: 3, kind: input, shape index: {}]   ;;  %s1023_s4 = inlined_call_operand.vmem [shape: bf16[2,8,256], index: 4, kind: output, shape index: {}]  }
   0x1   :  { %s930_s17 = smov 0  }
   0x2 LB: > { %s33_s18 = sadd.s32 1, %s894_s16  ;;  %p743_p0 = scmp.ge.s32.totalorder %s898_s17, 1  ;;  %s898_s17 = sphi %s930_s17, %s14_s17   ;;  %s894_s16 = sphi %s928_s16, %s1025_s16   ;;  %s890_s15 = sphi %s926_s15, %s1024_s15  }
   0x3   : > { %p35_p1 = scmp.ge.s32.totalorder %s33_s18, 2  ;;  %p209_p2 = scmp.lt.s32.totalorder %s898_s17, 3 }
   0x5   : > { %s1027_s18 = smov (%p35_p1, %s33_s18), 0  ;;  %p210_p3 = pnand %p743_p0, %p209_p2 }
   0x6   : > { %p261_p4 = scmp.lt.s32.totalorder (!%p210_p3), %s890_s15, 1 }
   0x7   : > { %213 = sbr.rel (%p210_p3) target bundleno = 286 (0x11e), region = 36 }
   0xc   : > { %v900_v0 = vmov 0   ;;  %v947_v1 = vld [vmem:[%s1019_s0] sm:$0xff]  ;;  %s1029_s15 = smov (!%p261_p4, %s890_s15), 1  ;;  %v872_v24 = vld [vmem:[%s1019_s0 + $0x8] ss:$0 sps:$4 sm:$0xff]   ;;  %vm520_vm0 = vcmask 261120  }
   0xd   : > { %597 = vmatprep.mubr.bf16.mxu1 %v900_v0  ;;  %818 = vset.pattern.permute.xlu0 %v900_v0  ;;  %v324_v2 = vld [vmem:[%s1021_s2] sm:$0xff]  ;;  %v748_v3 = vcombine.high %v947_v1, %v947_v1  ;;  %s792_s25 = smul.u32 288, %s1029_s15  ;;  %v747_v42 = vcombine.low %v947_v1, %v947_v1  ;;  %s790_s5 = sshll.u32 %s1029_s15, 3 }
   0xe   : > { %327 = vperm.xlu0 %818, %v324_v2   ;;  %v608_v4 = vld [vmem:[%s1022_s3] sm:$0xff]  ;;  %s283_s8 = scalar_lea.vmem %s1023_s4, %s790_s5 }
   0xf   : > { %556 = vmatprep.mubr.bf16.mxu0 %v748_v3  ;;  %s963_s28 = scalar_lea.vmem %s1020_s1, %s792_s25 }
  0x10   : > { %v819_v5 = vld [vmem:[%s963_s28 + $0x74] ss:$8 sps:$4 sm:$0xff]   ;;  %v821_v6 = vld [vmem:[%s963_s28 + $0x70] ss:$8 sps:$4 sm:$0xff]   ;;  %v822_v7 = vld [vmem:[%s963_s28 + $0x64] ss:$8 sps:$4 sm:$0xff]  }
  0x11   : > { %524 = vmatprep.subr.bf16.mxu0 %v819_v5  ;;  %v824_v8 = vld [vmem:[%s963_s28 + $0x60] ss:$8 sps:$4 sm:$0xff]   ;;  %v825_v9 = vld [vmem:[%s963_s28 + $0x54] ss:$8 sps:$4 sm:$0xff]   ;;  %v827_v10 = vld [vmem:[%s963_s28 + $0x50] ss:$8 sps:$4 sm:$0xff]  }
  0x12   : > { %611 = vperm.xlu0 %818, %v608_v4   ;;  %525 = vmatpush1.bf16.msra.mxu0 %v821_v6  ;;  %v828_v11 = vld [vmem:[%s963_s28 + $0x44] ss:$8 sps:$4 sm:$0xff]   ;;  %v830_v12 = vld [vmem:[%s963_s28 + $0x40] ss:$8 sps:$4 sm:$0xff]   ;;  %v831_v13 = vld [vmem:[%s963_s28 + $0x34] ss:$8 sps:$4 sm:$0xff]  }
  0x13   : > { %526 = vmatprep.subr.bf16.mxu0 %v822_v7  ;;  %v833_v14 = vld [vmem:[%s963_s28 + $0x30] ss:$8 sps:$4 sm:$0xff]   ;;  %v834_v15 = vld [vmem:[%s963_s28 + $0x24] ss:$8 sps:$4 sm:$0xff]   ;;  %v836_v16 = vld [vmem:[%s963_s28 + $0x20] ss:$8 sps:$4 sm:$0xff]  }
  0x14   : > { %v860_v17 = vld [vmem:[%s963_s28 + $0x114] ss:$8 sps:$4 sm:$0xff]   ;;  %v863_v18 = vld [vmem:[%s963_s28 + $0x110] ss:$8 sps:$4 sm:$0xff]   ;;  %v866_v20 = vld [vmem:[%s963_s28 + $0x104] ss:$8 sps:$4 sm:$0xff]  }
  0x15   : > { %v837_v19 = vld [vmem:[%s963_s28 + $0x14] ss:$8 sps:$4 sm:$0xff]   ;;  %577 = vmatprep.subr.bf16.mxu1 %v860_v17  ;;  %v869_v21 = vld [vmem:[%s963_s28 + $0x100] ss:$8 sps:$4 sm:$0xff]   ;;  %v839_v22 = vld [vmem:[%s963_s28 + $0x10] ss:$8 sps:$4 sm:$0xff]  }
  0x16   : > { %527 = vmatpush1.bf16.msra.mxu0 %v824_v8  ;;  %578 = vmatpush1.bf16.msra.mxu1 %v863_v18  ;;  %v840_v23 = vld [vmem:[%s963_s28 + $0x4] ss:$8 sps:$4 sm:$0xff]   ;;  %v842_v25 = vld [vmem:[%s963_s28] ss:$8 sps:$4 sm:$0xff]   ;;  %v843_v26 = vld [vmem:[%s963_s28 + $0xf4] ss:$8 sps:$4 sm:$0xff]  }
  0x17   : > { %528 = vmatprep.subr.bf16.mxu0 %v825_v9  ;;  %579 = vmatprep.subr.bf16.mxu1 %v866_v20  ;;  %v845_v27 = vld [vmem:[%s963_s28 + $0xf0] ss:$8 sps:$4 sm:$0xff]   ;;  %v846_v28 = vld [vmem:[%s963_s28 + $0xe4] ss:$8 sps:$4 sm:$0xff]   ;;  %v848_v29 = vld [vmem:[%s963_s28 + $0xe0] ss:$8 sps:$4 sm:$0xff]  }
  0x18   : > { %v849_v30 = vld [vmem:[%s963_s28 + $0xd4] ss:$8 sps:$4 sm:$0xff]   ;;  %v851_v31 = vld [vmem:[%s963_s28 + $0xd0] ss:$8 sps:$4 sm:$0xff]   ;;  %v852_v32 = vld [vmem:[%s963_s28 + $0xc4] ss:$8 sps:$4 sm:$0xff]  }
  0x19   : > { %v854_v33 = vld [vmem:[%s963_s28 + $0xc0] ss:$8 sps:$4 sm:$0xff]   ;;  %v855_v34 = vld [vmem:[%s963_s28 + $0xb4] ss:$8 sps:$4 sm:$0xff]   ;;  %v857_v35 = vld [vmem:[%s963_s28 + $0xb0] ss:$8 sps:$4 sm:$0xff]  }
  0x1a   : > { %529 = vmatpush1.bf16.msra.mxu0 %v827_v10  ;;  %580 = vmatpush1.bf16.msra.mxu1 %v869_v21  ;;  %v858_v36 = vld [vmem:[%s963_s28 + $0xa4] ss:$8 sps:$4 sm:$0xff]   ;;  %v862_v37 = vld [vmem:[%s963_s28 + $0xa0] ss:$8 sps:$4 sm:$0xff]   ;;  %v864_v38 = vld [vmem:[%s963_s28 + $0x94] ss:$8 sps:$4 sm:$0xff]  }
  0x1b   : > { %530 = vmatprep.subr.bf16.mxu0 %v828_v11  ;;  %v868_v39 = vld [vmem:[%s963_s28 + $0x90] ss:$8 sps:$4 sm:$0xff]   ;;  %v870_v40 = vld [vmem:[%s963_s28 + $0x84] ss:$8 sps:$4 sm:$0xff]   ;;  %v873_v41 = vld [vmem:[%s963_s28 + $0x80] ss:$8 sps:$4 sm:$0xff]  }
  0x1d   : > { %786 = vmatmul.mubr.msk.bf16.vlgmr.msra.gmra.mxu1 %vm520_vm0, %v872_v24 }
  0x1e   : > { %531 = vmatpush1.bf16.msra.mxu0 %v830_v12 }
  0x1f   : > { %532 = vmatprep.subr.bf16.mxu0 %v831_v13 }
  0x22   : > { %533 = vmatpush1.bf16.msra.mxu0 %v833_v14 }
  0x23   : > { %534 = vmatprep.subr.bf16.mxu0 %v834_v15 }
  0x26   : > { %535 = vmatpush1.bf16.msra.mxu0 %v836_v16 }
  0x27   : > { %536 = vmatprep.subr.bf16.mxu0 %v837_v19 }
  0x2a   : > { %537 = vmatpush1.bf16.msra.mxu0 %v839_v22 }
  0x2b   : > { %538 = vmatprep.subr.bf16.mxu0 %v840_v23 }
  0x2e   : > { %539 = vmatpush1.bf16.msra.mxu0 %v842_v25 }
  0x2f   : > { %540 = vmatprep.subr.bf16.mxu0 %v843_v26 }
  0x32   : > { %541 = vmatpush2.bf16.msra.mxu0 %v845_v27 }
  0x33   : > { %542 = vmatprep.subr.bf16.mxu0 %v846_v28 }
  0x36   : > { %543 = vmatpush2.bf16.msra.mxu0 %v848_v29 }
  0x37   : > { %544 = vmatprep.subr.bf16.mxu0 %v849_v30 }
  0x3a   : > { %545 = vmatpush2.bf16.msra.mxu0 %v851_v31 }
  0x3b   : > { %546 = vmatprep.subr.bf16.mxu0 %v852_v32 }
  0x3e   : > { %547 = vmatpush2.bf16.msra.mxu0 %v854_v33 }
  0x3f   : > { %548 = vmatprep.subr.bf16.mxu0 %v855_v34 }
  0x42   : > { %549 = vmatpush2.bf16.msra.mxu0 %v857_v35 }
  0x43   : > { %550 = vmatprep.subr.bf16.mxu0 %v858_v36 }
  0x46   : > { %551 = vmatpush2.bf16.msra.mxu0 %v862_v37 }
  0x47   : > { %552 = vmatprep.subr.bf16.mxu0 %v864_v38 }
  0x4a   : > { %553 = vmatpush2.bf16.msra.mxu0 %v868_v39 }
  0x4b   : > { %554 = vmatprep.subr.bf16.mxu0 %v870_v40 }
  0x4e   : > { %555 = vmatpush2.bf16.msra.mxu0 %v873_v41 }
  0x51   : > { %557 = vmatmul.mubr.bf16.vlgmr.msra.gmra.mxu0 %v747_v42 }
  0x89   : > { %v328_v47 = vpop.permute.xlu0 %327 }
  0x8d   : > { %v612_v53 = vpop.permute.xlu0 %611 }
  0xdd   : > { %v599_v43 = vpop.f32.mrf.mxu1 }
  0xdf   : > { %v601_v44 = vpop.f32.mrf.mxu1 }
  0xe1   : > { %v603_v45 = vpop.f32.mrf.mxu1 }
  0xe3   : > { %v604_v46 = vpop.f32.mrf.mxu1 }
 0x111   : > { %v558_v48 = vpop.f32.mrf.mxu0 }
 0x112   : > { %v559_v49 = vadd.f32 %v558_v48, %v328_v47 }
 0x113   : > { %v560_v50 = vpop.f32.mrf.mxu0 }
 0x114   : > { %v600_v51 = vadd.f32 %v599_v43, %v559_v49  ;;  %v561_v52 = vadd.f32 %v560_v50, %v328_v47 }
 0x115   : > { %v562_v54 = vpop.f32.mrf.mxu0 }
 0x116   : > { %v614_v55 = vmul.f32 %v612_v53, %v600_v51  ;;  %v602_v56 = vadd.f32 %v601_v44, %v561_v52  ;;  %vm606_vm1 = vcmp.gt.f32.partialorder %v600_v51, 0.0 }
 0x117   : > { %v563_v57 = vpop.f32.mrf.mxu0 }
 0x118   : > { %vm607_vm2 = vcmp.gt.f32.partialorder %v602_v56, 0.0  ;;  %v615_v58 = vmul.f32 %v612_v53, %v602_v56  ;;  %v616_v59 = vsel %vm606_vm1, %v600_v51, %v614_v55 }
 0x11a   : > { %v617_v60 = vsel %vm607_vm2, %v602_v56, %v615_v58 }
 0x11b   : > { %v791_v61 = vpack.c.bf16 %v617_v60, %v616_v59 }
 0x11d   : > { %626 = vst [vmem:[%s283_s8] sm:$0xff] %v791_v61 }
 0x11e PF: > { %s14_s17 = sadd.s32 1, %s898_s17   ;;  %s1024_s15 = smov %s894_s16 }
 0x11f   : > { %p11_p5 = scmp.ge.s32.totalorder %s14_s17, 4   ;;  %s1025_s16 = smov %s1027_s18 }
 0x121   :  { %13 = sbr.rel (!%p11_p5) target bundleno = 2 (0x2), region = 69 }

// kernel: recurrent_projection.25
= control target key start
LH: loop header
LB: loop body
LE: loop exit
PB: predicated region body
PF: predicated region fallthrough
CT: control target
= control target key end

     0   :  { %s634_s15 = smov 0   ;;  %s636_s16 = smov 0   ;;  %s680_s0 = inlined_call_operand.vmem [shape: bf16[1,8,72], index: 0, kind: input, shape index: {}]   ;;  %s681_s1 = inlined_call_operand.vmem [shape: bf16[2,72,256], index: 1, kind: input, shape index: {}]   ;;  %s682_s2 = inlined_call_operand.vmem [shape: f32[8,1], index: 2, kind: input, shape index: {}]   ;;  %s683_s3 = inlined_call_operand.vmem [shape: f32[8,1], index: 3, kind: input, shape index: {}]   ;;  %s684_s4 = inlined_call_operand.vmem [shape: f32[2,8,256], index: 4, kind: output, shape index: {}]  }
   0x1   :  { %s638_s17 = smov 0  }
   0x2 LB: > { %s33_s18 = sadd.s32 1, %s602_s16  ;;  %p524_p0 = scmp.ge.s32.totalorder %s606_s17, 1  ;;  %s606_s17 = sphi %s638_s17, %s14_s17   ;;  %s602_s16 = sphi %s636_s16, %s686_s16   ;;  %s598_s15 = sphi %s634_s15, %s685_s15  }
   0x3   : > { %p35_p1 = scmp.ge.s32.totalorder %s33_s18, 2  ;;  %p207_p2 = scmp.lt.s32.totalorder %s606_s17, 3 }
   0x5   : > { %s688_s18 = smov (%p35_p1, %s33_s18), 0  ;;  %p208_p3 = pnand %p524_p0, %p207_p2 }
   0x6   : > { %p256_p4 = scmp.lt.s32.totalorder (!%p208_p3), %s598_s15, 1 }
   0x7   : > { %211 = sbr.rel (%p208_p3) target bundleno = 240 (0xf0), region = 36 }
   0xc   : > { %v608_v0 = vmov 0   ;;  %v291_v1 = vld [vmem:[%s682_s2] sm:$0xff]  ;;  %s690_s15 = smov (!%p256_p4, %s598_s15), 1  ;;  %vm346_vm0 = vcmask 1043456   ;;  %vm342_vm1 = vcmask 588800  }
   0xd   : > { %385 = vmatprep.mubr.bf16.mxu0 %v608_v0  ;;  %569 = vset.pattern.permute.xlu0 %v608_v0  ;;  %v396_v2 = vld [vmem:[%s683_s3] sm:$0xff]  ;;  %s543_s23 = smul.u32 72, %s690_s15  ;;  %s542_s29 = sshll.u32 %s690_s15, 4 }
   0xe   : > { %294 = vperm.xlu0 %569, %v291_v1   ;;  %v281_v15 = vld [vmem:[%s680_s0] sm:$0xf]  ;;  %s278_s6 = scalar_lea.vmem %s684_s4, %s542_s29 }
   0xf   : > { %s267_s26 = scalar_lea.vmem %s681_s1, %s543_s23 }
  0x10   : > { %v290_v3 = vld [vmem:[%s267_s26 + $0x40] sm:$0xff]  ;;  %v572_v6 = vld [vmem:[%s267_s26 + $0x34] ss:$8 sps:$4 sm:$0xff]   ;;  %v574_v8 = vld [vmem:[%s267_s26 + $0x30] ss:$8 sps:$4 sm:$0xff]  }
  0x11   : > { %v537_v4 = vcombine.high %v290_v3, %v290_v3  ;;  %v536_v5 = vcombine.low %v290_v3, %v290_v3  ;;  %v575_v9 = vld [vmem:[%s267_s26 + $0x24] ss:$8 sps:$4 sm:$0xff]   ;;  %v577_v10 = vld [vmem:[%s267_s26 + $0x20] ss:$8 sps:$4 sm:$0xff]   ;;  %v578_v11 = vld [vmem:[%s267_s26 + $0x14] ss:$8 sps:$4 sm:$0xff]  }
  0x12   : > { %399 = vperm.xlu0 %569, %v396_v2   ;;  %v580_v12 = vld [vmem:[%s267_s26 + $0x10] ss:$8 sps:$4 sm:$0xff]   ;;  %v581_v13 = vld [vmem:[%s267_s26 + $0x4] ss:$8 sps:$4 sm:$0xff]   ;;  %v583_v14 = vld [vmem:[%s267_s26] ss:$8 sps:$4 sm:$0xff]  }
  0x13   : > { %538 = vmatprep.subr.msk.bf16.mxu0 %vm346_vm0, %v537_v4  ;;  %v348_v7 = vsel %vm346_vm0, %v536_v5, 0 }
  0x14   : > { %360 = vmatpush1.bf16.msra.mxu0 %v348_v7 }
  0x15   : > { %361 = vmatprep.subr.bf16.mxu0 %v572_v6 }
  0x18   : > { %362 = vmatpush1.bf16.msra.mxu0 %v574_v8 }
  0x19   : > { %363 = vmatprep.subr.bf16.mxu0 %v575_v9 }
  0x1c   : > { %364 = vmatpush1.bf16.msra.mxu0 %v577_v10 }
  0x1d   : > { %365 = vmatprep.subr.bf16.mxu0 %v578_v11 }
  0x20   : > { %366 = vmatpush1.bf16.msra.mxu0 %v580_v12 }
  0x21   : > { %367 = vmatprep.subr.bf16.mxu0 %v581_v13 }
  0x24   : > { %368 = vmatpush1.bf16.msra.mxu0 %v583_v14 }
  0x27   : > { %539 = vmatmul.mubr.msk.bf16.vlgmr.msra.gmra.mxu0 %vm342_vm1, %v281_v15 }
  0x89   : > { %v295_v16 = vpop.permute.xlu0 %294 }
  0x8d   : > { %v400_v19 = vpop.permute.xlu0 %399 }
  0xe7   : > { %v387_v17 = vpop.f32.mrf.mxu0 }
  0xe8   : > { %v388_v18 = vadd.f32 %v387_v17, %v295_v16 }
  0xe9   : > { %v389_v20 = vpop.f32.mrf.mxu0 }
  0xea   : > { %vm394_vm2 = vcmp.gt.f32.partialorder %v388_v18, 0.0  ;;  %v402_v21 = vmul.f32 %v400_v19, %v388_v18  ;;  %v390_v22 = vadd.f32 %v389_v20, %v295_v16 }
  0xeb   : > { %v391_v23 = vpop.f32.mrf.mxu0 }
  0xec   : > { %v404_v24 = vsel %vm394_vm2, %v388_v18, %v402_v21  ;;  %vm395_vm3 = vcmp.gt.f32.partialorder %v390_v22, 0.0  ;;  %v403_v25 = vmul.f32 %v400_v19, %v390_v22 }
  0xed   : > { %406 = vst [vmem:[%s278_s6] sm:$0xff] %v404_v24  ;;  %v392_v26 = vpop.f32.mrf.mxu0 }
  0xee   : > { %v405_v27 = vsel %vm395_vm3, %v390_v22, %v403_v25 }
  0xef   : > { %407 = vst [vmem:[%s278_s6 + $0x8] sm:$0xff] %v405_v27 }
  0xf0 PF: > { %s14_s17 = sadd.s32 1, %s606_s17   ;;  %s685_s15 = smov %s602_s16 }
  0xf1   : > { %p11_p5 = scmp.ge.s32.totalorder %s14_s17, 4   ;;  %s686_s16 = smov %s688_s18 }
  0xf3   :  { %13 = sbr.rel (!%p11_p5) target bundleno = 2 (0x2), region = 69 }

</bundles_post_ra>
